<compile_context>
chip_gen: v6e
topology: v6e:2x2x1
jax: 0.10.0
libtpu: 0.0.40
codegen_flags: <defaults>
</compile_context>

<pallas_src>
import math

import jax
import jax.numpy as jnp
from jax import lax
from jax.experimental import pallas as pl
from jax.experimental.pallas import tpu as pltpu


def _gelu_exact(x):
    # PyTorch nn.GELU() default: exact erf formulation (kept for semantic parity).
    return 0.5 * x * (1.0 + lax.erf(x * (1.0 / math.sqrt(2.0))))


def _ceil_to(x, m):
    return ((x + m - 1) // m) * m


# --------------------------- Kernel 1: conv1 as GEMM ---------------------------

def _conv1_kernel(x_ref, w_ref, b_ref, o_ref):
    # x: (rt, 16) bf16 im2col patches, w: (16, 64) bf16, b: (1, 64) f32.
    h = jnp.dot(x_ref[...], w_ref[...], preferred_element_type=jnp.float32)
    h = _gelu_exact(h + b_ref[...])
    o_ref[...] = h.astype(o_ref.dtype)


# ------------------ Kernel 2: conv2 GEMM + GELU + projector --------------------

def _conv2_proj_kernel(p2_ref, w2_ref, b2_ref, w3_ref, b3_ref, o_ref, acc_ref):
    p = pl.program_id(1)

    @pl.when(p == 0)
    def _():
        acc_ref[...] = jnp.zeros_like(acc_ref)

    x = p2_ref[0]                                            # (bt, 1024) bf16
    h = jnp.dot(x, w2_ref[...], preferred_element_type=jnp.float32)
    h = _gelu_exact(h + b2_ref[...])                         # (bt, 128) f32
    acc_ref[...] += jnp.dot(h.astype(jnp.bfloat16), w3_ref[0],
                            preferred_element_type=jnp.float32)

    @pl.when(p == pl.num_programs(1) - 1)
    def _():
        o_ref[...] = (acc_ref[...] + b3_ref[...]).astype(o_ref.dtype)


# ----------------------------------- Wrapper -----------------------------------

def mhd_image_processor(x, params, *, batch_tile=256, row_tile=2048):
    """x: (B, 1, H, W) float32 (H, W multiples of 4). Returns (B, common_dim) f32."""
    B, Cin, H, W = x.shape
    assert Cin == 1 and H % 4 == 0 and W % 4 == 0
    C1, C2, KH, KW = 64, 128, 4, 4
    OH1, OW1 = H // 2, W // 2
    OH2, OW2 = OH1 // 2, OW1 // 2
    P = OH2 * OW2                     # spatial positions after conv2
    K1 = Cin * KH * KW                # 16
    K2 = C1 * KH * KW                 # 1024
    common_dim = params["proj_w"].shape[0]
    dim = C2 * OH2 * OW2
    assert params["proj_w"].shape == (common_dim, dim)

    f32, bf16 = jnp.float32, jnp.bfloat16

    # ---- weight layout prep (PyTorch layouts -> GEMM layouts; done once) ----
    w1r = params["conv1_w"].transpose(2, 3, 1, 0).reshape(K1, C1).astype(bf16)
    b1r = params["conv1_b"].reshape(1, C1).astype(f32)
    w2r = params["conv2_w"].transpose(2, 3, 1, 0).reshape(K2, C2).astype(bf16)
    b2r = params["conv2_b"].reshape(1, C2).astype(f32)
    Cp = _ceil_to(max(common_dim, 128), 128)              # lane-dense projector out
    w3r = (params["proj_w"].reshape(common_dim, C2, OH2, OW2)
           .transpose(2, 3, 1, 0).reshape(P, C2, common_dim))
    w3p = jnp.pad(w3r, ((0, 0), (0, 0), (0, Cp - common_dim))).astype(bf16)
    b3p = jnp.pad(params["proj_b"], (0, Cp - common_dim)).reshape(1, Cp).astype(f32)

    # ---- conv1 im2col (wrapper-side layout plumbing only) ----
    xp = jnp.pad(x[:, 0], ((0, 0), (1, 1), (1, 1)))
    p1 = jnp.stack([xp[:, kh:kh + 2 * OH1:2, kw:kw + 2 * OW1:2]
                    for kh in range(KH) for kw in range(KW)], axis=-1)
    p1 = p1.reshape(B * OH1 * OW1, K1).astype(bf16)

    R1 = B * OH1 * OW1
    rt1 = min(_ceil_to(R1, 8), _ceil_to(row_tile, 8))
    R1p = _ceil_to(R1, rt1)
    if R1p != R1:
        p1 = jnp.pad(p1, ((0, R1p - R1), (0, 0)))

    h1_flat = pl.pallas_call(
        _conv1_kernel,
        out_shape=jax.ShapeDtypeStruct((R1p, C1), bf16),
        grid=(R1p // rt1,),
        in_specs=[
            pl.BlockSpec((rt1, K1), lambda i: (i, 0)),
            pl.BlockSpec((K1, C1), lambda i: (0, 0)),    # resident weight
            pl.BlockSpec((1, C1), lambda i: (0, 0)),     # resident bias
        ],
        out_specs=pl.BlockSpec((rt1, C1), lambda i: (i, 0)),
        compiler_params=pltpu.CompilerParams(dimension_semantics=("parallel",)),
        cost_estimate=pl.CostEstimate(
            flops=2 * R1p * K1 * C1,
            transcendentals=R1p * C1,
            bytes_accessed=2 * R1p * K1 + 2 * K1 * C1 + 4 * C1 + 2 * R1p * C1),
    )(p1, w1r, b1r)

    # ---- conv2 im2col over the conv1 feature map (layout plumbing) ----
    h1 = h1_flat[:R1].reshape(B, OH1, OW1, C1)
    h1p = jnp.pad(h1, ((0, 0), (1, 1), (1, 1), (0, 0)))
    p2 = jnp.stack([h1p[:, kh:kh + 2 * OH2:2, kw:kw + 2 * OW2:2, :]
                    for kh in range(KH) for kw in range(KW)], axis=3)
    p2 = p2.reshape(B, P, K2)
    p2 = jnp.transpose(p2, (1, 0, 2))                    # (P, B, K2): batch 2nd-minor

    bt = min(_ceil_to(B, 8), _ceil_to(batch_tile, 8))
    Bp = _ceil_to(B, bt)
    if Bp != B:
        p2 = jnp.pad(p2, ((0, 0), (0, Bp - B), (0, 0)))

    out_full = pl.pallas_call(
        _conv2_proj_kernel,
        out_shape=jax.ShapeDtypeStruct((Bp, Cp), f32),
        grid=(Bp // bt, P),                              # p (reduction) axis last
        in_specs=[
            pl.BlockSpec((1, bt, K2), lambda i, p: (p, i, 0)),
            pl.BlockSpec((K2, C2), lambda i, p: (0, 0)),     # resident conv2 weight
            pl.BlockSpec((1, C2), lambda i, p: (0, 0)),      # resident conv2 bias
            pl.BlockSpec((1, C2, Cp), lambda i, p: (p, 0, 0)),
            pl.BlockSpec((1, Cp), lambda i, p: (0, 0)),      # resident proj bias
        ],
        out_specs=pl.BlockSpec((bt, Cp), lambda i, p: (i, 0)),
        scratch_shapes=[pltpu.VMEM((bt, Cp), jnp.float32)],
        compiler_params=pltpu.CompilerParams(
            dimension_semantics=("parallel", "arbitrary")),
        cost_estimate=pl.CostEstimate(
            flops=2 * Bp * P * C2 * (K2 + Cp),
            transcendentals=Bp * P * C2,
            bytes_accessed=2 * P * Bp * K2 + 2 * K2 * C2 + 2 * P * C2 * Cp
                           + 4 * (C2 + Cp) + 4 * Bp * Cp),
    )(p2, w2r, b2r, w3p, b3p)

    return out_full[:B, :common_dim]


# -------------------------- params / pure-JAX reference ------------------------

def init_params(key, *, common_dim=64, dim=6272):
    """PyTorch-default-style uniform(+/-1/sqrt(fan_in)) init, PyTorch weight layouts."""
    def u(k, shape, fan_in):
        bound = 1.0 / math.sqrt(fan_in)
        return jax.random.uniform(k, shape, jnp.float32, -bound, bound)

    k = jax.random.split(key, 6)
    return {
        "conv1_w": u(k[0], (64, 1, 4, 4), 1 * 4 * 4),
        "conv1_b": u(k[1], (64,), 1 * 4 * 4),
        "conv2_w": u(k[2], (128, 64, 4, 4), 64 * 4 * 4),
        "conv2_b": u(k[3], (128,), 64 * 4 * 4),
        "proj_w": u(k[4], (common_dim, dim), dim),
        "proj_b": u(k[5], (common_dim,), dim),
    }


def _reference(x, p):
    """Pure-JAX f32 reference matching the PyTorch forward exactly."""
    dn = ("NCHW", "OIHW", "NCHW")
    h = lax.conv_general_dilated(x, p["conv1_w"], (2, 2), ((1, 1), (1, 1)),
                                 dimension_numbers=dn)
    h = _gelu_exact(h + p["conv1_b"][None, :, None, None])
    h = lax.conv_general_dilated(h, p["conv2_w"], (2, 2), ((1, 1), (1, 1)),
                                 dimension_numbers=dn)
    h = _gelu_exact(h + p["conv2_b"][None, :, None, None])
    h = h.reshape(h.shape[0], -1)
    return h @ p["proj_w"].T + p["proj_b"]


if __name__ == "__main__":
    key = jax.random.PRNGKey(0)
    kx, kp = jax.random.split(key)

    B, Himg, Wimg = 8, 28, 28              # MHD images are 1x28x28
    common_dim = 64
    dim = 128 * (Himg // 4) * (Wimg // 4)  # 6272 flattened conv features

    x = jax.random.normal(kx, (B, 1, Himg, Wimg), jnp.float32)
    params = init_params(kp, common_dim=common_dim, dim=dim)

    run = jax.jit(mhd_image_processor)
    out = jax.block_until_ready(run(x, params))

    ref = _reference(x, params)
    assert out.shape == (B, common_dim), out.shape
    max_err = float(jnp.max(jnp.abs(out - ref)))
    # bf16 matmul inputs (f32 accumulation) => tolerance looser than pure f32.
    assert jnp.allclose(out, ref, atol=5e-3, rtol=5e-2), max_err

    print("KERNEL_OK")
</pallas_src>

<mosaic_0001>
module attributes {stable_mosaic.version = 11 : i64} {
  func.func @_conv1_kernel(%arg0: i32, %arg1: memref<1568x16xbf16, #tpu.memory_space<vmem>>, %arg2: memref<16x64xbf16, #tpu.memory_space<vmem>>, %arg3: memref<1x64xf32, #tpu.memory_space<vmem>>, %arg4: memref<1568x64xbf16, #tpu.memory_space<vmem>>) attributes {dimension_semantics = [#tpu.dimension_semantics<parallel>], iteration_bounds = array<i64: 1>, scalar_prefetch = 0 : i64, scratch_operands = 0 : i64, tpu.core_type = #tpu.core_type<tc>, window_params = [{transform_indices = @transform_0, window_bounds = array<i64: 1568, 16>}, {pipeline_mode = #tpu.pipeline_mode<synchronous>, transform_indices = @transform_1, window_bounds = array<i64: 16, 64>}, {pipeline_mode = #tpu.pipeline_mode<synchronous>, transform_indices = @transform_2, window_bounds = array<i64: 1, 64>}, {transform_indices = @transform_3, window_bounds = array<i64: 1568, 64>}]} {
    %c0 = arith.constant 0 : index
    %c0_0 = arith.constant 0 : index
    %0 = vector.load %arg1[%c0, %c0_0] : memref<1568x16xbf16, #tpu.memory_space<vmem>>, vector<1568x16xbf16>
    %c0_1 = arith.constant 0 : index
    %c0_2 = arith.constant 0 : index
    %1 = vector.load %arg2[%c0_1, %c0_2] : memref<16x64xbf16, #tpu.memory_space<vmem>>, vector<16x64xbf16>
    %cst = arith.constant dense<0.000000e+00> : vector<1568x64xf32>
    %2 = tpu.matmul %0, %1, %cst {dimension_numbers = #tpu.dot_dimension_numbers<[1], [0], [0], [1], [0, 0, 1, 1], [], []>} : vector<1568x16xbf16>, vector<16x64xbf16>, vector<1568x64xf32> -> vector<1568x64xf32>
    %c0_3 = arith.constant 0 : index
    %c0_4 = arith.constant 0 : index
    %3 = vector.load %arg3[%c0_3, %c0_4] : memref<1x64xf32, #tpu.memory_space<vmem>>, vector<1x64xf32>
    %4 = vector.broadcast %3 : vector<1x64xf32> to vector<1568x64xf32>
    %5 = arith.addf %2, %4 : vector<1568x64xf32>
    %cst_5 = arith.constant 5.000000e-01 : f32
    %6 = vector.broadcast %cst_5 : f32 to vector<1568x64xf32>
    %7 = arith.mulf %6, %5 : vector<1568x64xf32>
    %cst_6 = arith.constant 0.707106769 : f32
    %8 = vector.broadcast %cst_6 : f32 to vector<1568x64xf32>
    %9 = arith.mulf %5, %8 : vector<1568x64xf32>
    %10 = math.erf %9 : vector<1568x64xf32>
    %cst_7 = arith.constant 1.000000e+00 : f32
    %11 = vector.broadcast %cst_7 : f32 to vector<1568x64xf32>
    %12 = arith.addf %11, %10 : vector<1568x64xf32>
    %13 = arith.mulf %7, %12 : vector<1568x64xf32>
    %14 = arith.truncf %13 : vector<1568x64xf32> to vector<1568x64xbf16>
    %c0_8 = arith.constant 0 : index
    %c0_9 = arith.constant 0 : index
    %15 = vector.load %arg4[%c0_8, %c0_9] : memref<1568x64xbf16, #tpu.memory_space<vmem>>, vector<1568x64xbf16>
    tpu.vector_store %arg4[%c0_8, %c0_9], %14 {strides = array<i32>} : memref<1568x64xbf16, #tpu.memory_space<vmem>>, vector<1568x64xbf16>,
    return
  }
  func.func @transform_0(%arg0: i32) -> (i32, i32) {
    %c0_i32 = arith.constant 0 : i32
    %c0_i32_0 = arith.constant 0 : i32
    return %arg0, %c0_i32 : i32, i32
  }
  func.func @transform_1(%arg0: i32) -> (i32, i32) {
    %c0_i32 = arith.constant 0 : i32
    %c0_i32_0 = arith.constant 0 : i32
    %c0_i32_1 = arith.constant 0 : i32
    return %c0_i32, %c0_i32_0 : i32, i32
  }
  func.func @transform_2(%arg0: i32) -> (i32, i32) {
    %c0_i32 = arith.constant 0 : i32
    %c0_i32_0 = arith.constant 0 : i32
    %c0_i32_1 = arith.constant 0 : i32
    return %c0_i32, %c0_i32_0 : i32, i32
  }
  func.func @transform_3(%arg0: i32) -> (i32, i32) {
    %c0_i32 = arith.constant 0 : i32
    %c0_i32_0 = arith.constant 0 : i32
    return %arg0, %c0_i32 : i32, i32
  }
}

module attributes {stable_mosaic.version = 11 : i64} {
  func.func @_conv2_proj_kernel(%arg0: i32, %arg1: i32, %arg2: memref<1x8x1024xbf16, #tpu.memory_space<vmem>>, %arg3: memref<1024x128xbf16, #tpu.memory_space<vmem>>, %arg4: memref<1x128xf32, #tpu.memory_space<vmem>>, %arg5: memref<1x128x128xbf16, #tpu.memory_space<vmem>>, %arg6: memref<1x128xf32, #tpu.memory_space<vmem>>, %arg7: memref<8x128xf32, #tpu.memory_space<vmem>>, %arg8: memref<8x128xf32, #tpu.memory_space<vmem>>) attributes {dimension_semantics = [#tpu.dimension_semantics<parallel>, #tpu.dimension_semantics<arbitrary>], iteration_bounds = array<i64: 1, 49>, scalar_prefetch = 0 : i64, scratch_operands = 1 : i64, tpu.core_type = #tpu.core_type<tc>, window_params = [{transform_indices = @transform_0, window_bounds = array<i64: 1, 8, 1024>}, {pipeline_mode = #tpu.pipeline_mode<synchronous>, transform_indices = @transform_1, window_bounds = array<i64: 1024, 128>}, {pipeline_mode = #tpu.pipeline_mode<synchronous>, transform_indices = @transform_2, window_bounds = array<i64: 1, 128>}, {transform_indices = @transform_3, window_bounds = array<i64: 1, 128, 128>}, {pipeline_mode = #tpu.pipeline_mode<synchronous>, transform_indices = @transform_4, window_bounds = array<i64: 1, 128>}, {transform_indices = @transform_5, window_bounds = array<i64: 8, 128>}]} {
    %c0_i32 = arith.constant 0 : i32
    %0 = arith.cmpi eq, %arg1, %c0_i32 : i32
    %1 = arith.extui %0 : i1 to i32
    %c0_i32_0 = arith.constant 0 : i32
    %2 = arith.cmpi ne, %1, %c0_i32_0 : i32
    scf.if %2 {
      %cst_19 = arith.constant 0.000000e+00 : f32
      %28 = vector.broadcast %cst_19 : f32 to vector<8x128xf32>
      %c0_20 = arith.constant 0 : index
      %c0_21 = arith.constant 0 : index
      %29 = vector.load %arg8[%c0_20, %c0_21] : memref<8x128xf32, #tpu.memory_space<vmem>>, vector<8x128xf32>
      tpu.vector_store %arg8[%c0_20, %c0_21], %28 {strides = array<i32>} : memref<8x128xf32, #tpu.memory_space<vmem>>, vector<8x128xf32>,
    } else {
    }
    %c0 = arith.constant 0 : index
    %c0_1 = arith.constant 0 : index
    %c0_2 = arith.constant 0 : index
    %3 = vector.load %arg2[%c0, %c0_1, %c0_2] : memref<1x8x1024xbf16, #tpu.memory_space<vmem>>, vector<1x8x1024xbf16>
    %4 = vector.shape_cast %3 : vector<1x8x1024xbf16> to vector<8x1024xbf16>
    %c0_3 = arith.constant 0 : index
    %c0_4 = arith.constant 0 : index
    %5 = vector.load %arg3[%c0_3, %c0_4] : memref<1024x128xbf16, #tpu.memory_space<vmem>>, vector<1024x128xbf16>
    %cst = arith.constant dense<0.000000e+00> : vector<8x128xf32>
    %6 = tpu.matmul %4, %5, %cst {dimension_numbers = #tpu.dot_dimension_numbers<[1], [0], [0], [1], [0, 0, 1, 1], [], []>} : vector<8x1024xbf16>, vector<1024x128xbf16>, vector<8x128xf32> -> vector<8x128xf32>
    %c0_5 = arith.constant 0 : index
    %c0_6 = arith.constant 0 : index
    %7 = vector.load %arg4[%c0_5, %c0_6] : memref<1x128xf32, #tpu.memory_space<vmem>>, vector<1x128xf32>
    %8 = vector.broadcast %7 : vector<1x128xf32> to vector<8x128xf32>
    %9 = arith.addf %6, %8 : vector<8x128xf32>
    %cst_7 = arith.constant 5.000000e-01 : f32
    %10 = vector.broadcast %cst_7 : f32 to vector<8x128xf32>
    %11 = arith.mulf %10, %9 : vector<8x128xf32>
    %cst_8 = arith.constant 0.707106769 : f32
    %12 = vector.broadcast %cst_8 : f32 to vector<8x128xf32>
    %13 = arith.mulf %9, %12 : vector<8x128xf32>
    %14 = math.erf %13 : vector<8x128xf32>
    %cst_9 = arith.constant 1.000000e+00 : f32
    %15 = vector.broadcast %cst_9 : f32 to vector<8x128xf32>
    %16 = arith.addf %15, %14 : vector<8x128xf32>
    %17 = arith.mulf %11, %16 : vector<8x128xf32>
    %c0_10 = arith.constant 0 : index
    %c0_11 = arith.constant 0 : index
    %18 = vector.load %arg8[%c0_10, %c0_11] : memref<8x128xf32, #tpu.memory_space<vmem>>, vector<8x128xf32>
    %19 = arith.truncf %17 : vector<8x128xf32> to vector<8x128xbf16>
    %c0_12 = arith.constant 0 : index
    %c0_13 = arith.constant 0 : index
    %c0_14 = arith.constant 0 : index
    %20 = vector.load %arg5[%c0_12, %c0_13, %c0_14] : memref<1x128x128xbf16, #tpu.memory_space<vmem>>, vector<1x128x128xbf16>
    %21 = vector.shape_cast %20 : vector<1x128x128xbf16> to vector<128x128xbf16>
    %cst_15 = arith.constant dense<0.000000e+00> : vector<8x128xf32>
    %22 = tpu.matmul %19, %21, %cst_15 {dimension_numbers = #tpu.dot_dimension_numbers<[1], [0], [0], [1], [0, 0, 1, 1], [], []>} : vector<8x128xbf16>, vector<128x128xbf16>, vector<8x128xf32> -> vector<8x128xf32>
    %23 = arith.addf %18, %22 : vector<8x128xf32>
    %c0_16 = arith.constant 0 : index
    %c0_17 = arith.constant 0 : index
    %24 = vector.load %arg8[%c0_16, %c0_17] : memref<8x128xf32, #tpu.memory_space<vmem>>, vector<8x128xf32>
    tpu.vector_store %arg8[%c0_16, %c0_17], %23 {strides = array<i32>} : memref<8x128xf32, #tpu.memory_space<vmem>>, vector<8x128xf32>,
    %c48_i32 = arith.constant 48 : i32
    %25 = arith.cmpi eq, %arg1, %c48_i32 : i32
    %26 = arith.extui %25 : i1 to i32
    %c0_i32_18 = arith.constant 0 : i32
    %27 = arith.cmpi ne, %26, %c0_i32_18 : i32
    scf.if %27 {
      %c0_19 = arith.constant 0 : index
      %c0_20 = arith.constant 0 : index
      %28 = vector.load %arg8[%c0_19, %c0_20] : memref<8x128xf32, #tpu.memory_space<vmem>>, vector<8x128xf32>
      %c0_21 = arith.constant 0 : index
      %c0_22 = arith.constant 0 : index
      %29 = vector.load %arg6[%c0_21, %c0_22] : memref<1x128xf32, #tpu.memory_space<vmem>>, vector<1x128xf32>
      %30 = vector.broadcast %29 : vector<1x128xf32> to vector<8x128xf32>
      %31 = arith.addf %28, %30 : vector<8x128xf32>
      %c0_23 = arith.constant 0 : index
      %c0_24 = arith.constant 0 : index
      %32 = vector.load %arg7[%c0_23, %c0_24] : memref<8x128xf32, #tpu.memory_space<vmem>>, vector<8x128xf32>
      tpu.vector_store %arg7[%c0_23, %c0_24], %31 {strides = array<i32>} : memref<8x128xf32, #tpu.memory_space<vmem>>, vector<8x128xf32>,
    } else {
    }
    return
  }
  func.func @transform_0(%arg0: i32, %arg1: i32) -> (i32, i32, i32) {
    %c0_i32 = arith.constant 0 : i32
    %c0_i32_0 = arith.constant 0 : i32
    return %arg1, %arg0, %c0_i32 : i32, i32, i32
  }
  func.func @transform_1(%arg0: i32, %arg1: i32) -> (i32, i32) {
    %c0_i32 = arith.constant 0 : i32
    %c0_i32_0 = arith.constant 0 : i32
    %c0_i32_1 = arith.constant 0 : i32
    return %c0_i32, %c0_i32_0 : i32, i32
  }
  func.func @transform_2(%arg0: i32, %arg1: i32) -> (i32, i32) {
    %c0_i32 = arith.constant 0 : i32
    %c0_i32_0 = arith.constant 0 : i32
    %c0_i32_1 = arith.constant 0 : i32
    return %c0_i32, %c0_i32_0 : i32, i32
  }
  func.func @transform_3(%arg0: i32, %arg1: i32) -> (i32, i32, i32) {
    %c0_i32 = arith.constant 0 : i32
    %c0_i32_0 = arith.constant 0 : i32
    %c0_i32_1 = arith.constant 0 : i32
    return %arg1, %c0_i32, %c0_i32_0 : i32, i32, i32
  }
  func.func @transform_4(%arg0: i32, %arg1: i32) -> (i32, i32) {
    %c0_i32 = arith.constant 0 : i32
    %c0_i32_0 = arith.constant 0 : i32
    %c0_i32_1 = arith.constant 0 : i32
    return %c0_i32, %c0_i32_0 : i32, i32
  }
  func.func @transform_5(%arg0: i32, %arg1: i32) -> (i32, i32) {
    %c0_i32 = arith.constant 0 : i32
    %c0_i32_0 = arith.constant 0 : i32
    return %arg0, %c0_i32 : i32, i32
  }
}

</mosaic_0001>

<bundles_post_ra>
// kernel: mhd_image_processor.2
= control target key start
LH: loop header
LB: loop body
LE: loop exit
PB: predicated region body
PF: predicated region fallthrough
CT: control target
= control target key end

     0   :  { %vm716_vm0 = vcmask 130048   ;;  %vm3592_vm1 = vcmask 519168   ;;  %s7801_s1 = inlined_call_operand.vmem [shape: bf16[16,64], index: 1, kind: input, shape index: {}]   ;;  %s7802_s0 = inlined_call_operand.vmem [shape: bf16[1568,16], index: 0, kind: input, shape index: {}]   ;;  %s7803_s2 = inlined_call_operand.vmem [shape: f32[1,64], index: 2, kind: input, shape index: {}]   ;;  %s7804_s3 = inlined_call_operand.vmem [shape: bf16[1568,64], index: 3, kind: output, shape index: {}]  }
   0x1   :  { %v4682_v0 = vld [vmem:[%s7801_s1] sm:$0xff]   ;;  %v4684_v2 = vld [vmem:[%s7802_s0 + $0x190] sm:$0xff]   ;;  %v4685_v3 = vld [vmem:[%s7802_s0 + $0x8] sm:$0xff]  }
   0x2   :  { %v4683_v1 = vld [vmem:[%s7802_s0] sm:$0xff]   ;;  %4482 = vmatprep.subr.bf16.mxu0 %v4682_v0  ;;  %4680 = vmatprep.subr.bf16.mxu1 %v4682_v0  ;;  %v4686_v4 = vld [vmem:[%s7802_s0 + $0x198] sm:$0xff]   ;;  %v4687_v5 = vld [vmem:[%s7802_s0 + $0x10] sm:$0xff]  }
   0x3   :  { %4483 = vmatpush3.bf16.msra.mxu0 %v4682_v0  ;;  %4681 = vmatpush3.bf16.msra.mxu1 %v4682_v0  ;;  %v4688_v6 = vld [vmem:[%s7802_s0 + $0x1a0] sm:$0xff]   ;;  %v4689_v7 = vld [vmem:[%s7802_s0 + $0x18] sm:$0xff]   ;;  %v4690_v8 = vld [vmem:[%s7802_s0 + $0x1a8] sm:$0xff]  }
   0x4   :  { %4484 = vmatprep.mubr.msk.bf16.mxu0 %vm716_vm0, %v4683_v1  ;;  %4584 = vmatprep.mubr.msk.bf16.mxu1 %vm716_vm0, %v4684_v2  ;;  %v4691_v9 = vld [vmem:[%s7802_s0 + $0x20] sm:$0xff]   ;;  %v4692_v10 = vld [vmem:[%s7802_s0 + $0x1b0] sm:$0xff]   ;;  %v4693_v11 = vld [vmem:[%s7802_s0 + $0x28] sm:$0xff]  }
   0x5   :  { %v4694_v12 = vld [vmem:[%s7802_s0 + $0x1b8] sm:$0xff]   ;;  %v4695_v13 = vld [vmem:[%s7802_s0 + $0x30] sm:$0xff]   ;;  %v4696_v14 = vld [vmem:[%s7802_s0 + $0x1c0] sm:$0xff]  }
   0x6   :  { %4485 = vmatmul.mubr.msk.bf16.vlgmr.msra.gmra.mxu0 %vm716_vm0, %v4685_v3  ;;  %4585 = vmatmul.mubr.msk.bf16.vlgmr.msra.gmra.mxu1 %vm716_vm0, %v4686_v4  ;;  %v4697_v15 = vld [vmem:[%s7802_s0 + $0x38] sm:$0xff]   ;;  %v4698_v16 = vld [vmem:[%s7802_s0 + $0x1c8] sm:$0xff]   ;;  %v4699_v17 = vld [vmem:[%s7802_s0 + $0x40] sm:$0xff]  }
   0x7   :  { %4488 = vmatprep.mubr.msk.bf16.mxu0 %vm716_vm0, %v4687_v5  ;;  %4588 = vmatprep.mubr.msk.bf16.mxu1 %vm716_vm0, %v4688_v6  ;;  %v4700_v18 = vld [vmem:[%s7802_s0 + $0x1d0] sm:$0xff]   ;;  %v4701_v19 = vld [vmem:[%s7802_s0 + $0x48] sm:$0xff]   ;;  %v4702_v20 = vld [vmem:[%s7802_s0 + $0x1d8] sm:$0xff]  }
   0x8   :  { %v4703_v21 = vld [vmem:[%s7802_s0 + $0x50] sm:$0xff]   ;;  %v4704_v22 = vld [vmem:[%s7802_s0 + $0x1e0] sm:$0xff]   ;;  %v4705_v23 = vld [vmem:[%s7802_s0 + $0x58] sm:$0xff]  }
   0x9   :  { %v4706_v24 = vld [vmem:[%s7802_s0 + $0x1e8] sm:$0xff]   ;;  %v4707_v25 = vld [vmem:[%s7802_s0 + $0x60] sm:$0xff]   ;;  %v4708_v26 = vld [vmem:[%s7802_s0 + $0x1f0] sm:$0xff]  }
   0xa   :  { %v4709_v27 = vld [vmem:[%s7802_s0 + $0x68] sm:$0xff]   ;;  %v4710_v28 = vld [vmem:[%s7802_s0 + $0x1f8] sm:$0xff]   ;;  %v4711_v29 = vld [vmem:[%s7802_s0 + $0x70] sm:$0xff]  }
   0xb   :  { %v4712_v30 = vld [vmem:[%s7802_s0 + $0x200] sm:$0xff]   ;;  %v4713_v31 = vld [vmem:[%s7802_s0 + $0x78] sm:$0xff]   ;;  %v4714_v32 = vld [vmem:[%s7802_s0 + $0x208] sm:$0xff]  }
   0xc   :  { %v4715_v33 = vld [vmem:[%s7802_s0 + $0x80] sm:$0xff]   ;;  %v4716_v34 = vld [vmem:[%s7802_s0 + $0x210] sm:$0xff]   ;;  %v4717_v35 = vld [vmem:[%s7802_s0 + $0x88] sm:$0xff]  }
   0xd   :  { %v4718_v36 = vld [vmem:[%s7802_s0 + $0x218] sm:$0xff]   ;;  %v4719_v37 = vld [vmem:[%s7802_s0 + $0x90] sm:$0xff]   ;;  %v4720_v38 = vld [vmem:[%s7802_s0 + $0x220] sm:$0xff]  }
   0xe   :  { %4489 = vmatmul.mubr.msk.bf16.gmra.mxu0 %vm716_vm0, %v4689_v7  ;;  %4589 = vmatmul.mubr.msk.bf16.gmra.mxu1 %vm716_vm0, %v4690_v8  ;;  %v4721_v39 = vld [vmem:[%s7802_s0 + $0x98] sm:$0xff]   ;;  %v4722_v40 = vld [vmem:[%s7802_s0 + $0x228] sm:$0xff]   ;;  %v4723_v41 = vld [vmem:[%s7802_s0 + $0xa0] sm:$0xff]  }
   0xf   :  { %4492 = vmatprep.mubr.msk.bf16.mxu0 %vm716_vm0, %v4691_v9  ;;  %4592 = vmatprep.mubr.msk.bf16.mxu1 %vm716_vm0, %v4692_v10  ;;  %v4724_v42 = vld [vmem:[%s7802_s0 + $0x230] sm:$0xff]   ;;  %v4725_v43 = vld [vmem:[%s7802_s0 + $0xa8] sm:$0xff]   ;;  %v4726_v44 = vld [vmem:[%s7802_s0 + $0x238] sm:$0xff]  }
  0x10   :  { %v4727_v45 = vld [vmem:[%s7802_s0 + $0xb0] sm:$0xff]   ;;  %v4728_v46 = vld [vmem:[%s7802_s0 + $0x240] sm:$0xff]   ;;  %v4729_v47 = vld [vmem:[%s7802_s0 + $0xb8] sm:$0xff]  }
  0x11   :  { %v4730_v48 = vld [vmem:[%s7802_s0 + $0x248] sm:$0xff]   ;;  %v4731_v49 = vld [vmem:[%s7802_s0 + $0xc0] sm:$0xff]   ;;  %v4732_v50 = vld [vmem:[%s7802_s0 + $0x250] sm:$0xff]  }
  0x12   :  { %v4733_v51 = vld [vmem:[%s7802_s0 + $0xc8] sm:$0xff]   ;;  %v4734_v52 = vld [vmem:[%s7802_s0 + $0x258] sm:$0xff]   ;;  %v4735_v53 = vld [vmem:[%s7802_s0 + $0xd0] sm:$0xff]  }
  0x13   :  { %v4736_v54 = vld [vmem:[%s7802_s0 + $0x260] sm:$0xff]   ;;  %v4737_v55 = vld [vmem:[%s7802_s0 + $0xd8] sm:$0xff]   ;;  %v4738_v56 = vld [vmem:[%s7802_s0 + $0x268] sm:$0xff]  }
  0x14   :  { %v4739_v57 = vld [vmem:[%s7802_s0 + $0xe0] sm:$0xff]   ;;  %v4740_v58 = vld [vmem:[%s7802_s0 + $0x270] sm:$0xff]   ;;  %v4741_v59 = vld [vmem:[%s7802_s0 + $0xe8] sm:$0xff]  }
  0x15   :  { %v4742_v60 = vld [vmem:[%s7802_s0 + $0x278] sm:$0xff]   ;;  %v4743_v61 = vld [vmem:[%s7802_s0 + $0xf0] sm:$0xff]   ;;  %v4744_v62 = vld [vmem:[%s7802_s0 + $0x280] sm:$0xff]  }
  0x16   :  { %4493 = vmatmul.mubr.msk.bf16.gmra.mxu0 %vm716_vm0, %v4693_v11  ;;  %4593 = vmatmul.mubr.msk.bf16.gmra.mxu1 %vm716_vm0, %v4694_v12  ;;  %v4745_v63 = vld [vmem:[%s7802_s0 + $0xf8] sm:$0xff]   ;;  %v4746_v0 = vld [vmem:[%s7802_s0 + $0x288] sm:$0xff]   ;;  %v4747_v1 = vld [vmem:[%s7802_s0 + $0x100] sm:$0xff]  }
  0x17   :  { %4496 = vmatprep.mubr.msk.bf16.mxu0 %vm716_vm0, %v4695_v13  ;;  %4596 = vmatprep.mubr.msk.bf16.mxu1 %vm716_vm0, %v4696_v14  ;;  %v4748_v2 = vld [vmem:[%s7802_s0 + $0x290] sm:$0xff]   ;;  %v4749_v3 = vld [vmem:[%s7802_s0 + $0x108] sm:$0xff]   ;;  %v4750_v4 = vld [vmem:[%s7802_s0 + $0x298] sm:$0xff]  }
  0x18   :  { %v4751_v5 = vld [vmem:[%s7802_s0 + $0x110] sm:$0xff]   ;;  %v4752_v6 = vld [vmem:[%s7802_s0 + $0x2a0] sm:$0xff]   ;;  %v4753_v7 = vld [vmem:[%s7802_s0 + $0x118] sm:$0xff]  }
  0x19   :  { %v4754_v8 = vld [vmem:[%s7802_s0 + $0x2a8] sm:$0xff]   ;;  %v4755_v9 = vld [vmem:[%s7802_s0 + $0x120] sm:$0xff]   ;;  %v4756_v10 = vld [vmem:[%s7802_s0 + $0x2b0] sm:$0xff]  }
  0x1a   :  { %v4757_v11 = vld [vmem:[%s7802_s0 + $0x128] sm:$0xff]   ;;  %v4758_v12 = vld [vmem:[%s7802_s0 + $0x2b8] sm:$0xff]   ;;  %v4759_v13 = vld [vmem:[%s7802_s0 + $0x130] sm:$0xff]  }
  0x1b   :  { %v4760_v14 = vld [vmem:[%s7802_s0 + $0x2c0] sm:$0xff]  }
  0x1e   :  { %4497 = vmatmul.mubr.msk.bf16.gmra.mxu0 %vm716_vm0, %v4697_v15  ;;  %4597 = vmatmul.mubr.msk.bf16.gmra.mxu1 %vm716_vm0, %v4698_v16  ;;  %v4761_v15 = vld [vmem:[%s7802_s0 + $0x138] sm:$0xff]   ;;  %v4762_v16 = vld [vmem:[%s7802_s0 + $0x2c8] sm:$0xff]  }
  0x1f   :  { %4500 = vmatprep.mubr.msk.bf16.mxu0 %vm716_vm0, %v4699_v17  ;;  %4600 = vmatprep.mubr.msk.bf16.mxu1 %vm716_vm0, %v4700_v18  ;;  %v4763_v17 = vld [vmem:[%s7802_s0 + $0x140] sm:$0xff]   ;;  %v4764_v18 = vld [vmem:[%s7802_s0 + $0x2d0] sm:$0xff]  }
  0x26   :  { %4501 = vmatmul.mubr.msk.bf16.gmra.mxu0 %vm716_vm0, %v4701_v19  ;;  %4601 = vmatmul.mubr.msk.bf16.gmra.mxu1 %vm716_vm0, %v4702_v20  ;;  %v4765_v19 = vld [vmem:[%s7802_s0 + $0x148] sm:$0xff]   ;;  %v4766_v20 = vld [vmem:[%s7802_s0 + $0x2d8] sm:$0xff]  }
  0x27   :  { %4504 = vmatprep.mubr.msk.bf16.mxu0 %vm716_vm0, %v4703_v21  ;;  %4604 = vmatprep.mubr.msk.bf16.mxu1 %vm716_vm0, %v4704_v22  ;;  %v4767_v21 = vld [vmem:[%s7802_s0 + $0x150] sm:$0xff]   ;;  %v4768_v22 = vld [vmem:[%s7802_s0 + $0x2e0] sm:$0xff]  }
  0x2e   :  { %4505 = vmatmul.mubr.msk.bf16.gmra.mxu0 %vm716_vm0, %v4705_v23  ;;  %4605 = vmatmul.mubr.msk.bf16.gmra.mxu1 %vm716_vm0, %v4706_v24  ;;  %v4769_v23 = vld [vmem:[%s7802_s0 + $0x158] sm:$0xff]   ;;  %v4770_v24 = vld [vmem:[%s7802_s0 + $0x2e8] sm:$0xff]  }
  0x2f   :  { %4508 = vmatprep.mubr.msk.bf16.mxu0 %vm716_vm0, %v4707_v25  ;;  %4608 = vmatprep.mubr.msk.bf16.mxu1 %vm716_vm0, %v4708_v26  ;;  %v4771_v25 = vld [vmem:[%s7802_s0 + $0x160] sm:$0xff]   ;;  %v4772_v26 = vld [vmem:[%s7802_s0 + $0x2f0] sm:$0xff]  }
  0x36   :  { %4509 = vmatmul.mubr.msk.bf16.gmra.mxu0 %vm716_vm0, %v4709_v27  ;;  %4609 = vmatmul.mubr.msk.bf16.gmra.mxu1 %vm716_vm0, %v4710_v28  ;;  %v4773_v27 = vld [vmem:[%s7802_s0 + $0x168] sm:$0xff]   ;;  %v4774_v28 = vld [vmem:[%s7802_s0 + $0x2f8] sm:$0xff]  }
  0x37   :  { %4512 = vmatprep.mubr.msk.bf16.mxu0 %vm716_vm0, %v4711_v29  ;;  %4612 = vmatprep.mubr.msk.bf16.mxu1 %vm716_vm0, %v4712_v30  ;;  %v4775_v29 = vld [vmem:[%s7802_s0 + $0x170] sm:$0xff]   ;;  %v4776_v30 = vld [vmem:[%s7802_s0 + $0x300] sm:$0xff]  }
  0x3e   :  { %4513 = vmatmul.mubr.msk.bf16.gmra.mxu0 %vm716_vm0, %v4713_v31  ;;  %4613 = vmatmul.mubr.msk.bf16.gmra.mxu1 %vm716_vm0, %v4714_v32  ;;  %v4777_v31 = vld [vmem:[%s7802_s0 + $0x178] sm:$0xff]   ;;  %v4778_v32 = vld [vmem:[%s7802_s0 + $0x308] sm:$0xff]  }
  0x3f   :  { %4516 = vmatprep.mubr.msk.bf16.mxu0 %vm716_vm0, %v4715_v33  ;;  %4616 = vmatprep.mubr.msk.bf16.mxu1 %vm716_vm0, %v4716_v34  ;;  %v4779_v33 = vld [vmem:[%s7802_s0 + $0x180] sm:$0xff]   ;;  %v4780_v34 = vld [vmem:[%s7802_s0 + $0x188] sm:$0xff]  }
  0x46   :  { %4517 = vmatmul.mubr.msk.bf16.gmra.mxu0 %vm716_vm0, %v4717_v35  ;;  %4617 = vmatmul.mubr.msk.bf16.gmra.mxu1 %vm716_vm0, %v4718_v36  ;;  %v5593_v35 = vld [vmem:[%s7803_s2] ss:$0 sm:$0xff] }
  0x47   :  { %4520 = vmatprep.mubr.msk.bf16.mxu0 %vm716_vm0, %v4719_v37  ;;  %4620 = vmatprep.mubr.msk.bf16.mxu1 %vm716_vm0, %v4720_v38 }
  0x4e   :  { %4521 = vmatmul.mubr.msk.bf16.gmra.mxu0 %vm716_vm0, %v4721_v39  ;;  %4621 = vmatmul.mubr.msk.bf16.gmra.mxu1 %vm716_vm0, %v4722_v40 }
  0x4f   :  { %4524 = vmatprep.mubr.msk.bf16.mxu0 %vm716_vm0, %v4723_v41  ;;  %4624 = vmatprep.mubr.msk.bf16.mxu1 %vm716_vm0, %v4724_v42 }
  0x56   :  { %4525 = vmatmul.mubr.msk.bf16.gmra.mxu0 %vm716_vm0, %v4725_v43  ;;  %4625 = vmatmul.mubr.msk.bf16.gmra.mxu1 %vm716_vm0, %v4726_v44 }
  0x57   :  { %4528 = vmatprep.mubr.msk.bf16.mxu0 %vm716_vm0, %v4727_v45  ;;  %4628 = vmatprep.mubr.msk.bf16.mxu1 %vm716_vm0, %v4728_v46 }
  0x5e   :  { %4529 = vmatmul.mubr.msk.bf16.gmra.mxu0 %vm716_vm0, %v4729_v47  ;;  %4629 = vmatmul.mubr.msk.bf16.gmra.mxu1 %vm716_vm0, %v4730_v48 }
  0x5f   :  { %4532 = vmatprep.mubr.msk.bf16.mxu0 %vm716_vm0, %v4731_v49  ;;  %4632 = vmatprep.mubr.msk.bf16.mxu1 %vm716_vm0, %v4732_v50 }
  0x66   :  { %4533 = vmatmul.mubr.msk.bf16.gmra.mxu0 %vm716_vm0, %v4733_v51  ;;  %4633 = vmatmul.mubr.msk.bf16.gmra.mxu1 %vm716_vm0, %v4734_v52 }
  0x67   :  { %4536 = vmatprep.mubr.msk.bf16.mxu0 %vm716_vm0, %v4735_v53  ;;  %4636 = vmatprep.mubr.msk.bf16.mxu1 %vm716_vm0, %v4736_v54 }
  0x6e   :  { %4537 = vmatmul.mubr.msk.bf16.gmra.mxu0 %vm716_vm0, %v4737_v55  ;;  %4637 = vmatmul.mubr.msk.bf16.gmra.mxu1 %vm716_vm0, %v4738_v56 }
  0x6f   :  { %4540 = vmatprep.mubr.msk.bf16.mxu0 %vm716_vm0, %v4739_v57  ;;  %4640 = vmatprep.mubr.msk.bf16.mxu1 %vm716_vm0, %v4740_v58 }
  0x76   :  { %4541 = vmatmul.mubr.msk.bf16.gmra.mxu0 %vm716_vm0, %v4741_v59  ;;  %4641 = vmatmul.mubr.msk.bf16.gmra.mxu1 %vm716_vm0, %v4742_v60 }
  0x77   :  { %4544 = vmatprep.mubr.msk.bf16.mxu0 %vm716_vm0, %v4743_v61  ;;  %4644 = vmatprep.mubr.msk.bf16.mxu1 %vm716_vm0, %v4744_v62 }
  0x7e   :  { %4545 = vmatmul.mubr.msk.bf16.gmra.mxu0 %vm716_vm0, %v4745_v63  ;;  %4645 = vmatmul.mubr.msk.bf16.gmra.mxu1 %vm716_vm0, %v4746_v0 }
  0x7f   :  { %4548 = vmatprep.mubr.msk.bf16.mxu0 %vm716_vm0, %v4747_v1  ;;  %4648 = vmatprep.mubr.msk.bf16.mxu1 %vm716_vm0, %v4748_v2 }
  0x86   :  { %4549 = vmatmul.mubr.msk.bf16.gmra.mxu0 %vm716_vm0, %v4749_v3  ;;  %4649 = vmatmul.mubr.msk.bf16.gmra.mxu1 %vm716_vm0, %v4750_v4 }
  0x87   :  { %4552 = vmatprep.mubr.msk.bf16.mxu0 %vm716_vm0, %v4751_v5  ;;  %4652 = vmatprep.mubr.msk.bf16.mxu1 %vm716_vm0, %v4752_v6 }
  0x8e   :  { %4553 = vmatmul.mubr.msk.bf16.gmra.mxu0 %vm716_vm0, %v4753_v7  ;;  %4653 = vmatmul.mubr.msk.bf16.gmra.mxu1 %vm716_vm0, %v4754_v8 }
  0x8f   :  { %4556 = vmatprep.mubr.msk.bf16.mxu0 %vm716_vm0, %v4755_v9  ;;  %4656 = vmatprep.mubr.msk.bf16.mxu1 %vm716_vm0, %v4756_v10 }
  0x96   :  { %4557 = vmatmul.mubr.msk.bf16.gmra.mxu0 %vm716_vm0, %v4757_v11  ;;  %4657 = vmatmul.mubr.msk.bf16.gmra.mxu1 %vm716_vm0, %v4758_v12 }
  0x97   :  { %4560 = vmatprep.mubr.msk.bf16.mxu0 %vm716_vm0, %v4759_v13  ;;  %4660 = vmatprep.mubr.msk.bf16.mxu1 %vm716_vm0, %v4760_v14 }
  0x9e   :  { %4561 = vmatmul.mubr.msk.bf16.gmra.mxu0 %vm716_vm0, %v4761_v15  ;;  %4661 = vmatmul.mubr.msk.bf16.gmra.mxu1 %vm716_vm0, %v4762_v16 }
  0x9f   :  { %4564 = vmatprep.mubr.msk.bf16.mxu0 %vm716_vm0, %v4763_v17  ;;  %4664 = vmatprep.mubr.msk.bf16.mxu1 %vm716_vm0, %v4764_v18 }
  0xa6   :  { %4565 = vmatmul.mubr.msk.bf16.gmra.mxu0 %vm716_vm0, %v4765_v19  ;;  %4665 = vmatmul.mubr.msk.bf16.gmra.mxu1 %vm716_vm0, %v4766_v20 }
  0xa7   :  { %4568 = vmatprep.mubr.msk.bf16.mxu0 %vm716_vm0, %v4767_v21  ;;  %4668 = vmatprep.mubr.msk.bf16.mxu1 %vm716_vm0, %v4768_v22 }
  0xae   :  { %4569 = vmatmul.mubr.msk.bf16.gmra.mxu0 %vm716_vm0, %v4769_v23  ;;  %4669 = vmatmul.mubr.msk.bf16.gmra.mxu1 %vm716_vm0, %v4770_v24 }
  0xaf   :  { %4572 = vmatprep.mubr.msk.bf16.mxu0 %vm716_vm0, %v4771_v25  ;;  %4672 = vmatprep.mubr.msk.bf16.mxu1 %vm716_vm0, %v4772_v26 }
  0xb6   :  { %4573 = vmatmul.mubr.msk.bf16.gmra.mxu0 %vm716_vm0, %v4773_v27  ;;  %4673 = vmatmul.mubr.msk.bf16.gmra.mxu1 %vm716_vm0, %v4774_v28 }
  0xb7   :  { %4576 = vmatprep.mubr.msk.bf16.mxu0 %vm716_vm0, %v4775_v29  ;;  %4676 = vmatprep.mubr.msk.bf16.mxu1 %vm716_vm0, %v4776_v30 }
  0xbe   :  { %4577 = vmatmul.mubr.msk.bf16.gmra.mxu0 %vm716_vm0, %v4777_v31  ;;  %4677 = vmatmul.mubr.msk.bf16.gmra.mxu1 %vm716_vm0, %v4778_v32 }
  0xbf   :  { %4580 = vmatprep.mubr.msk.bf16.mxu0 %vm716_vm0, %v4779_v33 }
  0xc6   :  { %v4486_v36 = vpop.f32.mrf.mxu0  ;;  %4581 = vmatmul.mubr.msk.bf16.gmra.mxu0 %vm716_vm0, %v4780_v34  ;;  %v4586_v37 = vpop.f32.mrf.mxu1 }
  0xc7   :  { %v1054_v38 = vadd.f32 %v4486_v36, %v5593_v35  ;;  %v1454_v39 = vadd.f32 %v4586_v37, %v5593_v35 }
  0xc8   :  { %v1045_v40 = vpop.f32.mrf.mxu0  ;;  %v1445_v41 = vpop.f32.mrf.mxu1 }
  0xc9   :  { %v2026_v42 = vmul.f32 0.70710677, %v1054_v38  ;;  %v2126_v43 = vmul.f32 0.70710677, %v1454_v39  ;;  %v1046_v44 = vadd.f32 %v5593_v35, %v1045_v40  ;;  %v1446_v45 = vadd.f32 %v5593_v35, %v1445_v41 }
  0xca   :  { %v4487_v46 = vpop.f32.mrf.mxu0  ;;  %v4587_v47 = vpop.f32.mrf.mxu1  ;;  %v1830_v1 = vmul.f32 0.5, %v1054_v38  ;;  %v1930_v4 = vmul.f32 0.5, %v1454_v39 }
  0xcb   :  { %4781 = verf.f32 %v2026_v42  ;;  %v1057_v48 = vadd.f32 %v4487_v46, %v5593_v35  ;;  %v1457_v49 = vadd.f32 %v4587_v47, %v5593_v35  ;;  %v2024_v50 = vmul.f32 0.70710677, %v1046_v44 }
  0xcc   :  { %4783 = verf.f32 %v2126_v43  ;;  %v1048_v51 = vpop.f32.mrf.mxu0  ;;  %v1448_v52 = vpop.f32.mrf.mxu1  ;;  %v2124_v53 = vmul.f32 0.70710677, %v1446_v45  ;;  %v1828_v12 = vmul.f32 0.5, %v1046_v44  ;;  %v5612_v13 = vmul.f32 0.5, %v1446_v45 }
  0xcd   :  { %v2027_v54 = vmul.f32 0.70710677, %v1057_v48  ;;  %4785 = verf.f32 %v2024_v50  ;;  %v2127_v55 = vmul.f32 0.70710677, %v1457_v49  ;;  %v1049_v56 = vadd.f32 %v5593_v35, %v1048_v51 }
  0xce   :  { %v1449_v57 = vadd.f32 %v5593_v35, %v1448_v52  ;;  %v4490_v58 = vpop.f32.mrf.mxu0  ;;  %v4590_v59 = vpop.f32.mrf.mxu1  ;;  %4787 = verf.f32 %v2124_v53  ;;  %v5614_v17 = vmul.f32 0.5, %v1057_v48  ;;  %v5616_v18 = vmul.f32 0.5, %v1457_v49 }
  0xcf   :  { %v1070_v60 = vadd.f32 %v4490_v58, %v5593_v35  ;;  %v1470_v61 = vadd.f32 %v4590_v59, %v5593_v35  ;;  %4789 = verf.f32 %v2027_v54  ;;  %v2025_v62 = vmul.f32 0.70710677, %v1049_v56 }
  0xd0   :  { %v1061_v63 = vpop.f32.mrf.mxu0  ;;  %v1461_v0 = vpop.f32.mrf.mxu1  ;;  %4791 = verf.f32 %v2127_v55  ;;  %v2125_v2 = vmul.f32 0.70710677, %v1449_v57  ;;  %v5618_v20 = vmul.f32 0.5, %v1049_v56  ;;  %v5630_v29 = vmul.f32 0.5, %v1449_v57 }
  0xd1   :  { %v2030_v3 = vmul.f32 0.70710677, %v1070_v60  ;;  %4793 = verf.f32 %v2025_v62  ;;  %v2130_v5 = vmul.f32 0.70710677, %v1470_v61  ;;  %v1062_v6 = vadd.f32 %v5593_v35, %v1061_v63 }
  0xd2   :  { %v4491_v7 = vpop.f32.mrf.mxu0  ;;  %v4591_v8 = vpop.f32.mrf.mxu1  ;;  %4795 = verf.f32 %v2125_v2  ;;  %v1462_v9 = vadd.f32 %v5593_v35, %v1461_v0  ;;  %v5632_v30 = vmul.f32 0.5, %v1070_v60  ;;  %v5637_v37 = vmul.f32 0.5, %v1470_v61 }
  0xd3   :  { %v1073_v10 = vadd.f32 %v4491_v7, %v5593_v35  ;;  %v5610_v11 = vadd.f32 %v4591_v8, %v5593_v35  ;;  %4797 = verf.f32 %v2030_v3  ;;  %v2028_v14 = vmul.f32 0.70710677, %v1062_v6 }
  0xd4   :  { %v1064_v15 = vpop.f32.mrf.mxu0  ;;  %v1464_v16 = vpop.f32.mrf.mxu1  ;;  %4799 = verf.f32 %v2130_v5  ;;  %v2128_v19 = vmul.f32 0.70710677, %v1462_v9  ;;  %v5640_v40 = vmul.f32 0.5, %v1062_v6  ;;  %v5642_v41 = vmul.f32 0.5, %v1462_v9 }
  0xd5   :  { %4801 = verf.f32 %v2028_v14  ;;  %v2031_v21 = vmul.f32 0.70710677, %v1073_v10  ;;  %v2131_v22 = vmul.f32 0.70710677, %v5610_v11  ;;  %v5622_v25 = vadd.f32 %v5593_v35, %v1064_v15 }
  0xd6   :  { %v4494_v23 = vpop.f32.mrf.mxu0  ;;  %v4594_v24 = vpop.f32.mrf.mxu1  ;;  %4803 = verf.f32 %v2128_v19  ;;  %v5625_v26 = vadd.f32 %v5593_v35, %v1464_v16  ;;  %v5649_v47 = vmul.f32 0.5, %v1073_v10 }
  0xd7   :  { %v5628_v27 = vadd.f32 %v4494_v23, %v5593_v35  ;;  %4805 = verf.f32 %v2031_v21  ;;  %v5635_v31 = vadd.f32 %v4594_v24, %v5593_v35  ;;  %v2029_v38 = vmul.f32 0.70710677, %v5622_v25 }
  0xd8   :  { %v4782_v28 = vpop.eup %4781  ;;  %v1077_v32 = vpop.f32.mrf.mxu0  ;;  %4807 = verf.f32 %v2131_v22  ;;  %v2129_v42 = vmul.f32 0.70710677, %v5625_v26  ;;  %v1833_v23 = vmul.f32 0.5, %v5622_v25 }
  0xd9   :  { %v1477_v33 = vpop.f32.mrf.mxu1  ;;  %v4784_v34 = vpop.eup %4783  ;;  %v2418_v36 = vadd.f32 1.0, %v4782_v28  ;;  %4809 = verf.f32 %v2029_v38  ;;  %v2034_v48 = vmul.f32 0.70710677, %v5628_v27  ;;  %v2134_v52 = vmul.f32 0.70710677, %v5635_v31 }
  0xda   :  { %v2518_v39 = vadd.f32 1.0, %v4784_v34  ;;  %v5645_v43 = vpop.f32.mrf.mxu0  ;;  %v4786_v45 = vpop.eup %4785  ;;  %4811 = verf.f32 %v2129_v42  ;;  %v5658_v58 = vadd.f32 %v5593_v35, %v1077_v32  ;;  %v5679_v10 = vadd.f32 %v5593_v35, %v1477_v33 }
  0xdb   :  { %v5647_v44 = vpop.f32.mrf.mxu1  ;;  %v2614_v46 = vmul.f32 %v2418_v36, %v1830_v1  ;;  %v4788_v49 = vpop.eup %4787  ;;  %v2416_v51 = vadd.f32 1.0, %v4786_v45  ;;  %4813 = verf.f32 %v2034_v48  ;;  %v5709_v42 = vadd.f32 %v5645_v43, %v5593_v35 }
  0xdc   :  { %v2714_v50 = vmul.f32 %v2518_v39, %v1930_v4  ;;  %v5653_v53 = vpop.f32.mrf.mxu0  ;;  %v4790_v55 = vpop.eup %4789  ;;  %v2516_v57 = vadd.f32 1.0, %v4788_v49  ;;  %4815 = verf.f32 %v2134_v52  ;;  %v5670_v4 = vmul.f32 0.5, %v5610_v11 }
  0xdd   :  { %v5655_v54 = vpop.f32.mrf.mxu1  ;;  %v4189_v56 = vpack.c.bf16 %v2614_v46, %v2614_v46  ;;  %v4792_v59 = vpop.eup %4791  ;;  %v2612_v61 = vmul.f32 %v2416_v51, %v1828_v12  ;;  %v2419_v62 = vadd.f32 1.0, %v4790_v55  ;;  %v2032_v5 = vmul.f32 0.70710677, %v5658_v58 }
  0xde   :  { %v4289_v60 = vpack.c.bf16 %v2714_v50, %v2714_v50  ;;  %v5660_v63 = vpop.f32.mrf.mxu0  ;;  %v4794_v1 = vpop.eup %4793  ;;  %v2712_v2 = vmul.f32 %v2516_v57, %v5612_v13  ;;  %v2519_v3 = vadd.f32 1.0, %v4792_v59  ;;  %v2132_v36 = vmul.f32 0.70710677, %v5679_v10 }
  0xdf   :  { %v5662_v0 = vpop.f32.mrf.mxu1  ;;  %3595 = vst.msk [vmem:[%s7804_s3 + $0x8] sm:$0xf] %vm3592_vm1, %v4189_v56  ;;  %v4796_v6 = vpop.eup %4795  ;;  %v4187_v7 = vpack.c.bf16 %v2612_v61, %v2612_v61  ;;  %v2615_v8 = vmul.f32 %v2419_v62, %v5614_v17  ;;  %v2417_v9 = vadd.f32 1.0, %v4794_v1  ;;  %4817 = verf.f32 %v2032_v5 }
  0xe0   :  { %3695 = vst.msk [vmem:[%s7804_s3 + $0x198] sm:$0xf] %vm3592_vm1, %v4289_v60  ;;  %v5681_v12 = vpop.f32.mrf.mxu0  ;;  %v4798_v11 = vpop.eup %4797  ;;  %v4287_v14 = vpack.c.bf16 %v2712_v2, %v2712_v2  ;;  %v2715_v15 = vmul.f32 %v2519_v3, %v5616_v18  ;;  %v2517_v16 = vadd.f32 1.0, %v4796_v6  ;;  %4819 = verf.f32 %v2132_v36 }
  0xe1   :  { %v5683_v13 = vpop.f32.mrf.mxu1  ;;  %v4800_v19 = vpop.eup %4799  ;;  %3593 = vst.msk [vmem:[%s7804_s3] sm:$0xf] %vm3592_vm1, %v4187_v7  ;;  %v4190_v17 = vpack.c.bf16 %v2615_v8, %v2615_v8  ;;  %v2613_v21 = vmul.f32 %v2417_v9, %v5618_v20  ;;  %v2422_v22 = vadd.f32 1.0, %v4798_v11  ;;  %v1933_v55 = vmul.f32 0.5, %v5625_v26 }
  0xe2   :  { %v5692_v24 = vpop.f32.mrf.mxu0  ;;  %v4802_v32 = vpop.eup %4801  ;;  %3693 = vst.msk [vmem:[%s7804_s3 + $0x190] sm:$0xf] %vm3592_vm1, %v4287_v14  ;;  %v4290_v18 = vpack.c.bf16 %v2715_v15, %v2715_v15  ;;  %v2713_v33 = vmul.f32 %v2517_v16, %v5630_v29  ;;  %v2522_v34 = vadd.f32 1.0, %v4800_v19  ;;  %v2035_v61 = vmul.f32 0.70710677, %v5709_v42 }
  0xe3   :  { %v5694_v28 = vpop.f32.mrf.mxu1  ;;  %v4804_v20 = vpop.eup %4803  ;;  %3596 = vst.msk [vmem:[%s7804_s3 + $0xc] sm:$0xf] %vm3592_vm1, %v4190_v17  ;;  %v4188_v25 = vpack.c.bf16 %v2613_v21, %v2613_v21  ;;  %v2618_v38 = vmul.f32 %v2422_v22, %v5632_v30  ;;  %v2420_v39 = vadd.f32 1.0, %v4802_v32  ;;  %v5743_v1 = vadd.f32 %v5647_v44, %v5593_v35 }
  0xe4   :  { %v5711_v45 = vpop.f32.mrf.mxu0  ;;  %v4806_v46 = vpop.eup %4805  ;;  %3696 = vst.msk [vmem:[%s7804_s3 + $0x19c] sm:$0xf] %vm3592_vm1, %v4290_v18  ;;  %v4288_v48 = vpack.c.bf16 %v2713_v33, %v2713_v33  ;;  %v2718_v49 = vmul.f32 %v2522_v34, %v5637_v37  ;;  %v2520_v50 = vadd.f32 1.0, %v4804_v20  ;;  %v5747_v2 = vadd.f32 %v5593_v35, %v5653_v53 }
  0xe5   :  { %v5713_v29 = vpop.f32.mrf.mxu1  ;;  %v4808_v30 = vpop.eup %4807  ;;  %3594 = vst.msk [vmem:[%s7804_s3 + $0x4] sm:$0xf] %vm3592_vm1, %v4188_v25  ;;  %v4193_v43 = vpack.c.bf16 %v2618_v38, %v2618_v38  ;;  %v2616_v51 = vmul.f32 %v2420_v39, %v5640_v40  ;;  %v2423_v52 = vadd.f32 1.0, %v4806_v46  ;;  %4821 = verf.f32 %v2035_v61 }
  0xe6   :  { %v5726_v56 = vpop.f32.mrf.mxu0  ;;  %3694 = vst.msk [vmem:[%s7804_s3 + $0x194] sm:$0xf] %vm3592_vm1, %v4288_v48  ;;  %v4293_v37 = vpack.c.bf16 %v2718_v49, %v2718_v49  ;;  %v2716_v59 = vmul.f32 %v2520_v50, %v5642_v41  ;;  %v2523_v60 = vadd.f32 1.0, %v4808_v30  ;;  %v4810_v62 = vpop.eup %4809  ;;  %v1838_v9 = vmul.f32 0.5, %v5628_v27 }
  0xe7   :  { %v5728_v57 = vpop.f32.mrf.mxu1  ;;  %3599 = vst.msk [vmem:[%s7804_s3 + $0x18] sm:$0xf] %vm3592_vm1, %v4193_v43  ;;  %v4191_v26 = vpack.c.bf16 %v2616_v51, %v2616_v51  ;;  %v2619_v40 = vmul.f32 %v2423_v52, %v5649_v47  ;;  %v4812_v5 = vpop.eup %4811  ;;  %v2421_v7 = vadd.f32 1.0, %v4810_v62  ;;  %v2135_v11 = vmul.f32 0.70710677, %v5743_v1 }
  0xe8   :  { %v5749_v41 = vpop.f32.mrf.mxu0  ;;  %3699 = vst.msk [vmem:[%s7804_s3 + $0x1a8] sm:$0xf] %vm3592_vm1, %v4293_v37  ;;  %v4291_v6 = vpack.c.bf16 %v2716_v59, %v2716_v59  ;;  %v2719_v47 = vmul.f32 %v2523_v60, %v5670_v4  ;;  %v4814_v44 = vpop.eup %4813  ;;  %v2521_v8 = vadd.f32 1.0, %v4812_v5  ;;  %v1938_v21 = vmul.f32 0.5, %v5635_v31 }
  0xe9   :  { %v5751_v3 = vpop.f32.mrf.mxu1  ;;  %3597 = vst.msk [vmem:[%s7804_s3 + $0x10] sm:$0xf] %vm3592_vm1, %v4191_v26  ;;  %v4194_v53 = vpack.c.bf16 %v2619_v40, %v2619_v40  ;;  %v4816_v16 = vpop.eup %4815  ;;  %v2617_v19 = vmul.f32 %v2421_v7, %v1833_v23  ;;  %v2426_v17 = vadd.f32 1.0, %v4814_v44  ;;  %4823 = verf.f32 %v2135_v11 }
  0xea   :  { %v5764_v14 = vpop.f32.mrf.mxu0  ;;  %3697 = vst.msk [vmem:[%s7804_s3 + $0x1a0] sm:$0xf] %vm3592_vm1, %v4291_v6  ;;  %v4294_v4 = vpack.c.bf16 %v2719_v47, %v2719_v47  ;;  %v2717_v27 = vmul.f32 %v2521_v8, %v1933_v55  ;;  %v2526_v22 = vadd.f32 1.0, %v4816_v16  ;;  %v2033_v32 = vmul.f32 0.70710677, %v5747_v2 }
  0xeb   :  { %v5766_v15 = vpop.f32.mrf.mxu1  ;;  %3600 = vst.msk [vmem:[%s7804_s3 + $0x1c] sm:$0xf] %vm3592_vm1, %v4194_v53  ;;  %v4192_v31 = vpack.c.bf16 %v2617_v19, %v2617_v19  ;;  %v2622_v23 = vmul.f32 %v2426_v17, %v1838_v9  ;;  %v1481_v34 = vadd.f32 %v5593_v35, %v5655_v54  ;;  %v1102_v36 = vadd.f32 %v5660_v63, %v5593_v35 }
  0xec   :  { %v5778_v18 = vpop.f32.mrf.mxu0  ;;  %3700 = vst.msk [vmem:[%s7804_s3 + $0x1ac] sm:$0xf] %vm3592_vm1, %v4294_v4  ;;  %v4818_v20 = vpop.eup %4817  ;;  %v4292_v25 = vpack.c.bf16 %v2717_v27, %v2717_v27  ;;  %v2722_v38 = vmul.f32 %v2526_v22, %v1938_v21  ;;  %4825 = verf.f32 %v2033_v32  ;;  %v1502_v39 = vadd.f32 %v5662_v0, %v5593_v35 }
  0xed   :  { %v5780_v33 = vpop.f32.mrf.mxu1  ;;  %3598 = vst.msk [vmem:[%s7804_s3 + $0x14] sm:$0xf] %vm3592_vm1, %v4192_v31  ;;  %v4197_v54 = vpack.c.bf16 %v2622_v23, %v2622_v23  ;;  %v1836_v49 = vmul.f32 0.5, %v5658_v58  ;;  %v2424_v63 = vadd.f32 1.0, %v4818_v20  ;;  %v2133_v50 = vmul.f32 0.70710677, %v1481_v34  ;;  %v4820_v59 = vpop.eup %4819 }
  0xee   :  { %v5792_v46 = vpop.f32.mrf.mxu0  ;;  %3698 = vst.msk [vmem:[%s7804_s3 + $0x1a4] sm:$0xf] %vm3592_vm1, %v4292_v25  ;;  %v4297_v0 = vpack.c.bf16 %v2722_v38, %v2722_v38  ;;  %v1936_v30 = vmul.f32 0.5, %v5679_v10  ;;  %v2038_v43 = vmul.f32 0.70710677, %v1102_v36  ;;  %v1094_v37 = vadd.f32 %v5593_v35, %v5681_v12 }
  0xef   :  { %v5794_v48 = vpop.f32.mrf.mxu1  ;;  %3603 = vst.msk [vmem:[%s7804_s3 + $0x28] sm:$0xf] %vm3592_vm1, %v4197_v54  ;;  %v2620_v58 = vmul.f32 %v2424_v63, %v1836_v49  ;;  %4827 = verf.f32 %v2133_v50  ;;  %v2138_v55 = vmul.f32 0.70710677, %v1502_v39  ;;  %v1494_v10 = vadd.f32 %v5593_v35, %v5683_v13 }
  0xf0   :  { %v5806_v51 = vpop.f32.mrf.mxu0  ;;  %3703 = vst.msk [vmem:[%s7804_s3 + $0x1b8] sm:$0xf] %vm3592_vm1, %v4297_v0  ;;  %4829 = verf.f32 %v2038_v43  ;;  %v1105_v60 = vadd.f32 %v5692_v24, %v5593_v35  ;;  %v5826_v61 = vadd.f32 %v5694_v28, %v5593_v35  ;;  %v2524_v40 = vadd.f32 1.0, %v4820_v59 }
  0xf1   :  { %v5808_v52 = vpop.f32.mrf.mxu1  ;;  %v4195_v26 = vpack.c.bf16 %v2620_v58, %v2620_v58  ;;  %v1839_v5 = vmul.f32 0.5, %v5709_v42  ;;  %4831 = verf.f32 %v2138_v55  ;;  %v1939_v6 = vmul.f32 0.5, %v5743_v1 }
  0xf2   :  { %v5828_v62 = vpop.f32.mrf.mxu0  ;;  %v1837_v13 = vmul.f32 0.5, %v5747_v2  ;;  %v2036_v47 = vmul.f32 0.70710677, %v1094_v37  ;;  %v2136_v7 = vmul.f32 0.70710677, %v1494_v10  ;;  %v2720_v28 = vmul.f32 %v2524_v40, %v1936_v30  ;;  %v4822_v1 = vpop.eup %4821 }
  0xf3   :  { %v5830_v12 = vpop.f32.mrf.mxu1  ;;  %3601 = vst.msk [vmem:[%s7804_s3 + $0x20] sm:$0xf] %vm3592_vm1, %v4195_v26  ;;  %v5843_v53 = vmul.f32 0.5, %v1481_v34  ;;  %v2039_v42 = vmul.f32 0.70710677, %v1105_v60  ;;  %v1097_v2 = vadd.f32 %v5593_v35, %v5711_v45  ;;  %v5850_v9 = vadd.f32 %v5593_v35, %v5713_v29 }
  0xf4   :  { %v5835_v24 = vpop.f32.mrf.mxu0  ;;  %v2139_v8 = vmul.f32 0.70710677, %v5826_v61  ;;  %4833 = verf.f32 %v2036_v47  ;;  %v5854_v11 = vadd.f32 %v5726_v56, %v5593_v35  ;;  %v4295_v19 = vpack.c.bf16 %v2720_v28, %v2720_v28 }
  0xf5   :  { %v5837_v44 = vpop.f32.mrf.mxu1  ;;  %v2427_v17 = vadd.f32 1.0, %v4822_v1  ;;  %4835 = verf.f32 %v2136_v7  ;;  %v5862_v21 = vadd.f32 %v5728_v57, %v5593_v35  ;;  %v1842_v45 = vmul.f32 0.5, %v1102_v36 }
  0xf6   :  { %v5856_v16 = vpop.f32.mrf.mxu0  ;;  %v5864_v27 = vmul.f32 0.5, %v1502_v39  ;;  %4837 = verf.f32 %v2039_v42  ;;  %v2037_v29 = vmul.f32 0.70710677, %v1097_v2  ;;  %v4824_v32 = vpop.eup %4823  ;;  %3701 = vst.msk [vmem:[%s7804_s3 + $0x1b0] sm:$0xf] %vm3592_vm1, %v4295_v19  ;;  %v5874_v23 = vmul.f32 0.5, %v1094_v37 }
  0xf7   :  { %v5858_v4 = vpop.f32.mrf.mxu1  ;;  %v2623_v31 = vmul.f32 %v2427_v17, %v1839_v5  ;;  %4839 = verf.f32 %v2139_v8  ;;  %v2137_v57 = vmul.f32 0.70710677, %v5850_v9  ;;  %v2527_v34 = vadd.f32 1.0, %v4824_v32 }
  0xf8   :  { %v5866_v22 = vpop.f32.mrf.mxu0  ;;  %v5877_v36 = vmul.f32 0.5, %v1494_v10  ;;  %4841 = verf.f32 %v2037_v29  ;;  %v2042_v20 = vmul.f32 0.70710677, %v5854_v11  ;;  %v2142_v49 = vmul.f32 0.70710677, %v5862_v21 }
  0xf9   :  { %v5868_v56 = vpop.f32.mrf.mxu1  ;;  %v4826_v39 = vpop.eup %4825  ;;  %v4198_v54 = vpack.c.bf16 %v2623_v31, %v2623_v31  ;;  %4843 = verf.f32 %v2137_v57  ;;  %v1110_v63 = vadd.f32 %v5593_v35, %v5749_v41  ;;  %v2723_v50 = vmul.f32 %v2527_v34, %v1939_v6 }
  0xfa   :  { %v5880_v25 = vpop.f32.mrf.mxu0  ;;  %v2425_v0 = vadd.f32 1.0, %v4826_v39  ;;  %4845 = verf.f32 %v2042_v20  ;;  %v5889_v30 = vadd.f32 %v5593_v35, %v5751_v3  ;;  %v5899_v55 = vmul.f32 0.5, %v1105_v60 }
  0xfb   :  { %v5882_v38 = vpop.f32.mrf.mxu1  ;;  %3604 = vst.msk [vmem:[%s7804_s3 + $0x2c] sm:$0xf] %vm3592_vm1, %v4198_v54  ;;  %4847 = verf.f32 %v2142_v49  ;;  %v2040_v41 = vmul.f32 0.70710677, %v1110_v63  ;;  %v5903_v37 = vadd.f32 %v5764_v14, %v5593_v35  ;;  %v4298_v3 = vpack.c.bf16 %v2723_v50, %v2723_v50 }
  0xfc   :  { %v5891_v43 = vpop.f32.mrf.mxu0  ;;  %v4828_v59 = vpop.eup %4827  ;;  %v2621_v10 = vmul.f32 %v2425_v0, %v1837_v13  ;;  %v5906_v26 = vmul.f32 0.5, %v5826_v61  ;;  %v2140_v40 = vmul.f32 0.70710677, %v5889_v30  ;;  %v5913_v7 = vmul.f32 0.5, %v1097_v2 }
  0xfd   :  { %v5893_v58 = vpop.f32.mrf.mxu1  ;;  %v4830_v60 = vpop.eup %4829  ;;  %v2525_v47 = vadd.f32 1.0, %v4828_v59  ;;  %4849 = verf.f32 %v2040_v41  ;;  %v2043_v14 = vmul.f32 0.70710677, %v5903_v37  ;;  %3704 = vst.msk [vmem:[%s7804_s3 + $0x1bc] sm:$0xf] %vm3592_vm1, %v4298_v3  ;;  %v5922_v42 = vadd.f32 %v5766_v15, %v5593_v35 }
  0xfe   :  { %v5909_v5 = vpop.f32.mrf.mxu0  ;;  %v4832_v28 = vpop.eup %4831  ;;  %v4196_v61 = vpack.c.bf16 %v2621_v10, %v2621_v10  ;;  %v2430_v13 = vadd.f32 1.0, %v4830_v60  ;;  %4851 = verf.f32 %v2140_v40  ;;  %v5929_v19 = vadd.f32 %v5593_v35, %v5778_v18 }
  0xff   :  { %v5911_v6 = vpop.f32.mrf.mxu1  ;;  %v2721_v1 = vmul.f32 %v2525_v47, %v5843_v53  ;;  %v2530_v2 = vadd.f32 1.0, %v4832_v28  ;;  %4853 = verf.f32 %v2043_v14  ;;  %v1941_v29 = vmul.f32 0.5, %v5850_v9 }
 0x100   :  { %v5924_v8 = vpop.f32.mrf.mxu0  ;;  %3602 = vst.msk [vmem:[%s7804_s3 + $0x24] sm:$0xf] %vm3592_vm1, %v4196_v61  ;;  %v2626_v17 = vmul.f32 %v2430_v13, %v1842_v45  ;;  %v2143_v15 = vmul.f32 0.70710677, %v5922_v42  ;;  %v5939_v32 = vadd.f32 %v5593_v35, %v5780_v33  ;;  %v1846_v20 = vmul.f32 0.5, %v5854_v11 }
 0x101   :  { %v5941_v53 = vpop.f32.mrf.mxu1  ;;  %v4834_v18 = vpop.eup %4833  ;;  %v4296_v57 = vpack.c.bf16 %v2721_v1, %v2721_v1  ;;  %v2726_v34 = vmul.f32 %v2530_v2, %v5864_v27  ;;  %v2041_v45 = vmul.f32 0.70710677, %v5929_v19  ;;  %v1946_v49 = vmul.f32 0.5, %v5862_v21 }
 0x102   :  { %v5943_v31 = vpop.f32.mrf.mxu0  ;;  %v4836_v39 = vpop.eup %4835  ;;  %v4201_v9 = vpack.c.bf16 %v2626_v17, %v2626_v17  ;;  %v2428_v54 = vadd.f32 1.0, %v4834_v18  ;;  %4855 = verf.f32 %v2143_v15  ;;  %v2141_v11 = vmul.f32 0.70710677, %v5939_v32 }
 0x103   :  { %v4838_v50 = vpop.eup %4837  ;;  %3702 = vst.msk [vmem:[%s7804_s3 + $0x1b4] sm:$0xf] %vm3592_vm1, %v4296_v57  ;;  %v4301_v0 = vpack.c.bf16 %v2726_v34, %v2726_v34  ;;  %v2528_v27 = vadd.f32 1.0, %v4836_v39  ;;  %4857 = verf.f32 %v2041_v45  ;;  %v1844_v3 = vmul.f32 0.5, %v1110_v63  ;;  %v5965_v40 = vpop.f32.mrf.mxu1 }
 0x104   :  { %v5949_v33 = vpop.f32.mrf.mxu0  ;;  %v4840_v41 = vpop.eup %4839  ;;  %3607 = vst.msk [vmem:[%s7804_s3 + $0x38] sm:$0xf] %vm3592_vm1, %v4201_v9  ;;  %v2624_v21 = vmul.f32 %v2428_v54, %v5874_v23  ;;  %v2431_v59 = vadd.f32 1.0, %v4838_v50  ;;  %v5963_v10 = vadd.f32 %v5792_v46, %v5593_v35  ;;  %4859 = verf.f32 %v2141_v11 }
 0x105   :  { %v4842_v47 = vpop.eup %4841  ;;  %3707 = vst.msk [vmem:[%s7804_s3 + $0x1c8] sm:$0xf] %vm3592_vm1, %v4301_v0  ;;  %v2724_v14 = vmul.f32 %v2528_v27, %v5877_v36  ;;  %v2531_v28 = vadd.f32 1.0, %v4840_v41  ;;  %v5976_v23 = vadd.f32 %v5794_v48, %v5593_v35  ;;  %v5981_v1 = vadd.f32 %v5593_v35, %v5806_v51  ;;  %v5991_v45 = vpop.f32.mrf.mxu1 }
 0x106   :  { %v5967_v60 = vpop.f32.mrf.mxu0  ;;  %v4844_v46 = vpop.eup %4843  ;;  %v4199_v63 = vpack.c.bf16 %v2624_v21, %v2624_v21  ;;  %v2627_v61 = vmul.f32 %v2431_v59, %v5899_v55  ;;  %v2429_v13 = vadd.f32 1.0, %v4842_v47  ;;  %v2046_v18 = vmul.f32 0.70710677, %v5963_v10 }
 0x107   :  { %v4846_v2 = vpop.eup %4845  ;;  %v4299_v17 = vpack.c.bf16 %v2724_v14, %v2724_v14  ;;  %v2727_v15 = vmul.f32 %v2531_v28, %v5906_v26  ;;  %v2529_v36 = vadd.f32 1.0, %v4844_v46  ;;  %v1944_v51 = vmul.f32 0.5, %v5889_v30  ;;  %v6016_v28 = vpop.f32.mrf.mxu1 }
 0x108   :  { %v4848_v57 = vpop.eup %4847  ;;  %3605 = vst.msk [vmem:[%s7804_s3 + $0x30] sm:$0xf] %vm3592_vm1, %v4199_v63  ;;  %v4202_v48 = vpack.c.bf16 %v2627_v61, %v2627_v61  ;;  %v2625_v55 = vmul.f32 %v2429_v13, %v5913_v7  ;;  %v2434_v34 = vadd.f32 1.0, %v4846_v2  ;;  %v5993_v39 = vpop.f32.mrf.mxu0  ;;  %4861 = verf.f32 %v2046_v18 }
 0x109   :  { %3705 = vst.msk [vmem:[%s7804_s3 + $0x1c0] sm:$0xf] %vm3592_vm1, %v4299_v17  ;;  %v4302_v26 = vpack.c.bf16 %v2727_v15, %v2727_v15  ;;  %v2725_v9 = vmul.f32 %v2529_v36, %v1941_v29  ;;  %v2534_v54 = vadd.f32 1.0, %v4848_v57  ;;  %v1847_v0 = vmul.f32 0.5, %v5903_v37 }
 0x10a   :  { %v4850_v50 = vpop.eup %4849  ;;  %3608 = vst.msk [vmem:[%s7804_s3 + $0x3c] sm:$0xf] %vm3592_vm1, %v4202_v48  ;;  %v4200_v30 = vpack.c.bf16 %v2625_v55, %v2625_v55  ;;  %v2630_v7 = vmul.f32 %v2434_v34, %v1846_v20  ;;  %v2146_v27 = vmul.f32 0.70710677, %v5976_v23  ;;  %v2044_v59 = vmul.f32 0.70710677, %v5981_v1  ;;  %v6018_v46 = vpop.f32.mrf.mxu0 }
 0x10b   :  { %v4852_v11 = vpop.eup %4851  ;;  %3708 = vst.msk [vmem:[%s7804_s3 + $0x1cc] sm:$0xf] %vm3592_vm1, %v4302_v26  ;;  %v4300_v29 = vpack.c.bf16 %v2725_v9, %v2725_v9  ;;  %v2730_v41 = vmul.f32 %v2534_v54, %v1946_v49  ;;  %v2432_v21 = vadd.f32 1.0, %v4850_v50  ;;  %v1526_v14 = vadd.f32 %v5593_v35, %v5808_v52  ;;  %v6045_v34 = vpop.f32.mrf.mxu1 }
 0x10c   :  { %v4854_v47 = vpop.eup %4853  ;;  %3606 = vst.msk [vmem:[%s7804_s3 + $0x34] sm:$0xf] %vm3592_vm1, %v4200_v30  ;;  %v4205_v37 = vpack.c.bf16 %v2630_v7, %v2630_v7  ;;  %v2532_v20 = vadd.f32 1.0, %v4852_v11  ;;  %4863 = verf.f32 %v2146_v27  ;;  %v6030_v2 = vadd.f32 %v5828_v62, %v5593_v35 }
 0x10d   :  { %3706 = vst.msk [vmem:[%s7804_s3 + $0x1c4] sm:$0xf] %vm3592_vm1, %v4300_v29  ;;  %v4305_v49 = vpack.c.bf16 %v2730_v41, %v2730_v41  ;;  %v2628_v63 = vmul.f32 %v2432_v21, %v1844_v3  ;;  %v2435_v61 = vadd.f32 1.0, %v4854_v47  ;;  %4865 = verf.f32 %v2044_v59  ;;  %v6074_v41 = vpop.f32.mrf.mxu1 }
 0x10e   :  { %3611 = vst.msk [vmem:[%s7804_s3 + $0x48] sm:$0xf] %vm3592_vm1, %v4205_v37  ;;  %v2728_v13 = vmul.f32 %v2532_v20, %v1944_v51  ;;  %v2144_v52 = vmul.f32 0.70710677, %v1526_v14  ;;  %v6038_v36 = vadd.f32 %v5830_v12, %v5593_v35  ;;  %v6042_v18 = vadd.f32 %v5593_v35, %v5835_v24  ;;  %v6047_v51 = vpop.f32.mrf.mxu0 }
 0x10f   :  { %v4856_v17 = vpop.eup %4855  ;;  %3711 = vst.msk [vmem:[%s7804_s3 + $0x1d8] sm:$0xf] %vm3592_vm1, %v4305_v49  ;;  %v4203_v3 = vpack.c.bf16 %v2628_v63, %v2628_v63  ;;  %v2631_v15 = vmul.f32 %v2435_v61, %v1847_v0  ;;  %v1947_v62 = vmul.f32 0.5, %v5922_v42  ;;  %v1845_v26 = vmul.f32 0.5, %v5929_v19 }
 0x110   :  { %v4858_v57 = vpop.eup %4857  ;;  %v4303_v48 = vpack.c.bf16 %v2728_v13, %v2728_v13  ;;  %v2535_v55 = vadd.f32 1.0, %v4856_v17  ;;  %4867 = verf.f32 %v2144_v52  ;;  %v2047_v9 = vmul.f32 0.70710677, %v6030_v2  ;;  %v6076_v21 = vpop.f32.mrf.mxu0 }
 0x111   :  { %3609 = vst.msk [vmem:[%s7804_s3 + $0x40] sm:$0xf] %vm3592_vm1, %v4203_v3  ;;  %v4206_v12 = vpack.c.bf16 %v2631_v15, %v2631_v15  ;;  %v2433_v24 = vadd.f32 1.0, %v4858_v57  ;;  %v4860_v54 = vpop.eup %4859  ;;  %v1945_v50 = vmul.f32 0.5, %v5939_v32  ;;  %v2147_v30 = vmul.f32 0.70710677, %v6038_v36  ;;  %v6102_v17 = vpop.f32.mrf.mxu1 }
 0x112   :  { %3709 = vst.msk [vmem:[%s7804_s3 + $0x1d0] sm:$0xf] %vm3592_vm1, %v4303_v48  ;;  %v2731_v42 = vmul.f32 %v2535_v55, %v1947_v62  ;;  %v2045_v7 = vmul.f32 0.70710677, %v6042_v18  ;;  %v2533_v0 = vadd.f32 1.0, %v4860_v54  ;;  %4869 = verf.f32 %v2047_v9  ;;  %v6104_v3 = vpop.f32.mrf.mxu0 }
 0x113   :  { %3612 = vst.msk [vmem:[%s7804_s3 + $0x4c] sm:$0xf] %vm3592_vm1, %v4206_v12  ;;  %v2629_v19 = vmul.f32 %v2433_v24, %v1845_v26  ;;  %v1529_v27 = vadd.f32 %v5593_v35, %v5837_v44  ;;  %4871 = verf.f32 %v2147_v30  ;;  %v6070_v32 = vadd.f32 %v5856_v16, %v5593_v35 }
 0x114   :  { %v4306_v11 = vpack.c.bf16 %v2731_v42, %v2731_v42  ;;  %v1550_v29 = vadd.f32 %v5858_v4, %v5593_v35  ;;  %v2729_v47 = vmul.f32 %v2533_v0, %v1945_v50  ;;  %v1850_v37 = vmul.f32 0.5, %v5963_v10  ;;  %v6122_v42 = vpop.f32.mrf.mxu0 }
 0x115   :  { %v4204_v59 = vpack.c.bf16 %v2629_v19, %v2629_v19  ;;  %4873 = verf.f32 %v2045_v7  ;;  %v4862_v20 = vpop.eup %4861  ;;  %v1950_v44 = vmul.f32 0.5, %v5976_v23  ;;  %v1848_v16 = vmul.f32 0.5, %v5981_v1 }
 0x116   :  { %3712 = vst.msk [vmem:[%s7804_s3 + $0x1dc] sm:$0xf] %vm3592_vm1, %v4306_v11  ;;  %v2145_v4 = vmul.f32 0.70710677, %v1529_v27  ;;  %v2050_v49 = vmul.f32 0.70710677, %v6070_v32  ;;  %v4304_v10 = vpack.c.bf16 %v2729_v47, %v2729_v47  ;;  %v6092_v13 = vadd.f32 %v5593_v35, %v5866_v22 }
 0x117   :  { %3610 = vst.msk [vmem:[%s7804_s3 + $0x44] sm:$0xf] %vm3592_vm1, %v4204_v59  ;;  %v2438_v63 = vadd.f32 1.0, %v4862_v20  ;;  %v2150_v61 = vmul.f32 0.70710677, %v1550_v29  ;;  %v1948_v52 = vmul.f32 0.5, %v1526_v14  ;;  %v6096_v23 = vadd.f32 %v5593_v35, %v5868_v56 }
 0x118   :  { %4875 = verf.f32 %v2145_v4  ;;  %v6100_v1 = vadd.f32 %v5880_v25, %v5593_v35  ;;  %3710 = vst.msk [vmem:[%s7804_s3 + $0x1d4] sm:$0xf] %vm3592_vm1, %v4304_v10  ;;  %v2048_v14 = vmul.f32 0.70710677, %v6092_v13  ;;  %v6113_v56 = vadd.f32 %v5882_v38, %v5593_v35  ;;  %v6120_v38 = vpop.f32.mrf.mxu1 }
 0x119   :  { %v4864_v15 = vpop.eup %4863  ;;  %v2634_v22 = vmul.f32 %v2438_v63, %v1850_v37  ;;  %4877 = verf.f32 %v2050_v49  ;;  %v1851_v48 = vmul.f32 0.5, %v6030_v2  ;;  %v2148_v62 = vmul.f32 0.70710677, %v6096_v23 }
 0x11a   :  { %v4866_v25 = vpop.eup %4865  ;;  %v2538_v57 = vadd.f32 1.0, %v4864_v15  ;;  %4879 = verf.f32 %v2150_v61  ;;  %v1951_v26 = vmul.f32 0.5, %v6038_v36  ;;  %v1849_v9 = vmul.f32 0.5, %v6042_v18 }
 0x11b   :  { %v4209_v55 = vpack.c.bf16 %v2634_v22, %v2634_v22  ;;  %v2436_v12 = vadd.f32 1.0, %v4866_v25  ;;  %4881 = verf.f32 %v2048_v14  ;;  %v2051_v54 = vmul.f32 0.70710677, %v6100_v1 }
 0x11c   :  { %v2734_v24 = vmul.f32 %v2538_v57, %v1950_v44  ;;  %4883 = verf.f32 %v2148_v62  ;;  %v2151_v36 = vmul.f32 0.70710677, %v6113_v56  ;;  %v6131_v30 = vadd.f32 %v5593_v35, %v5891_v43 }
 0x11d   :  { %v4868_v50 = vpop.eup %4867  ;;  %3615 = vst.msk [vmem:[%s7804_s3 + $0x58] sm:$0xf] %vm3592_vm1, %v4209_v55  ;;  %v2632_v2 = vmul.f32 %v2436_v12, %v1848_v16  ;;  %v6135_v18 = vadd.f32 %v5593_v35, %v5893_v58  ;;  %4885 = verf.f32 %v2051_v54  ;;  %v6139_v0 = vadd.f32 %v5909_v5, %v5593_v35  ;;  %v6148_v16 = vpop.f32.mrf.mxu1 }
 0x11e   :  { %v4309_v7 = vpack.c.bf16 %v2734_v24, %v2734_v24  ;;  %v2536_v19 = vadd.f32 1.0, %v4868_v50  ;;  %v1949_v59 = vmul.f32 0.5, %v1529_v27  ;;  %4887 = verf.f32 %v2151_v36  ;;  %v6150_v35 = vpop.f32.mrf.mxu0 }
 0x11f   :  { %v4207_v11 = vpack.c.bf16 %v2632_v2, %v2632_v2  ;;  %v2049_v47 = vmul.f32 0.70710677, %v6131_v30  ;;  %v4870_v37 = vpop.eup %4869  ;;  %v1854_v58 = vmul.f32 0.5, %v6070_v32  ;;  %v1954_v20 = vmul.f32 0.5, %v1550_v29  ;;  %v6160_v32 = vld [vmem:[%s7803_s2] ss:$0 sm:$0xff]  ;;  %v6178_v62 = vpop.f32.mrf.mxu1 }
 0x120   :  { %3715 = vst.msk [vmem:[%s7804_s3 + $0x1e8] sm:$0xf] %vm3592_vm1, %v4309_v7  ;;  %v2732_v43 = vmul.f32 %v2536_v19, %v1948_v52  ;;  %v2149_v44 = vmul.f32 0.70710677, %v6135_v18  ;;  %v4872_v5 = vpop.eup %4871  ;;  %v2439_v27 = vadd.f32 1.0, %v4870_v37  ;;  %v6164_v29 = vadd.f32 %v6160_v32, %v5911_v6 }
 0x121   :  { %3613 = vst.msk [vmem:[%s7804_s3 + $0x50] sm:$0xf] %vm3592_vm1, %v4207_v11  ;;  %4889 = verf.f32 %v2049_v47  ;;  %v2054_v4 = vmul.f32 0.70710677, %v6139_v0  ;;  %v2539_v63 = vadd.f32 1.0, %v4872_v5  ;;  %v6168_v61 = vadd.f32 %v6160_v32, %v5924_v8  ;;  %v6180_v8 = vpop.f32.mrf.mxu0  ;;  %v6205_v47 = vpop.f32.mrf.mxu1 }
 0x122   :  { %v4874_v49 = vpop.eup %4873  ;;  %v4307_v10 = vpack.c.bf16 %v2732_v43, %v2732_v43  ;;  %4891 = verf.f32 %v2149_v44  ;;  %v2635_v52 = vmul.f32 %v2439_v27, %v1851_v48  ;;  %v1852_v22 = vmul.f32 0.5, %v6092_v13 }
 0x123   :  { %v2437_v15 = vadd.f32 1.0, %v4874_v49  ;;  %4893 = verf.f32 %v2054_v4  ;;  %v2735_v6 = vmul.f32 %v2539_v63, %v1951_v26  ;;  %v1952_v14 = vmul.f32 0.5, %v6096_v23  ;;  %v6207_v37 = vpop.f32.mrf.mxu0 }
 0x124   :  { %3713 = vst.msk [vmem:[%s7804_s3 + $0x1e0] sm:$0xf] %vm3592_vm1, %v4307_v10  ;;  %v2154_v25 = vmul.f32 0.70710677, %v6164_v29  ;;  %v2052_v57 = vmul.f32 0.70710677, %v6168_v61  ;;  %v4210_v55 = vpack.c.bf16 %v2635_v52, %v2635_v52  ;;  %v6184_v12 = vadd.f32 %v6160_v32, %v5941_v53 }
 0x125   :  { %v4876_v48 = vpop.eup %4875  ;;  %v2633_v13 = vmul.f32 %v2437_v15, %v1849_v9  ;;  %v6188_v26 = vadd.f32 %v6160_v32, %v5943_v31  ;;  %v4310_v24 = vpack.c.bf16 %v2735_v6, %v2735_v6  ;;  %v1855_v50 = vmul.f32 0.5, %v6100_v1 }
 0x126   :  { %v4878_v23 = vpop.eup %4877  ;;  %v2537_v54 = vadd.f32 1.0, %v4876_v48  ;;  %4895 = verf.f32 %v2154_v25  ;;  %3616 = vst.msk [vmem:[%s7804_s3 + $0x5c] sm:$0xf] %vm3592_vm1, %v4210_v55  ;;  %v6197_v53 = vadd.f32 %v6160_v32, %v5965_v40  ;;  %v1955_v19 = vmul.f32 0.5, %v6113_v56  ;;  %v6224_v25 = vpop.f32.mrf.mxu1 }
 0x127   :  { %v4880_v2 = vpop.eup %4879  ;;  %v4208_v9 = vpack.c.bf16 %v2633_v13, %v2633_v13  ;;  %v2442_v36 = vadd.f32 1.0, %v4878_v23  ;;  %4897 = verf.f32 %v2052_v57  ;;  %3716 = vst.msk [vmem:[%s7804_s3 + $0x1ec] sm:$0xf] %vm3592_vm1, %v4310_v24  ;;  %v2152_v11 = vmul.f32 0.70710677, %v6184_v12  ;;  %v6226_v57 = vpop.f32.mrf.mxu0 }
 0x128   :  { %v4882_v31 = vpop.eup %4881  ;;  %v2733_v1 = vmul.f32 %v2537_v54, %v1949_v59  ;;  %v2542_v7 = vadd.f32 1.0, %v4880_v2  ;;  %v1853_v5 = vmul.f32 0.5, %v6131_v30  ;;  %v2055_v59 = vmul.f32 0.70710677, %v6188_v26 }
 0x129   :  { %v4884_v43 = vpop.eup %4883  ;;  %3614 = vst.msk [vmem:[%s7804_s3 + $0x54] sm:$0xf] %vm3592_vm1, %v4208_v9  ;;  %v2638_v40 = vmul.f32 %v2442_v36, %v1854_v58  ;;  %v2440_v44 = vadd.f32 1.0, %v4882_v31  ;;  %4899 = verf.f32 %v2152_v11  ;;  %v2155_v52 = vmul.f32 0.70710677, %v6197_v53 }
 0x12a   :  { %v4308_v27 = vpack.c.bf16 %v2733_v1, %v2733_v1  ;;  %v2738_v56 = vmul.f32 %v2542_v7, %v1954_v20  ;;  %v2540_v4 = vadd.f32 1.0, %v4884_v43  ;;  %v4886_v49 = vpop.eup %4885  ;;  %4901 = verf.f32 %v2055_v59  ;;  %v6256_v7 = vpop.f32.mrf.mxu1 }
 0x12b   :  { %v4213_v10 = vpack.c.bf16 %v2638_v40, %v2638_v40  ;;  %v2636_v63 = vmul.f32 %v2440_v44, %v1852_v22  ;;  %v4888_v15 = vpop.eup %4887  ;;  %v2443_v6 = vadd.f32 1.0, %v4886_v49  ;;  %v6222_v20 = vadd.f32 %v6160_v32, %v5949_v33 }
 0x12c   :  { %3714 = vst.msk [vmem:[%s7804_s3 + $0x1e4] sm:$0xf] %vm3592_vm1, %v4308_v27  ;;  %v4313_v58 = vpack.c.bf16 %v2738_v56, %v2738_v56  ;;  %v2736_v30 = vmul.f32 %v2540_v4, %v1952_v14  ;;  %v2543_v48 = vadd.f32 1.0, %v4888_v15  ;;  %4903 = verf.f32 %v2155_v52  ;;  %v6282_v52 = vpop.f32.mrf.mxu1 }
 0x12d   :  { %3619 = vst.msk [vmem:[%s7804_s3 + $0x68] sm:$0xf] %vm3592_vm1, %v4213_v10  ;;  %v4211_v22 = vpack.c.bf16 %v2636_v63, %v2636_v63  ;;  %v6234_v14 = vadd.f32 %v6160_v32, %v5991_v45  ;;  %v2639_v13 = vmul.f32 %v2443_v6, %v1855_v50  ;;  %v1953_v23 = vmul.f32 0.5, %v6135_v18 }
 0x12e   :  { %v4890_v55 = vpop.eup %4889  ;;  %3719 = vst.msk [vmem:[%s7804_s3 + $0x1f8] sm:$0xf] %vm3592_vm1, %v4313_v58  ;;  %v4311_v33 = vpack.c.bf16 %v2736_v30, %v2736_v30  ;;  %v2053_v24 = vmul.f32 0.70710677, %v6222_v20  ;;  %v2739_v45 = vmul.f32 %v2543_v48, %v1955_v19  ;;  %v1858_v9 = vmul.f32 0.5, %v6139_v0  ;;  %v6258_v19 = vpop.f32.mrf.mxu0 }
 0x12f   :  { %v4892_v54 = vpop.eup %4891  ;;  %3617 = vst.msk [vmem:[%s7804_s3 + $0x60] sm:$0xf] %vm3592_vm1, %v4211_v22  ;;  %v2441_v2 = vadd.f32 1.0, %v4890_v55  ;;  %v2153_v36 = vmul.f32 0.70710677, %v6234_v14  ;;  %v4214_v18 = vpack.c.bf16 %v2639_v13, %v2639_v13  ;;  %v6254_v1 = vadd.f32 %v6160_v32, %v5967_v60 }
 0x130   :  { %v4894_v31 = vpop.eup %4893  ;;  %3717 = vst.msk [vmem:[%s7804_s3 + $0x1f0] sm:$0xf] %vm3592_vm1, %v4311_v33  ;;  %v2541_v50 = vadd.f32 1.0, %v4892_v54  ;;  %4905 = verf.f32 %v2053_v24  ;;  %v4314_v0 = vpack.c.bf16 %v2739_v45, %v2739_v45  ;;  %v6267_v60 = vadd.f32 %v6160_v32, %v6016_v28  ;;  %v6284_v15 = vpop.f32.mrf.mxu0 }
 0x131   :  { %v2637_v11 = vmul.f32 %v2441_v2, %v1853_v5  ;;  %v2446_v43 = vadd.f32 1.0, %v4894_v31  ;;  %4907 = verf.f32 %v2153_v36  ;;  %3620 = vst.msk [vmem:[%s7804_s3 + $0x6c] sm:$0xf] %vm3592_vm1, %v4214_v18  ;;  %v2058_v44 = vmul.f32 0.70710677, %v6254_v1  ;;  %v6315_v45 = vpop.f32.mrf.mxu1 }
 0x132   :  { %v2737_v40 = vmul.f32 %v2541_v50, %v1953_v23  ;;  %3720 = vst.msk [vmem:[%s7804_s3 + $0x1fc] sm:$0xf] %vm3592_vm1, %v4314_v0  ;;  %v6275_v56 = vadd.f32 %v6160_v32, %v5993_v39  ;;  %v6279_v4 = vadd.f32 %v6160_v32, %v6045_v34  ;;  %v1958_v28 = vmul.f32 0.5, %v6164_v29  ;;  %v6317_v2 = vpop.f32.mrf.mxu0 }
 0x133   :  { %v4896_v59 = vpop.eup %4895  ;;  %v4212_v5 = vpack.c.bf16 %v2637_v11, %v2637_v11  ;;  %v2642_v27 = vmul.f32 %v2446_v43, %v1858_v9  ;;  %4909 = verf.f32 %v2058_v44  ;;  %v1856_v58 = vmul.f32 0.5, %v6168_v61 }
 0x134   :  { %v4898_v49 = vpop.eup %4897  ;;  %v4312_v10 = vpack.c.bf16 %v2737_v40, %v2737_v40  ;;  %v2546_v63 = vadd.f32 1.0, %v4896_v59  ;;  %v2158_v30 = vmul.f32 0.70710677, %v6267_v60  ;;  %v1956_v6 = vmul.f32 0.5, %v6184_v12  ;;  %v6341_v59 = vpop.f32.mrf.mxu1 }
 0x135   :  { %3618 = vst.msk [vmem:[%s7804_s3 + $0x64] sm:$0xf] %vm3592_vm1, %v4212_v5  ;;  %v4217_v39 = vpack.c.bf16 %v2642_v27, %v2642_v27  ;;  %v2444_v34 = vadd.f32 1.0, %v4898_v49  ;;  %v2056_v22 = vmul.f32 0.70710677, %v6275_v56  ;;  %v6305_v33 = vadd.f32 %v6160_v32, %v6018_v46  ;;  %v6343_v5 = vpop.f32.mrf.mxu0 }
 0x136   :  { %3718 = vst.msk [vmem:[%s7804_s3 + $0x1f4] sm:$0xf] %vm3592_vm1, %v4312_v10  ;;  %v2742_v29 = vmul.f32 %v2546_v63, %v1958_v28  ;;  %v2156_v48 = vmul.f32 0.70710677, %v6279_v4  ;;  %v4900_v55 = vpop.eup %4899  ;;  %4911 = verf.f32 %v2158_v30  ;;  %v6309_v13 = vadd.f32 %v6160_v32, %v6074_v41 }
 0x137   :  { %3623 = vst.msk [vmem:[%s7804_s3 + $0x78] sm:$0xf] %vm3592_vm1, %v4217_v39  ;;  %v2640_v61 = vmul.f32 %v2444_v34, %v1856_v58  ;;  %v4902_v12 = vpop.eup %4901  ;;  %v2544_v24 = vadd.f32 1.0, %v4900_v55  ;;  %4913 = verf.f32 %v2056_v22  ;;  %v6313_v54 = vadd.f32 %v6160_v32, %v6047_v51  ;;  %v6365_v22 = vpop.f32.mrf.mxu0 }
 0x138   :  { %v4317_v23 = vpack.c.bf16 %v2742_v29, %v2742_v29  ;;  %v1859_v46 = vmul.f32 0.5, %v6188_v26  ;;  %v2447_v36 = vadd.f32 1.0, %v4902_v12  ;;  %4915 = verf.f32 %v2156_v48 }
 0x139   :  { %v4215_v9 = vpack.c.bf16 %v2640_v61, %v2640_v61  ;;  %v4904_v31 = vpop.eup %4903  ;;  %v2740_v41 = vmul.f32 %v2544_v24, %v1956_v6  ;;  %v1959_v18 = vmul.f32 0.5, %v6197_v53  ;;  %v2059_v51 = vmul.f32 0.70710677, %v6305_v33  ;;  %v6363_v6 = vpop.f32.mrf.mxu1 }
 0x13a   :  { %3723 = vst.msk [vmem:[%s7804_s3 + $0x208] sm:$0xf] %vm3592_vm1, %v4317_v23  ;;  %v2159_v50 = vmul.f32 0.70710677, %v6309_v13  ;;  %v2643_v26 = vmul.f32 %v2447_v36, %v1859_v46  ;;  %v2547_v0 = vadd.f32 1.0, %v4904_v31  ;;  %v1857_v11 = vmul.f32 0.5, %v6222_v20 }
 0x13b   :  { %3621 = vst.msk [vmem:[%s7804_s3 + $0x70] sm:$0xf] %vm3592_vm1, %v4215_v9  ;;  %v2057_v43 = vmul.f32 0.70710677, %v6313_v54  ;;  %v4315_v40 = vpack.c.bf16 %v2740_v41, %v2740_v41  ;;  %4917 = verf.f32 %v2059_v51  ;;  %v6335_v53 = vadd.f32 %v6160_v32, %v6102_v17 }
 0x13c   :  { %v6339_v44 = vadd.f32 %v6160_v32, %v6076_v21  ;;  %v4218_v49 = vpack.c.bf16 %v2643_v26, %v2643_v26  ;;  %v2743_v10 = vmul.f32 %v2547_v0, %v1959_v18  ;;  %4919 = verf.f32 %v2159_v50  ;;  %v6393_v18 = vpop.f32.mrf.mxu1 }
 0x13d   :  { %v4906_v27 = vpop.eup %4905  ;;  %v6347_v20 = vadd.f32 %v6160_v32, %v6120_v38  ;;  %3721 = vst.msk [vmem:[%s7804_s3 + $0x200] sm:$0xf] %vm3592_vm1, %v4315_v40  ;;  %v1957_v17 = vmul.f32 0.5, %v6234_v14  ;;  %4921 = verf.f32 %v2057_v43  ;;  %v2157_v63 = vmul.f32 0.70710677, %v6335_v53 }
 0x13e   :  { %v4908_v28 = vpop.eup %4907  ;;  %v2445_v21 = vadd.f32 1.0, %v4906_v27  ;;  %3624 = vst.msk [vmem:[%s7804_s3 + $0x7c] sm:$0xf] %vm3592_vm1, %v4218_v49  ;;  %v4318_v39 = vpack.c.bf16 %v2743_v10, %v2743_v10  ;;  %v1862_v58 = vmul.f32 0.5, %v6254_v1  ;;  %v2062_v34 = vmul.f32 0.70710677, %v6339_v44 }
 0x13f   :  { %v2545_v38 = vadd.f32 1.0, %v4908_v28  ;;  %v1962_v29 = vmul.f32 0.5, %v6267_v60  ;;  %4923 = verf.f32 %v2157_v63  ;;  %v2162_v14 = vmul.f32 0.70710677, %v6347_v20 }
 0x140   :  { %v2641_v30 = vmul.f32 %v2445_v21, %v1857_v11  ;;  %v4910_v48 = vpop.eup %4909  ;;  %3724 = vst.msk [vmem:[%s7804_s3 + $0x20c] sm:$0xf] %vm3592_vm1, %v4318_v39  ;;  %4925 = verf.f32 %v2062_v34  ;;  %v6373_v1 = vadd.f32 %v6160_v32, %v6104_v3  ;;  %v6377_v60 = vadd.f32 %v6160_v32, %v6148_v16  ;;  %v6421_v21 = vpop.f32.mrf.mxu1 }
 0x141   :  { %v2741_v55 = vmul.f32 %v2545_v38, %v1957_v17  ;;  %v2450_v12 = vadd.f32 1.0, %v4910_v48  ;;  %4927 = verf.f32 %v2162_v14  ;;  %v6381_v23 = vadd.f32 %v6160_v32, %v6122_v42 }
 0x142   :  { %v4216_v61 = vpack.c.bf16 %v2641_v30, %v2641_v30  ;;  %v1860_v9 = vmul.f32 0.5, %v6275_v56  ;;  %v1960_v46 = vmul.f32 0.5, %v6279_v4  ;;  %v2060_v36 = vmul.f32 0.70710677, %v6373_v1  ;;  %v6395_v56 = vpop.f32.mrf.mxu0 }
 0x143   :  { %v4316_v24 = vpack.c.bf16 %v2741_v55, %v2741_v55  ;;  %v4912_v3 = vpop.eup %4911  ;;  %v2646_v16 = vmul.f32 %v2450_v12, %v1862_v58  ;;  %v1863_v31 = vmul.f32 0.5, %v6305_v33  ;;  %v2160_v41 = vmul.f32 0.70710677, %v6377_v60  ;;  %v6444_v12 = vpop.f32.mrf.mxu1 }
 0x144   :  { %3622 = vst.msk [vmem:[%s7804_s3 + $0x74] sm:$0xf] %vm3592_vm1, %v4216_v61  ;;  %v2063_v42 = vmul.f32 0.70710677, %v6381_v23  ;;  %v4914_v4 = vpop.eup %4913  ;;  %v2550_v51 = vadd.f32 1.0, %v4912_v3  ;;  %4929 = verf.f32 %v2060_v36  ;;  %v6403_v50 = vadd.f32 %v6160_v32, %v6178_v62 }
 0x145   :  { %3722 = vst.msk [vmem:[%s7804_s3 + $0x204] sm:$0xf] %vm3592_vm1, %v4316_v24  ;;  %v6407_v33 = vadd.f32 %v6160_v32, %v6150_v35  ;;  %v4916_v26 = vpop.eup %4915  ;;  %v4221_v0 = vpack.c.bf16 %v2646_v16, %v2646_v16  ;;  %v2448_v11 = vadd.f32 1.0, %v4914_v4  ;;  %4931 = verf.f32 %v2160_v41 }
 0x146   :  { %v6411_v43 = vadd.f32 %v6160_v32, %v6205_v47  ;;  %v2746_v40 = vmul.f32 %v2550_v51, %v1962_v29  ;;  %v2548_v27 = vadd.f32 1.0, %v4916_v26  ;;  %v1963_v49 = vmul.f32 0.5, %v6309_v13  ;;  %v6423_v47 = vpop.f32.mrf.mxu0 }
 0x147   :  { %4933 = verf.f32 %v2063_v42  ;;  %3627 = vst.msk [vmem:[%s7804_s3 + $0x88] sm:$0xf] %vm3592_vm1, %v4221_v0  ;;  %v2644_v35 = vmul.f32 %v2448_v11, %v1860_v9  ;;  %v1861_v62 = vmul.f32 0.5, %v6313_v54  ;;  %v2163_v10 = vmul.f32 0.70710677, %v6403_v50 }
 0x148   :  { %v2061_v28 = vmul.f32 0.70710677, %v6407_v33  ;;  %v4918_v17 = vpop.eup %4917  ;;  %v4321_v63 = vpack.c.bf16 %v2746_v40, %v2746_v40  ;;  %v2744_v13 = vmul.f32 %v2548_v27, %v1960_v46  ;;  %v1961_v39 = vmul.f32 0.5, %v6335_v53  ;;  %v6446_v24 = vpop.f32.mrf.mxu0 }
 0x149   :  { %v2161_v38 = vmul.f32 0.70710677, %v6411_v43  ;;  %v4920_v58 = vpop.eup %4919  ;;  %v4219_v34 = vpack.c.bf16 %v2644_v35, %v2644_v35  ;;  %v2451_v30 = vadd.f32 1.0, %v4918_v17  ;;  %4935 = verf.f32 %v2163_v10  ;;  %v6467_v27 = vpop.f32.mrf.mxu1 }
 0x14a   :  { %v6429_v54 = vadd.f32 %v6160_v32, %v6180_v8  ;;  %v4922_v29 = vpop.eup %4921  ;;  %3727 = vst.msk [vmem:[%s7804_s3 + $0x218] sm:$0xf] %vm3592_vm1, %v4321_v63  ;;  %v4319_v14 = vpack.c.bf16 %v2744_v13, %v2744_v13  ;;  %v2551_v48 = vadd.f32 1.0, %v4920_v58  ;;  %4937 = verf.f32 %v2061_v28 }
 0x14b   :  { %v6437_v53 = vadd.f32 %v6160_v32, %v6224_v25  ;;  %3625 = vst.msk [vmem:[%s7804_s3 + $0x80] sm:$0xf] %vm3592_vm1, %v4219_v34  ;;  %v2647_v8 = vmul.f32 %v2451_v30, %v1863_v31  ;;  %v2449_v55 = vadd.f32 1.0, %v4922_v29  ;;  %v1866_v61 = vmul.f32 0.5, %v6339_v44 }
 0x14c   :  { %4939 = verf.f32 %v2161_v38  ;;  %v4924_v9 = vpop.eup %4923  ;;  %3725 = vst.msk [vmem:[%s7804_s3 + $0x210] sm:$0xf] %vm3592_vm1, %v4319_v14  ;;  %v2747_v25 = vmul.f32 %v2551_v48, %v1963_v49  ;;  %v1966_v46 = vmul.f32 0.5, %v6347_v20  ;;  %v2066_v36 = vmul.f32 0.70710677, %v6429_v54 }
 0x14d   :  { %v2166_v3 = vmul.f32 0.70710677, %v6437_v53  ;;  %v4926_v16 = vpop.eup %4925  ;;  %v4222_v44 = vpack.c.bf16 %v2647_v8, %v2647_v8  ;;  %v2645_v31 = vmul.f32 %v2449_v55, %v1861_v62  ;;  %v2549_v41 = vadd.f32 1.0, %v4924_v9 }
 0x14e   :  { %v6457_v42 = vadd.f32 %v6160_v32, %v6207_v37  ;;  %v4928_v4 = vpop.eup %4927  ;;  %v4322_v51 = vpack.c.bf16 %v2747_v25, %v2747_v25  ;;  %v2454_v26 = vadd.f32 1.0, %v4926_v16  ;;  %4941 = verf.f32 %v2066_v36  ;;  %v6469_v37 = vpop.f32.mrf.mxu0 }
 0x14f   :  { %v6461_v0 = vadd.f32 %v6160_v32, %v6256_v7  ;;  %3628 = vst.msk [vmem:[%s7804_s3 + $0x8c] sm:$0xf] %vm3592_vm1, %v4222_v44  ;;  %v4220_v20 = vpack.c.bf16 %v2645_v31, %v2645_v31  ;;  %v2745_v11 = vmul.f32 %v2549_v41, %v1961_v39  ;;  %v2554_v40 = vadd.f32 1.0, %v4928_v4 }
 0x150   :  { %4943 = verf.f32 %v2166_v3  ;;  %3728 = vst.msk [vmem:[%s7804_s3 + $0x21c] sm:$0xf] %vm3592_vm1, %v4322_v51  ;;  %v2650_v7 = vmul.f32 %v2454_v26, %v1866_v61  ;;  %v1864_v49 = vmul.f32 0.5, %v6373_v1  ;;  %v1964_v35 = vmul.f32 0.5, %v6377_v60  ;;  %v6498_v14 = vpop.f32.mrf.mxu0 }
 0x151   :  { %v2064_v62 = vmul.f32 0.70710677, %v6457_v42  ;;  %v4930_v10 = vpop.eup %4929  ;;  %3626 = vst.msk [vmem:[%s7804_s3 + $0x84] sm:$0xf] %vm3592_vm1, %v4220_v20  ;;  %v4320_v28 = vpack.c.bf16 %v2745_v11, %v2745_v11  ;;  %v2750_v17 = vmul.f32 %v2554_v40, %v1966_v46  ;;  %v2164_v63 = vmul.f32 0.70710677, %v6461_v0 }
 0x152   :  { %v6485_v13 = vadd.f32 %v6160_v32, %v6226_v57  ;;  %v4932_v39 = vpop.eup %4931  ;;  %v4225_v1 = vpack.c.bf16 %v2650_v7, %v2650_v7  ;;  %v2452_v38 = vadd.f32 1.0, %v4930_v10  ;;  %v6489_v60 = vadd.f32 %v6160_v32, %v6282_v52  ;;  %v6496_v57 = vpop.f32.mrf.mxu1 }
 0x153   :  { %4945 = verf.f32 %v2064_v62  ;;  %3726 = vst.msk [vmem:[%s7804_s3 + $0x214] sm:$0xf] %vm3592_vm1, %v4320_v28  ;;  %v4325_v34 = vpack.c.bf16 %v2750_v17, %v2750_v17  ;;  %v2552_v30 = vadd.f32 1.0, %v4932_v39  ;;  %v1867_v29 = vmul.f32 0.5, %v6381_v23  ;;  %v6526_v4 = vpop.f32.mrf.mxu0 }
 0x154   :  { %v4934_v58 = vpop.eup %4933  ;;  %4947 = verf.f32 %v2164_v63  ;;  %3631 = vst.msk [vmem:[%s7804_s3 + $0x98] sm:$0xf] %vm3592_vm1, %v4225_v1  ;;  %v2648_v52 = vmul.f32 %v2452_v38, %v1864_v49  ;;  %v1967_v8 = vmul.f32 0.5, %v6403_v50  ;;  %v2067_v55 = vmul.f32 0.70710677, %v6485_v13 }
 0x155   :  { %v2455_v48 = vadd.f32 1.0, %v4934_v58  ;;  %3731 = vst.msk [vmem:[%s7804_s3 + $0x228] sm:$0xf] %vm3592_vm1, %v4325_v34  ;;  %v2748_v23 = vmul.f32 %v2552_v30, %v1964_v35  ;;  %v2167_v61 = vmul.f32 0.70710677, %v6489_v60  ;;  %v6513_v9 = vadd.f32 %v6160_v32, %v6258_v19  ;;  %v6524_v19 = vpop.f32.mrf.mxu1  ;;  %v6555_v63 = vpop.f32.mrf.mxu0 }
 0x156   :  { %v6517_v25 = vadd.f32 %v6160_v32, %v6315_v45  ;;  %v4936_v46 = vpop.eup %4935  ;;  %v4223_v50 = vpack.c.bf16 %v2648_v52, %v2648_v52  ;;  %4949 = verf.f32 %v2067_v55  ;;  %v6521_v3 = vadd.f32 %v6160_v32, %v6284_v15 }
 0x157   :  { %v2651_v36 = vmul.f32 %v2455_v48, %v1867_v29  ;;  %v4938_v16 = vpop.eup %4937  ;;  %v4323_v44 = vpack.c.bf16 %v2748_v23, %v2748_v23  ;;  %v2555_v31 = vadd.f32 1.0, %v4936_v46  ;;  %v1865_v41 = vmul.f32 0.5, %v6407_v33  ;;  %v6553_v17 = vpop.f32.mrf.mxu1 }
 0x158   :  { %4951 = verf.f32 %v2167_v61  ;;  %3629 = vst.msk [vmem:[%s7804_s3 + $0x90] sm:$0xf] %vm3592_vm1, %v4223_v50  ;;  %v2453_v26 = vadd.f32 1.0, %v4938_v16  ;;  %v1965_v15 = vmul.f32 0.5, %v6411_v43  ;;  %v2065_v20 = vmul.f32 0.70710677, %v6513_v9 }
 0x159   :  { %v4940_v45 = vpop.eup %4939  ;;  %v4226_v51 = vpack.c.bf16 %v2651_v36, %v2651_v36  ;;  %3729 = vst.msk [vmem:[%s7804_s3 + $0x220] sm:$0xf] %vm3592_vm1, %v4323_v44  ;;  %v2751_v33 = vmul.f32 %v2555_v31, %v1967_v8  ;;  %v1870_v40 = vmul.f32 0.5, %v6429_v54  ;;  %v2165_v7 = vmul.f32 0.70710677, %v6517_v25  ;;  %v6589_v23 = vpop.f32.mrf.mxu1 }
 0x15a   :  { %v2553_v11 = vadd.f32 1.0, %v4940_v45  ;;  %v2649_v49 = vmul.f32 %v2453_v26, %v1865_v41  ;;  %4953 = verf.f32 %v2065_v20  ;;  %v2070_v43 = vmul.f32 0.70710677, %v6521_v3 }
 0x15b   :  { %3632 = vst.msk [vmem:[%s7804_s3 + $0x9c] sm:$0xf] %vm3592_vm1, %v4226_v51  ;;  %v6547_v35 = vadd.f32 %v6160_v32, %v6341_v59  ;;  %v4942_v62 = vpop.eup %4941  ;;  %v4326_v10 = vpack.c.bf16 %v2751_v33, %v2751_v33  ;;  %4955 = verf.f32 %v2165_v7  ;;  %v6551_v54 = vadd.f32 %v6160_v32, %v6317_v2  ;;  %v6609_v20 = vpop.f32.mrf.mxu1 }
 0x15c   :  { %v2749_v28 = vmul.f32 %v2553_v11, %v1965_v15  ;;  %v4224_v1 = vpack.c.bf16 %v2649_v49, %v2649_v49  ;;  %v2458_v38 = vadd.f32 1.0, %v4942_v62  ;;  %v1970_v58 = vmul.f32 0.5, %v6437_v53 }
 0x15d   :  { %v4944_v39 = vpop.eup %4943  ;;  %4957 = verf.f32 %v2070_v43  ;;  %3732 = vst.msk [vmem:[%s7804_s3 + $0x22c] sm:$0xf] %vm3592_vm1, %v4326_v10  ;;  %v1868_v2 = vmul.f32 0.5, %v6457_v42  ;;  %v2170_v30 = vmul.f32 0.70710677, %v6547_v35  ;;  %v6571_v52 = vadd.f32 %v6160_v32, %v6363_v6 }
 0x15e   :  { %v4324_v59 = vpack.c.bf16 %v2749_v28, %v2749_v28  ;;  %v2558_v34 = vadd.f32 1.0, %v4944_v39  ;;  %3630 = vst.msk [vmem:[%s7804_s3 + $0x94] sm:$0xf] %vm3592_vm1, %v4224_v1  ;;  %v2654_v29 = vmul.f32 %v2458_v38, %v1870_v40  ;;  %v2068_v53 = vmul.f32 0.70710677, %v6551_v54 }
 0x15f   :  { %v6575_v48 = vadd.f32 %v6160_v32, %v6343_v5  ;;  %4959 = verf.f32 %v2170_v30  ;;  %v6583_v55 = vadd.f32 %v6160_v32, %v6393_v18  ;;  %v6587_v6 = vadd.f32 %v6160_v32, %v6365_v22  ;;  %v6591_v5 = vpop.f32.mrf.mxu0 }
 0x160   :  { %v4946_v8 = vpop.eup %4945  ;;  %3730 = vst.msk [vmem:[%s7804_s3 + $0x224] sm:$0xf] %vm3592_vm1, %v4324_v59  ;;  %v2754_v42 = vmul.f32 %v2558_v34, %v1970_v58  ;;  %v4229_v46 = vpack.c.bf16 %v2654_v29, %v2654_v29  ;;  %v1968_v36 = vmul.f32 0.5, %v6461_v0  ;;  %4961 = verf.f32 %v2068_v53  ;;  %v6637_v58 = vpop.f32.mrf.mxu1 }
 0x161   :  { %v4948_v61 = vpop.eup %4947  ;;  %v2456_v50 = vadd.f32 1.0, %v4946_v8  ;;  %v1871_v31 = vmul.f32 0.5, %v6485_v13  ;;  %v2168_v18 = vmul.f32 0.70710677, %v6571_v52  ;;  %v1971_v41 = vmul.f32 0.5, %v6489_v60  ;;  %v6611_v33 = vpop.f32.mrf.mxu0 }
 0x162   :  { %v4329_v16 = vpack.c.bf16 %v2754_v42, %v2754_v42  ;;  %v2556_v44 = vadd.f32 1.0, %v4948_v61  ;;  %3635 = vst.msk [vmem:[%s7804_s3 + $0xa8] sm:$0xf] %vm3592_vm1, %v4229_v46  ;;  %v2071_v45 = vmul.f32 0.70710677, %v6575_v48  ;;  %v1869_v26 = vmul.f32 0.5, %v6513_v9 }
 0x163   :  { %v2652_v22 = vmul.f32 %v2456_v50, %v1868_v2  ;;  %v2171_v51 = vmul.f32 0.70710677, %v6583_v55  ;;  %v4950_v0 = vpop.eup %4949  ;;  %4963 = verf.f32 %v2168_v18  ;;  %v2069_v15 = vmul.f32 0.70710677, %v6587_v6 }
 0x164   :  { %3735 = vst.msk [vmem:[%s7804_s3 + $0x238] sm:$0xf] %vm3592_vm1, %v4329_v16  ;;  %v2752_v13 = vmul.f32 %v2556_v44, %v1968_v36  ;;  %v2459_v40 = vadd.f32 1.0, %v4950_v0  ;;  %4965 = verf.f32 %v2071_v45  ;;  %v6615_v7 = vadd.f32 %v6160_v32, %v6421_v21  ;;  %v6665_v16 = vpop.f32.mrf.mxu1 }
 0x165   :  { %v4952_v60 = vpop.eup %4951  ;;  %v4227_v11 = vpack.c.bf16 %v2652_v22, %v2652_v22  ;;  %4967 = verf.f32 %v2171_v51  ;;  %v6619_v9 = vadd.f32 %v6160_v32, %v6395_v56  ;;  %v1969_v10 = vmul.f32 0.5, %v6517_v25  ;;  %v6639_v25 = vpop.f32.mrf.mxu0 }
 0x166   :  { %v4327_v49 = vpack.c.bf16 %v2752_v13, %v2752_v13  ;;  %v2559_v43 = vadd.f32 1.0, %v4952_v60  ;;  %v2655_v62 = vmul.f32 %v2459_v40, %v1871_v31  ;;  %4969 = verf.f32 %v2069_v15 }
 0x167   :  { %3633 = vst.msk [vmem:[%s7804_s3 + $0xa0] sm:$0xf] %vm3592_vm1, %v4227_v11  ;;  %v2169_v28 = vmul.f32 0.70710677, %v6615_v7  ;;  %v4954_v21 = vpop.eup %4953  ;;  %v1874_v56 = vmul.f32 0.5, %v6521_v3  ;;  %v6635_v38 = vadd.f32 %v6160_v32, %v6444_v12  ;;  %v6643_v30 = vadd.f32 %v6160_v32, %v6423_v47  ;;  %v6687_v11 = vpop.f32.mrf.mxu1 }
 0x168   :  { %3733 = vst.msk [vmem:[%s7804_s3 + $0x230] sm:$0xf] %vm3592_vm1, %v4327_v49  ;;  %v2755_v39 = vmul.f32 %v2559_v43, %v1971_v41  ;;  %v2074_v1 = vmul.f32 0.70710677, %v6619_v9  ;;  %v4956_v59 = vpop.eup %4955  ;;  %v4230_v34 = vpack.c.bf16 %v2655_v62, %v2655_v62  ;;  %v2457_v2 = vadd.f32 1.0, %v4954_v21 }
 0x169   :  { %4971 = verf.f32 %v2169_v28  ;;  %v2557_v53 = vadd.f32 1.0, %v4956_v59  ;;  %v1974_v8 = vmul.f32 0.5, %v6547_v35  ;;  %v1872_v61 = vmul.f32 0.5, %v6551_v54  ;;  %v6667_v54 = vpop.f32.mrf.mxu0 }
 0x16a   :  { %v4958_v29 = vpop.eup %4957  ;;  %v4330_v3 = vpack.c.bf16 %v2755_v39, %v2755_v39  ;;  %4973 = verf.f32 %v2074_v1  ;;  %3636 = vst.msk [vmem:[%s7804_s3 + $0xac] sm:$0xf] %vm3592_vm1, %v4230_v34  ;;  %v2653_v12 = vmul.f32 %v2457_v2, %v1869_v26  ;;  %v2174_v46 = vmul.f32 0.70710677, %v6635_v38 }
 0x16b   :  { %v2462_v42 = vadd.f32 1.0, %v4958_v29  ;;  %v2753_v47 = vmul.f32 %v2557_v53, %v1969_v10  ;;  %v2072_v35 = vmul.f32 0.70710677, %v6643_v30  ;;  %v6659_v50 = vadd.f32 %v6160_v32, %v6467_v27  ;;  %v6689_v40 = vpop.f32.mrf.mxu0 }
 0x16c   :  { %3736 = vst.msk [vmem:[%s7804_s3 + $0x23c] sm:$0xf] %vm3592_vm1, %v4330_v3  ;;  %v6663_v36 = vadd.f32 %v6160_v32, %v6446_v24  ;;  %v4960_v44 = vpop.eup %4959  ;;  %v4228_v31 = vpack.c.bf16 %v2653_v12, %v2653_v12  ;;  %4975 = verf.f32 %v2174_v46  ;;  %v6671_v22 = vadd.f32 %v6160_v32, %v6496_v57 }
 0x16d   :  { %v2658_v18 = vmul.f32 %v2462_v42, %v1874_v56  ;;  %v4962_v41 = vpop.eup %4961  ;;  %v4328_v45 = vpack.c.bf16 %v2753_v47, %v2753_v47  ;;  %v2562_v27 = vadd.f32 1.0, %v4960_v44  ;;  %v1972_v51 = vmul.f32 0.5, %v6571_v52  ;;  %v6716_v3 = vpop.f32.mrf.mxu0 }
 0x16e   :  { %4977 = verf.f32 %v2072_v35  ;;  %3634 = vst.msk [vmem:[%s7804_s3 + $0xa4] sm:$0xf] %vm3592_vm1, %v4228_v31  ;;  %v2460_v0 = vadd.f32 1.0, %v4962_v41  ;;  %v1875_v13 = vmul.f32 0.5, %v6575_v48  ;;  %v2172_v26 = vmul.f32 0.70710677, %v6659_v50 }
 0x16f   :  { %v4233_v24 = vpack.c.bf16 %v2658_v18, %v2658_v18  ;;  %3734 = vst.msk [vmem:[%s7804_s3 + $0x234] sm:$0xf] %vm3592_vm1, %v4328_v45  ;;  %v2758_v57 = vmul.f32 %v2562_v27, %v1974_v8  ;;  %v1975_v52 = vmul.f32 0.5, %v6583_v55  ;;  %v2075_v15 = vmul.f32 0.70710677, %v6663_v36  ;;  %v6735_v27 = vpop.f32.mrf.mxu0 }
 0x170   :  { %v2175_v60 = vmul.f32 0.70710677, %v6671_v22  ;;  %v4964_v49 = vpop.eup %4963  ;;  %v2656_v48 = vmul.f32 %v2460_v0, %v1872_v61  ;;  %4979 = verf.f32 %v2172_v26  ;;  %v6697_v43 = vadd.f32 %v6160_v32, %v6469_v37 }
 0x171   :  { %3639 = vst.msk [vmem:[%s7804_s3 + $0xb8] sm:$0xf] %vm3592_vm1, %v4233_v24  ;;  %v6701_v55 = vadd.f32 %v6160_v32, %v6524_v19  ;;  %v4966_v62 = vpop.eup %4965  ;;  %v4333_v10 = vpack.c.bf16 %v2758_v57, %v2758_v57  ;;  %v2560_v28 = vadd.f32 1.0, %v4964_v49  ;;  %4981 = verf.f32 %v2075_v15 }
 0x172   :  { %v6705_v21 = vadd.f32 %v6160_v32, %v6498_v14  ;;  %v4968_v39 = vpop.eup %4967  ;;  %v4231_v56 = vpack.c.bf16 %v2656_v48, %v2656_v48  ;;  %v2463_v1 = vadd.f32 1.0, %v4966_v62  ;;  %v1873_v59 = vmul.f32 0.5, %v6587_v6  ;;  %v6714_v14 = vpop.f32.mrf.mxu1 }
 0x173   :  { %4983 = verf.f32 %v2175_v60  ;;  %v4970_v37 = vpop.eup %4969  ;;  %3739 = vst.msk [vmem:[%s7804_s3 + $0x248] sm:$0xf] %vm3592_vm1, %v4333_v10  ;;  %v2756_v19 = vmul.f32 %v2560_v28, %v1972_v51  ;;  %v2563_v34 = vadd.f32 1.0, %v4968_v39  ;;  %v1973_v2 = vmul.f32 0.5, %v6615_v7 }
 0x174   :  { %v2073_v29 = vmul.f32 0.70710677, %v6697_v43  ;;  %3637 = vst.msk [vmem:[%s7804_s3 + $0xb0] sm:$0xf] %vm3592_vm1, %v4231_v56  ;;  %v2659_v6 = vmul.f32 %v2463_v1, %v1875_v13  ;;  %v2461_v53 = vadd.f32 1.0, %v4970_v37  ;;  %v1878_v8 = vmul.f32 0.5, %v6619_v9  ;;  %v6733_v45 = vpop.f32.mrf.mxu1 }
 0x175   :  { %v2173_v12 = vmul.f32 0.70710677, %v6701_v55  ;;  %v4331_v61 = vpack.c.bf16 %v2756_v19, %v2756_v19  ;;  %v2759_v7 = vmul.f32 %v2563_v34, %v1975_v52  ;;  %v2078_v46 = vmul.f32 0.70710677, %v6705_v21 }
 0x176   :  { %v4972_v42 = vpop.eup %4971  ;;  %4985 = verf.f32 %v2073_v29  ;;  %v4234_v35 = vpack.c.bf16 %v2659_v6, %v2659_v6  ;;  %v2657_v44 = vmul.f32 %v2461_v53, %v1873_v59  ;;  %v6731_v41 = vadd.f32 %v6160_v32, %v6553_v17  ;;  %v6766_v28 = vpop.f32.mrf.mxu1  ;;  %v6784_v59 = vld [vmem:[%s7803_s2] ss:$0 sm:$0xff] }
 0x177   :  { %v4974_v47 = vpop.eup %4973  ;;  %v2561_v31 = vadd.f32 1.0, %v4972_v42  ;;  %4987 = verf.f32 %v2173_v12  ;;  %3737 = vst.msk [vmem:[%s7804_s3 + $0x240] sm:$0xf] %vm3592_vm1, %v4331_v61  ;;  %v4334_v18 = vpack.c.bf16 %v2759_v7, %v2759_v7  ;;  %v6743_v0 = vadd.f32 %v6160_v32, %v6526_v4 }
 0x178   :  { %v2466_v9 = vadd.f32 1.0, %v4974_v47  ;;  %4989 = verf.f32 %v2078_v46  ;;  %3640 = vst.msk [vmem:[%s7804_s3 + $0xbc] sm:$0xf] %vm3592_vm1, %v4234_v35  ;;  %v4232_v51 = vpack.c.bf16 %v2657_v44, %v2657_v44  ;;  %v6747_v13 = vadd.f32 %v6160_v32, %v6589_v23 }
 0x179   :  { %v2757_v24 = vmul.f32 %v2561_v31, %v1973_v2  ;;  %v4976_v17 = vpop.eup %4975  ;;  %3740 = vst.msk [vmem:[%s7804_s3 + $0x24c] sm:$0xf] %vm3592_vm1, %v4334_v18  ;;  %v1978_v57 = vmul.f32 0.5, %v6635_v38  ;;  %v2178_v52 = vmul.f32 0.70710677, %v6731_v41  ;;  %v6757_v15 = vadd.f32 %v6160_v32, %v6555_v63  ;;  %v6768_v32 = vpop.f32.mrf.mxu0 }
 0x17a   :  { %v2662_v26 = vmul.f32 %v2466_v9, %v1878_v8  ;;  %3638 = vst.msk [vmem:[%s7804_s3 + $0xb4] sm:$0xf] %vm3592_vm1, %v4232_v51  ;;  %v2566_v60 = vadd.f32 1.0, %v4976_v17  ;;  %v1876_v49 = vmul.f32 0.5, %v6643_v30  ;;  %v2076_v48 = vmul.f32 0.70710677, %v6743_v0 }
 0x17b   :  { %v4978_v4 = vpop.eup %4977  ;;  %v4332_v23 = vpack.c.bf16 %v2757_v24, %v2757_v24  ;;  %v1976_v10 = vmul.f32 0.5, %v6659_v50  ;;  %4991 = verf.f32 %v2178_v52  ;;  %v1879_v39 = vmul.f32 0.5, %v6663_v36  ;;  %v6801_v42 = vpop.f32.mrf.mxu0 }
 0x17c   :  { %v4237_v62 = vpack.c.bf16 %v2662_v26, %v2662_v26  ;;  %v2464_v38 = vadd.f32 1.0, %v4978_v4  ;;  %v2762_v63 = vmul.f32 %v2566_v60, %v1978_v57  ;;  %4993 = verf.f32 %v2076_v48 }
 0x17d   :  { %3738 = vst.msk [vmem:[%s7804_s3 + $0x244] sm:$0xf] %vm3592_vm1, %v4332_v23  ;;  %v2176_v30 = vmul.f32 0.70710677, %v6747_v13  ;;  %v4980_v56 = vpop.eup %4979  ;;  %v2079_v1 = vmul.f32 0.70710677, %v6757_v15  ;;  %v6788_v36 = vadd.f32 %v6784_v59, %v6609_v20  ;;  %v6792_v37 = vadd.f32 %v6784_v59, %v6591_v5  ;;  %v6799_v20 = vpop.f32.mrf.mxu1 }
 0x17e   :  { %3643 = vst.msk [vmem:[%s7804_s3 + $0xc8] sm:$0xf] %vm3592_vm1, %v4237_v62  ;;  %v2660_v50 = vmul.f32 %v2464_v38, %v1876_v49  ;;  %v4982_v19 = vpop.eup %4981  ;;  %v4337_v34 = vpack.c.bf16 %v2762_v63, %v2762_v63  ;;  %v2564_v2 = vadd.f32 1.0, %v4980_v56  ;;  %v6796_v29 = vadd.f32 %v6784_v59, %v6637_v58  ;;  %v6826_v26 = vpop.f32.mrf.mxu0 }
 0x17f   :  { %4995 = verf.f32 %v2176_v30  ;;  %v2467_v8 = vadd.f32 1.0, %v4982_v19  ;;  %v1979_v12 = vmul.f32 0.5, %v6671_v22  ;;  %v1877_v58 = vmul.f32 0.5, %v6697_v43 }
 0x180   :  { %v4984_v6 = vpop.eup %4983  ;;  %v4235_v53 = vpack.c.bf16 %v2660_v50, %v2660_v50  ;;  %4997 = verf.f32 %v2079_v1  ;;  %3743 = vst.msk [vmem:[%s7804_s3 + $0x258] sm:$0xf] %vm3592_vm1, %v4337_v34  ;;  %v2760_v5 = vmul.f32 %v2564_v2, %v1976_v10  ;;  %v2179_v7 = vmul.f32 0.70710677, %v6788_v36  ;;  %v6858_v30 = vpop.f32.mrf.mxu0 }
 0x181   :  { %v2567_v61 = vadd.f32 1.0, %v4984_v6  ;;  %v2663_v22 = vmul.f32 %v2467_v8, %v1879_v39  ;;  %v1977_v46 = vmul.f32 0.5, %v6701_v55  ;;  %v2077_v47 = vmul.f32 0.70710677, %v6792_v37  ;;  %v6824_v55 = vpop.f32.mrf.mxu1 }
 0x182   :  { %3641 = vst.msk [vmem:[%s7804_s3 + $0xc0] sm:$0xf] %vm3592_vm1, %v4235_v53  ;;  %v2177_v35 = vmul.f32 0.70710677, %v6796_v29  ;;  %v4335_v31 = vpack.c.bf16 %v2760_v5, %v2760_v5  ;;  %4999 = verf.f32 %v2179_v7  ;;  %v6818_v43 = vadd.f32 %v6784_v59, %v6611_v33 }
 0x183   :  { %v4986_v44 = vpop.eup %4985  ;;  %v2763_v18 = vmul.f32 %v2567_v61, %v1979_v12  ;;  %v4238_v51 = vpack.c.bf16 %v2663_v22, %v2663_v22  ;;  %5001 = verf.f32 %v2077_v47  ;;  %v6822_v17 = vadd.f32 %v6784_v59, %v6665_v16  ;;  %v6856_v39 = vpop.f32.mrf.mxu1 }
 0x184   :  { %v4988_v9 = vpop.eup %4987  ;;  %v2465_v24 = vadd.f32 1.0, %v4986_v44  ;;  %3741 = vst.msk [vmem:[%s7804_s3 + $0x250] sm:$0xf] %vm3592_vm1, %v4335_v31  ;;  %v1882_v4 = vmul.f32 0.5, %v6705_v21  ;;  %5003 = verf.f32 %v2177_v35  ;;  %v1982_v60 = vmul.f32 0.5, %v6731_v41  ;;  %v6888_v61 = vpop.f32.mrf.mxu0 }
 0x185   :  { %v4990_v57 = vpop.eup %4989  ;;  %v4338_v33 = vpack.c.bf16 %v2763_v18, %v2763_v18  ;;  %v2565_v52 = vadd.f32 1.0, %v4988_v9  ;;  %3644 = vst.msk [vmem:[%s7804_s3 + $0xcc] sm:$0xf] %vm3592_vm1, %v4238_v51  ;;  %v2082_v49 = vmul.f32 0.70710677, %v6818_v43  ;;  %v6846_v62 = vadd.f32 %v6784_v59, %v6639_v25 }
 0x186   :  { %v2661_v16 = vmul.f32 %v2465_v24, %v1877_v58  ;;  %v2470_v23 = vadd.f32 1.0, %v4990_v57  ;;  %v2182_v21 = vmul.f32 0.70710677, %v6822_v17  ;;  %v6850_v38 = vadd.f32 %v6784_v59, %v6687_v11 }
 0x187   :  { %3744 = vst.msk [vmem:[%s7804_s3 + $0x25c] sm:$0xf] %vm3592_vm1, %v4338_v33  ;;  %v2761_v48 = vmul.f32 %v2565_v52, %v1977_v46  ;;  %5005 = verf.f32 %v2082_v49  ;;  %v6854_v63 = vadd.f32 %v6784_v59, %v6667_v54  ;;  %v1880_v25 = vmul.f32 0.5, %v6743_v0  ;;  %v6906_v33 = vpop.f32.mrf.mxu0 }
 0x188   :  { %v4236_v10 = vpack.c.bf16 %v2661_v16, %v2661_v16  ;;  %v2666_v41 = vmul.f32 %v2470_v23, %v1882_v4  ;;  %v4992_v56 = vpop.eup %4991  ;;  %5007 = verf.f32 %v2182_v21  ;;  %v2080_v1 = vmul.f32 0.70710677, %v6846_v62 }
 0x189   :  { %v4336_v50 = vpack.c.bf16 %v2761_v48, %v2761_v48  ;;  %v4994_v11 = vpop.eup %4993  ;;  %v2570_v54 = vadd.f32 1.0, %v4992_v56  ;;  %v1980_v34 = vmul.f32 0.5, %v6747_v13  ;;  %v2180_v2 = vmul.f32 0.70710677, %v6850_v38 }
 0x18a   :  { %3642 = vst.msk [vmem:[%s7804_s3 + $0xc4] sm:$0xf] %vm3592_vm1, %v4236_v10  ;;  %v4241_v19 = vpack.c.bf16 %v2666_v41, %v2666_v41  ;;  %v2468_v0 = vadd.f32 1.0, %v4994_v11  ;;  %v1883_v6 = vmul.f32 0.5, %v6757_v15  ;;  %5009 = verf.f32 %v2080_v1  ;;  %v6886_v15 = vpop.f32.mrf.mxu1  ;;  %v6938_v1 = vpop.f32.mrf.mxu0 }
 0x18b   :  { %3742 = vst.msk [vmem:[%s7804_s3 + $0x254] sm:$0xf] %vm3592_vm1, %v4336_v50  ;;  %v2083_v53 = vmul.f32 0.70710677, %v6854_v63  ;;  %v2766_v13 = vmul.f32 %v2570_v54, %v1982_v60  ;;  %5011 = verf.f32 %v2180_v2  ;;  %v6880_v12 = vadd.f32 %v6784_v59, %v6714_v14 }
 0x18c   :  { %v4996_v8 = vpop.eup %4995  ;;  %3647 = vst.msk [vmem:[%s7804_s3 + $0xd8] sm:$0xf] %vm3592_vm1, %v4241_v19  ;;  %v6884_v5 = vadd.f32 %v6784_v59, %v6689_v40  ;;  %v2664_v7 = vmul.f32 %v2468_v0, %v1880_v25  ;;  %v6892_v46 = vadd.f32 %v6784_v59, %v6733_v45  ;;  %v1983_v14 = vmul.f32 0.5, %v6788_v36  ;;  %v6904_v57 = vpop.f32.mrf.mxu1 }
 0x18d   :  { %v4998_v58 = vpop.eup %4997  ;;  %v2568_v22 = vadd.f32 1.0, %v4996_v8  ;;  %5013 = verf.f32 %v2083_v53  ;;  %v4341_v47 = vpack.c.bf16 %v2766_v13, %v2766_v13  ;;  %v2183_v44 = vmul.f32 0.70710677, %v6880_v12 }
 0x18e   :  { %v2471_v35 = vadd.f32 1.0, %v4998_v58  ;;  %v4239_v40 = vpack.c.bf16 %v2664_v7, %v2664_v7  ;;  %v1881_v18 = vmul.f32 0.5, %v6792_v37  ;;  %v2081_v9 = vmul.f32 0.70710677, %v6884_v5  ;;  %v6936_v25 = vpop.f32.mrf.mxu1 }
 0x18f   :  { %v2764_v31 = vmul.f32 %v2568_v22, %v1980_v34  ;;  %v5000_v51 = vpop.eup %4999  ;;  %3747 = vst.msk [vmem:[%s7804_s3 + $0x268] sm:$0xf] %vm3592_vm1, %v4341_v47  ;;  %v1981_v24 = vmul.f32 0.5, %v6796_v29  ;;  %5015 = verf.f32 %v2183_v44  ;;  %v2181_v36 = vmul.f32 0.70710677, %v6892_v46  ;;  %v6966_v22 = vpop.f32.mrf.mxu0 }
 0x190   :  { %v2667_v45 = vmul.f32 %v2471_v35, %v1883_v6  ;;  %v5002_v52 = vpop.eup %5001  ;;  %3645 = vst.msk [vmem:[%s7804_s3 + $0xd0] sm:$0xf] %vm3592_vm1, %v4239_v40  ;;  %v2571_v4 = vadd.f32 1.0, %v5000_v51  ;;  %5017 = verf.f32 %v2081_v9  ;;  %v6914_v16 = vadd.f32 %v6784_v59, %v6716_v3 }
 0x191   :  { %v4339_v37 = vpack.c.bf16 %v2764_v31, %v2764_v31  ;;  %v5004_v29 = vpop.eup %5003  ;;  %v2469_v60 = vadd.f32 1.0, %v5002_v52  ;;  %5019 = verf.f32 %v2181_v36  ;;  %v6918_v49 = vadd.f32 %v6784_v59, %v6766_v28 }
 0x192   :  { %v4242_v23 = vpack.c.bf16 %v2667_v45, %v2667_v45  ;;  %v2767_v48 = vmul.f32 %v2571_v4, %v1983_v14  ;;  %v2569_v21 = vadd.f32 1.0, %v5004_v29  ;;  %v1886_v10 = vmul.f32 0.5, %v6818_v43 }
 0x193   :  { %3745 = vst.msk [vmem:[%s7804_s3 + $0x260] sm:$0xf] %vm3592_vm1, %v4339_v37  ;;  %v2086_v3 = vmul.f32 0.70710677, %v6914_v16  ;;  %v2665_v41 = vmul.f32 %v2469_v60, %v1881_v18  ;;  %v1986_v28 = vmul.f32 0.5, %v6822_v17  ;;  %v6934_v50 = vadd.f32 %v6784_v59, %v6735_v27 }
 0x194   :  { %3648 = vst.msk [vmem:[%s7804_s3 + $0xdc] sm:$0xf] %vm3592_vm1, %v4242_v23  ;;  %v2186_v56 = vmul.f32 0.70710677, %v6918_v49  ;;  %v5006_v43 = vpop.eup %5005  ;;  %v4342_v11 = vpack.c.bf16 %v2767_v48, %v2767_v48  ;;  %v2765_v19 = vmul.f32 %v2569_v21, %v1981_v24  ;;  %v6942_v54 = vadd.f32 %v6784_v59, %v6799_v20 }
 0x195   :  { %5021 = verf.f32 %v2086_v3  ;;  %v5008_v34 = vpop.eup %5007  ;;  %v4240_v17 = vpack.c.bf16 %v2665_v41, %v2665_v41  ;;  %v2474_v2 = vadd.f32 1.0, %v5006_v43  ;;  %v1884_v0 = vmul.f32 0.5, %v6846_v62 }
 0x196   :  { %5023 = verf.f32 %v2186_v56  ;;  %3748 = vst.msk [vmem:[%s7804_s3 + $0x26c] sm:$0xf] %vm3592_vm1, %v4342_v11  ;;  %v4340_v27 = vpack.c.bf16 %v2765_v19, %v2765_v19  ;;  %v2574_v6 = vadd.f32 1.0, %v5008_v34  ;;  %v1984_v53 = vmul.f32 0.5, %v6850_v38  ;;  %v6964_v38 = vpop.f32.mrf.mxu1 }
 0x197   :  { %v2084_v8 = vmul.f32 0.70710677, %v6934_v50  ;;  %v5010_v13 = vpop.eup %5009  ;;  %3646 = vst.msk [vmem:[%s7804_s3 + $0xd4] sm:$0xf] %vm3592_vm1, %v4240_v17  ;;  %v2670_v20 = vmul.f32 %v2474_v2, %v1886_v10  ;;  %v2184_v62 = vmul.f32 0.70710677, %v6942_v54  ;;  %v6958_v58 = vadd.f32 %v6784_v59, %v6768_v32 }
 0x198   :  { %v6962_v7 = vadd.f32 %v6784_v59, %v6824_v55  ;;  %v5012_v47 = vpop.eup %5011  ;;  %3746 = vst.msk [vmem:[%s7804_s3 + $0x264] sm:$0xf] %vm3592_vm1, %v4340_v27  ;;  %v2770_v35 = vmul.f32 %v2574_v6, %v1986_v28  ;;  %v2472_v14 = vadd.f32 1.0, %v5010_v13  ;;  %v6974_v32 = vadd.f32 %v6784_v59, %v6801_v42  ;;  %v6985_v37 = vpop.f32.mrf.mxu1 }
 0x199   :  { %5025 = verf.f32 %v2084_v8  ;;  %v4245_v55 = vpack.c.bf16 %v2670_v20, %v2670_v20  ;;  %v2572_v40 = vadd.f32 1.0, %v5012_v47  ;;  %v1887_v31 = vmul.f32 0.5, %v6854_v63  ;;  %v6987_v63 = vpop.f32.mrf.mxu0 }
 0x19a   :  { %v5014_v44 = vpop.eup %5013  ;;  %5027 = verf.f32 %v2184_v62  ;;  %v4345_v18 = vpack.c.bf16 %v2770_v35, %v2770_v35  ;;  %v2668_v9 = vmul.f32 %v2472_v14, %v1884_v0  ;;  %v2087_v45 = vmul.f32 0.70710677, %v6958_v58  ;;  %v7012_v19 = vpop.f32.mrf.mxu1 }
 0x19b   :  { %v2475_v51 = vadd.f32 1.0, %v5014_v44  ;;  %3651 = vst.msk [vmem:[%s7804_s3 + $0xe8] sm:$0xf] %vm3592_vm1, %v4245_v55  ;;  %v2768_v24 = vmul.f32 %v2572_v40, %v1984_v53  ;;  %v1987_v42 = vmul.f32 0.5, %v6880_v12  ;;  %v1885_v36 = vmul.f32 0.5, %v6884_v5  ;;  %v7014_v34 = vpop.f32.mrf.mxu0 }
 0x19c   :  { %v2187_v52 = vmul.f32 0.70710677, %v6962_v7  ;;  %v5016_v4 = vpop.eup %5015  ;;  %3751 = vst.msk [vmem:[%s7804_s3 + $0x278] sm:$0xf] %vm3592_vm1, %v4345_v18  ;;  %v4243_v29 = vpack.c.bf16 %v2668_v9, %v2668_v9  ;;  %5029 = verf.f32 %v2087_v45  ;;  %v2085_v60 = vmul.f32 0.70710677, %v6974_v32  ;;  %v7037_v14 = vpop.f32.mrf.mxu1 }
 0x19d   :  { %v2671_v23 = vmul.f32 %v2475_v51, %v1887_v31  ;;  %v5018_v12 = vpop.eup %5017  ;;  %v4343_v48 = vpack.c.bf16 %v2768_v24, %v2768_v24  ;;  %v2575_v5 = vadd.f32 1.0, %v5016_v4  ;;  %v6996_v21 = vadd.f32 %v6784_v59, %v6856_v39 }
 0x19e   :  { %5031 = verf.f32 %v2187_v52  ;;  %v5020_v10 = vpop.eup %5019  ;;  %3649 = vst.msk [vmem:[%s7804_s3 + $0xe0] sm:$0xf] %vm3592_vm1, %v4243_v29  ;;  %v2473_v41 = vadd.f32 1.0, %v5018_v12  ;;  %v7004_v28 = vadd.f32 %v6784_v59, %v6826_v26  ;;  %v1985_v56 = vmul.f32 0.5, %v6892_v46  ;;  %v7069_v4 = vpop.f32.mrf.mxu1 }
 0x19f   :  { %v4246_v3 = vpack.c.bf16 %v2671_v23, %v2671_v23  ;;  %5033 = verf.f32 %v2085_v60  ;;  %3749 = vst.msk [vmem:[%s7804_s3 + $0x270] sm:$0xf] %vm3592_vm1, %v4343_v48  ;;  %v2771_v39 = vmul.f32 %v2575_v5, %v1987_v42  ;;  %v2573_v43 = vadd.f32 1.0, %v5020_v10 }
 0x1a0   :  { %v2185_v11 = vmul.f32 0.70710677, %v6996_v21  ;;  %v2669_v26 = vmul.f32 %v2473_v41, %v1885_v36  ;;  %v1890_v17 = vmul.f32 0.5, %v6914_v16  ;;  %v2090_v2 = vmul.f32 0.70710677, %v7004_v28 }
 0x1a1   :  { %3652 = vst.msk [vmem:[%s7804_s3 + $0xec] sm:$0xf] %vm3592_vm1, %v4246_v3  ;;  %v7024_v46 = vadd.f32 %v6784_v59, %v6886_v15  ;;  %v4346_v27 = vpack.c.bf16 %v2771_v39, %v2771_v39  ;;  %v2769_v6 = vmul.f32 %v2573_v43, %v1985_v56  ;;  %v7028_v53 = vadd.f32 %v6784_v59, %v6858_v30  ;;  %v7039_v30 = vpop.f32.mrf.mxu0 }
 0x1a2   :  { %v5022_v0 = vpop.eup %5021  ;;  %5035 = verf.f32 %v2185_v11  ;;  %v4244_v13 = vpack.c.bf16 %v2669_v26, %v2669_v26  ;;  %v1990_v62 = vmul.f32 0.5, %v6918_v49  ;;  %v1888_v47 = vmul.f32 0.5, %v6934_v50 }
 0x1a3   :  { %v5024_v8 = vpop.eup %5023  ;;  %v2478_v20 = vadd.f32 1.0, %v5022_v0  ;;  %5037 = verf.f32 %v2090_v2  ;;  %3752 = vst.msk [vmem:[%s7804_s3 + $0x27c] sm:$0xf] %vm3592_vm1, %v4346_v27  ;;  %v4344_v15 = vpack.c.bf16 %v2769_v6, %v2769_v6  ;;  %v2190_v35 = vmul.f32 0.70710677, %v7024_v46 }
 0x1a4   :  { %v2578_v16 = vadd.f32 1.0, %v5024_v8  ;;  %3650 = vst.msk [vmem:[%s7804_s3 + $0xe4] sm:$0xf] %vm3592_vm1, %v4244_v13  ;;  %v2088_v44 = vmul.f32 0.70710677, %v7028_v53  ;;  %v7048_v55 = vadd.f32 %v6784_v59, %v6904_v57  ;;  %v7052_v50 = vadd.f32 %v6784_v59, %v6888_v61 }
 0x1a5   :  { %v2674_v49 = vmul.f32 %v2478_v20, %v1890_v17  ;;  %3750 = vst.msk [vmem:[%s7804_s3 + $0x274] sm:$0xf] %vm3592_vm1, %v4344_v15  ;;  %5039 = verf.f32 %v2190_v35  ;;  %v7060_v18 = vadd.f32 %v6784_v59, %v6936_v25  ;;  %v7064_v57 = vadd.f32 %v6784_v59, %v6906_v33  ;;  %v7071_v25 = vpop.f32.mrf.mxu0 }
 0x1a6   :  { %v5026_v40 = vpop.eup %5025  ;;  %v2774_v31 = vmul.f32 %v2578_v16, %v1990_v62  ;;  %v1988_v45 = vmul.f32 0.5, %v6942_v54  ;;  %5041 = verf.f32 %v2088_v44  ;;  %v1891_v36 = vmul.f32 0.5, %v6958_v58 }
 0x1a7   :  { %v5028_v9 = vpop.eup %5027  ;;  %v4249_v51 = vpack.c.bf16 %v2674_v49, %v2674_v49  ;;  %v2476_v61 = vadd.f32 1.0, %v5026_v40  ;;  %v2188_v52 = vmul.f32 0.70710677, %v7048_v55  ;;  %v1991_v29 = vmul.f32 0.5, %v6962_v7  ;;  %v7096_v11 = vpop.f32.mrf.mxu0 }
 0x1a8   :  { %v4349_v24 = vpack.c.bf16 %v2774_v31, %v2774_v31  ;;  %v2576_v42 = vadd.f32 1.0, %v5028_v9  ;;  %v2091_v54 = vmul.f32 0.70710677, %v7052_v50  ;;  %v2191_v23 = vmul.f32 0.70710677, %v7060_v18 }
 0x1a9   :  { %3655 = vst.msk [vmem:[%s7804_s3 + $0xf8] sm:$0xf] %vm3592_vm1, %v4249_v51  ;;  %v2672_v33 = vmul.f32 %v2476_v61, %v1888_v47  ;;  %v5030_v60 = vpop.eup %5029  ;;  %v1889_v12 = vmul.f32 0.5, %v6974_v32  ;;  %5043 = verf.f32 %v2188_v52  ;;  %v2089_v48 = vmul.f32 0.70710677, %v7064_v57  ;;  %v7094_v32 = vpop.f32.mrf.mxu1 }
 0x1aa   :  { %3755 = vst.msk [vmem:[%s7804_s3 + $0x288] sm:$0xf] %vm3592_vm1, %v4349_v24  ;;  %v2772_v58 = vmul.f32 %v2576_v42, %v1988_v45  ;;  %v2479_v3 = vadd.f32 1.0, %v5030_v60  ;;  %5045 = verf.f32 %v2091_v54  ;;  %v7088_v7 = vadd.f32 %v6784_v59, %v6964_v38  ;;  %v7124_v35 = vpop.f32.mrf.mxu0 }
 0x1ab   :  { %v5032_v5 = vpop.eup %5031  ;;  %v4247_v10 = vpack.c.bf16 %v2672_v33, %v2672_v33  ;;  %5047 = verf.f32 %v2191_v23  ;;  %v7092_v43 = vadd.f32 %v6784_v59, %v6938_v1  ;;  %v1989_v17 = vmul.f32 0.5, %v6996_v21  ;;  %v7122_v47 = vpop.f32.mrf.mxu1 }
 0x1ac   :  { %v5034_v41 = vpop.eup %5033  ;;  %v4347_v39 = vpack.c.bf16 %v2772_v58, %v2772_v58  ;;  %v2579_v56 = vadd.f32 1.0, %v5032_v5  ;;  %v2675_v26 = vmul.f32 %v2479_v3, %v1891_v36  ;;  %5049 = verf.f32 %v2089_v48  ;;  %v7154_v33 = vpop.f32.mrf.mxu0 }
 0x1ad   :  { %3653 = vst.msk [vmem:[%s7804_s3 + $0xf0] sm:$0xf] %vm3592_vm1, %v4247_v10  ;;  %v2477_v38 = vadd.f32 1.0, %v5034_v41  ;;  %v1894_v2 = vmul.f32 0.5, %v7004_v28  ;;  %v2189_v0 = vmul.f32 0.70710677, %v7088_v7  ;;  %v7112_v20 = vadd.f32 %v6784_v59, %v6985_v37  ;;  %v7152_v52 = vpop.f32.mrf.mxu1 }
 0x1ae   :  { %3753 = vst.msk [vmem:[%s7804_s3 + $0x280] sm:$0xf] %vm3592_vm1, %v4347_v39  ;;  %v2775_v1 = vmul.f32 %v2579_v56, %v1991_v29  ;;  %v2094_v27 = vmul.f32 0.70710677, %v7092_v43  ;;  %v4250_v8 = vpack.c.bf16 %v2675_v26, %v2675_v26  ;;  %v7116_v21 = vadd.f32 %v6784_v59, %v6966_v22  ;;  %v7182_v39 = vpop.f32.mrf.mxu0 }
 0x1af   :  { %v5036_v6 = vpop.eup %5035  ;;  %v2673_v13 = vmul.f32 %v2477_v38, %v1889_v12  ;;  %5051 = verf.f32 %v2189_v0  ;;  %v7120_v28 = vadd.f32 %v6784_v59, %v7012_v19  ;;  %v1994_v49 = vmul.f32 0.5, %v7024_v46  ;;  %v7180_v41 = vpop.f32.mrf.mxu1 }
 0x1b0   :  { %v5038_v62 = vpop.eup %5037  ;;  %v4350_v15 = vpack.c.bf16 %v2775_v1, %v2775_v1  ;;  %v2577_v16 = vadd.f32 1.0, %v5036_v6  ;;  %3656 = vst.msk [vmem:[%s7804_s3 + $0xfc] sm:$0xf] %vm3592_vm1, %v4250_v8  ;;  %5053 = verf.f32 %v2094_v27  ;;  %v1892_v44 = vmul.f32 0.5, %v7028_v53 }
 0x1b1   :  { %v4248_v37 = vpack.c.bf16 %v2673_v13, %v2673_v13  ;;  %v2482_v22 = vadd.f32 1.0, %v5038_v62  ;;  %v2194_v40 = vmul.f32 0.70710677, %v7112_v20  ;;  %v2092_v31 = vmul.f32 0.70710677, %v7116_v21 }
 0x1b2   :  { %3756 = vst.msk [vmem:[%s7804_s3 + $0x28c] sm:$0xf] %vm3592_vm1, %v4350_v15  ;;  %v2773_v19 = vmul.f32 %v2577_v16, %v1989_v17  ;;  %v5040_v9 = vpop.eup %5039  ;;  %v1992_v51 = vmul.f32 0.5, %v7048_v55  ;;  %v2192_v61 = vmul.f32 0.70710677, %v7120_v28  ;;  %v7146_v45 = vadd.f32 %v6784_v59, %v6987_v63  ;;  %v7198_v15 = vpop.f32.mrf.mxu1 }
 0x1b3   :  { %3654 = vst.msk [vmem:[%s7804_s3 + $0xf4] sm:$0xf] %vm3592_vm1, %v4248_v37  ;;  %v2678_v46 = vmul.f32 %v2482_v22, %v1894_v2  ;;  %v5042_v53 = vpop.eup %5041  ;;  %v2582_v42 = vadd.f32 1.0, %v5040_v9  ;;  %5055 = verf.f32 %v2194_v40  ;;  %v7150_v36 = vadd.f32 %v6784_v59, %v7037_v14 }
 0x1b4   :  { %v4348_v24 = vpack.c.bf16 %v2773_v19, %v2773_v19  ;;  %v2480_v55 = vadd.f32 1.0, %v5042_v53  ;;  %v1895_v54 = vmul.f32 0.5, %v7052_v50  ;;  %5057 = verf.f32 %v2092_v31 }
 0x1b5   :  { %v4253_v29 = vpack.c.bf16 %v2678_v46, %v2678_v46  ;;  %v2778_v63 = vmul.f32 %v2582_v42, %v1994_v49  ;;  %v1995_v23 = vmul.f32 0.5, %v7060_v18  ;;  %5059 = verf.f32 %v2192_v61 }
 0x1b6   :  { %3754 = vst.msk [vmem:[%s7804_s3 + $0x284] sm:$0xf] %vm3592_vm1, %v4348_v24  ;;  %v2095_v14 = vmul.f32 0.70710677, %v7146_v45  ;;  %v5044_v60 = vpop.eup %5043  ;;  %v2676_v58 = vmul.f32 %v2480_v55, %v1892_v44  ;;  %v2195_v50 = vmul.f32 0.70710677, %v7150_v36  ;;  %v7170_v12 = vadd.f32 %v6784_v59, %v7014_v34  ;;  %v7230_v24 = vpop.f32.mrf.mxu1 }
 0x1b7   :  { %3659 = vst.msk [vmem:[%s7804_s3 + $0x108] sm:$0xf] %vm3592_vm1, %v4253_v29  ;;  %v7174_v48 = vadd.f32 %v6784_v59, %v7069_v4  ;;  %v5046_v18 = vpop.eup %5045  ;;  %v4353_v5 = vpack.c.bf16 %v2778_v63, %v2778_v63  ;;  %v2580_v10 = vadd.f32 1.0, %v5044_v60  ;;  %v7178_v3 = vadd.f32 %v6784_v59, %v7039_v30 }
 0x1b8   :  { %5061 = verf.f32 %v2095_v14  ;;  %v5048_v56 = vpop.eup %5047  ;;  %v4251_v26 = vpack.c.bf16 %v2676_v58, %v2676_v58  ;;  %v2483_v34 = vadd.f32 1.0, %v5046_v18  ;;  %v1893_v38 = vmul.f32 0.5, %v7064_v57 }
 0x1b9   :  { %5063 = verf.f32 %v2195_v50  ;;  %v5050_v4 = vpop.eup %5049  ;;  %3759 = vst.msk [vmem:[%s7804_s3 + $0x298] sm:$0xf] %vm3592_vm1, %v4353_v5  ;;  %v2776_v17 = vmul.f32 %v2580_v10, %v1992_v51  ;;  %v2583_v1 = vadd.f32 1.0, %v5048_v56  ;;  %v1993_v30 = vmul.f32 0.5, %v7088_v7  ;;  %v7200_v7 = vpop.f32.mrf.mxu0 }
 0x1ba   :  { %v2093_v2 = vmul.f32 0.70710677, %v7170_v12  ;;  %3657 = vst.msk [vmem:[%s7804_s3 + $0x100] sm:$0xf] %vm3592_vm1, %v4251_v26  ;;  %v2679_v0 = vmul.f32 %v2483_v34, %v1895_v54  ;;  %v2481_v57 = vadd.f32 1.0, %v5050_v4  ;;  %v1898_v27 = vmul.f32 0.5, %v7092_v43 }
 0x1bb   :  { %v2193_v6 = vmul.f32 0.70710677, %v7174_v48  ;;  %v4351_v8 = vpack.c.bf16 %v2776_v17, %v2776_v17  ;;  %v2779_v13 = vmul.f32 %v2583_v1, %v1995_v23  ;;  %v2098_v62 = vmul.f32 0.70710677, %v7178_v3  ;;  %v7232_v42 = vpop.f32.mrf.mxu0 }
 0x1bc   :  { %5065 = verf.f32 %v2093_v2  ;;  %v5052_v16 = vpop.eup %5051  ;;  %v4254_v37 = vpack.c.bf16 %v2679_v0, %v2679_v0  ;;  %v2677_v22 = vmul.f32 %v2481_v57, %v1893_v38  ;;  %v7204_v49 = vadd.f32 %v6784_v59, %v7094_v32 }
 0x1bd   :  { %5067 = verf.f32 %v2193_v6  ;;  %v5054_v43 = vpop.eup %5053  ;;  %3757 = vst.msk [vmem:[%s7804_s3 + $0x290] sm:$0xf] %vm3592_vm1, %v4351_v8  ;;  %v4354_v19 = vpack.c.bf16 %v2779_v13, %v2779_v13  ;;  %v2581_v44 = vadd.f32 1.0, %v5052_v16  ;;  %v7212_v40 = vadd.f32 %v6784_v59, %v7071_v25  ;;  %v7257_v56 = vpop.f32.mrf.mxu0 }
 0x1be   :  { %5069 = verf.f32 %v2098_v62  ;;  %3660 = vst.msk [vmem:[%s7804_s3 + $0x10c] sm:$0xf] %vm3592_vm1, %v4254_v37  ;;  %v4252_v32 = vpack.c.bf16 %v2677_v22, %v2677_v22  ;;  %v2486_v31 = vadd.f32 1.0, %v5054_v43  ;;  %v1998_v9 = vmul.f32 0.5, %v7112_v20 }
 0x1bf   :  { %v2198_v46 = vmul.f32 0.70710677, %v7204_v49  ;;  %3760 = vst.msk [vmem:[%s7804_s3 + $0x29c] sm:$0xf] %vm3592_vm1, %v4354_v19  ;;  %v2777_v51 = vmul.f32 %v2581_v44, %v1993_v30  ;;  %v1896_v25 = vmul.f32 0.5, %v7116_v21  ;;  %v7228_v53 = vadd.f32 %v6784_v59, %v7122_v47  ;;  %v7280_v13 = vpop.f32.mrf.mxu0 }
 0x1c0   :  { %v2096_v61 = vmul.f32 0.70710677, %v7212_v40  ;;  %v5056_v20 = vpop.eup %5055  ;;  %3658 = vst.msk [vmem:[%s7804_s3 + $0x104] sm:$0xf] %vm3592_vm1, %v4252_v32  ;;  %v2682_v29 = vmul.f32 %v2486_v31, %v1898_v27  ;;  %v7240_v21 = vadd.f32 %v6784_v59, %v7096_v11  ;;  %v7244_v47 = vadd.f32 %v6784_v59, %v7152_v52 }
 0x1c1   :  { %5071 = verf.f32 %v2198_v46  ;;  %v5058_v55 = vpop.eup %5057  ;;  %v4352_v54 = vpack.c.bf16 %v2777_v51, %v2777_v51  ;;  %v2586_v63 = vadd.f32 1.0, %v5056_v20  ;;  %v1996_v23 = vmul.f32 0.5, %v7120_v28  ;;  %v7255_v28 = vpop.f32.mrf.mxu1 }
 0x1c2   :  { %5073 = verf.f32 %v2096_v61  ;;  %v5060_v14 = vpop.eup %5059  ;;  %v4257_v60 = vpack.c.bf16 %v2682_v29, %v2682_v29  ;;  %v2484_v58 = vadd.f32 1.0, %v5058_v55  ;;  %v1899_v50 = vmul.f32 0.5, %v7146_v45  ;;  %v7311_v61 = vpop.f32.mrf.mxu0 }
 0x1c3   :  { %v2196_v18 = vmul.f32 0.70710677, %v7228_v53  ;;  %3758 = vst.msk [vmem:[%s7804_s3 + $0x294] sm:$0xf] %vm3592_vm1, %v4352_v54  ;;  %v2782_v11 = vmul.f32 %v2586_v63, %v1998_v9  ;;  %v2584_v52 = vadd.f32 1.0, %v5060_v14  ;;  %v1999_v5 = vmul.f32 0.5, %v7150_v36  ;;  %v7278_v8 = vpop.f32.mrf.mxu1 }
 0x1c4   :  { %v2099_v10 = vmul.f32 0.70710677, %v7240_v21  ;;  %3663 = vst.msk [vmem:[%s7804_s3 + $0x118] sm:$0xf] %vm3592_vm1, %v4257_v60  ;;  %v2680_v45 = vmul.f32 %v2484_v58, %v1896_v25  ;;  %v2199_v34 = vmul.f32 0.70710677, %v7244_v47  ;;  %v7266_v38 = vadd.f32 %v6784_v59, %v7124_v35 }
 0x1c5   :  { %v5062_v26 = vpop.eup %5061  ;;  %5075 = verf.f32 %v2196_v18  ;;  %v4357_v4 = vpack.c.bf16 %v2782_v11, %v2782_v11  ;;  %v2780_v17 = vmul.f32 %v2584_v52, %v1996_v23  ;;  %v1897_v0 = vmul.f32 0.5, %v7170_v12  ;;  %v7332_v52 = vpop.f32.mrf.mxu0 }
 0x1c6   :  { %v5064_v36 = vpop.eup %5063  ;;  %v2487_v1 = vadd.f32 1.0, %v5062_v26  ;;  %5077 = verf.f32 %v2099_v10  ;;  %v4255_v30 = vpack.c.bf16 %v2680_v45, %v2680_v45  ;;  %v2097_v35 = vmul.f32 0.70710677, %v7266_v38 }
 0x1c7   :  { %v2587_v2 = vadd.f32 1.0, %v5064_v36  ;;  %5079 = verf.f32 %v2199_v34  ;;  %3763 = vst.msk [vmem:[%s7804_s3 + $0x2a8] sm:$0xf] %vm3592_vm1, %v4357_v4  ;;  %v4355_v57 = vpack.c.bf16 %v2780_v17, %v2780_v17  ;;  %v7276_v6 = vadd.f32 %v6784_v59, %v7180_v41 }
 0x1c8   :  { %v2683_v27 = vmul.f32 %v2487_v1, %v1899_v50  ;;  %3661 = vst.msk [vmem:[%s7804_s3 + $0x110] sm:$0xf] %vm3592_vm1, %v4255_v30  ;;  %v1997_v16 = vmul.f32 0.5, %v7174_v48  ;;  %v7289_v37 = vadd.f32 %v6784_v59, %v7154_v33  ;;  %v7293_v41 = vadd.f32 %v6784_v59, %v7198_v15 }
 0x1c9   :  { %v5066_v62 = vpop.eup %5065  ;;  %v2783_v12 = vmul.f32 %v2587_v2, %v1999_v5  ;;  %3761 = vst.msk [vmem:[%s7804_s3 + $0x2a0] sm:$0xf] %vm3592_vm1, %v4355_v57  ;;  %5081 = verf.f32 %v2097_v35  ;;  %v7301_v48 = vadd.f32 %v6784_v59, %v7182_v39  ;;  %v1902_v31 = vmul.f32 0.5, %v7178_v3  ;;  %v4666_v39 = vpop.f32.mrf.mxu1 }
 0x1ca   :  { %v5068_v22 = vpop.eup %5067  ;;  %v4258_v43 = vpack.c.bf16 %v2683_v27, %v2683_v27  ;;  %v2485_v19 = vadd.f32 1.0, %v5066_v62  ;;  %v2197_v15 = vmul.f32 0.70710677, %v7276_v6  ;;  %v2002_v51 = vmul.f32 0.5, %v7204_v49 }
 0x1cb   :  { %v5070_v44 = vpop.eup %5069  ;;  %v4358_v33 = vpack.c.bf16 %v2783_v12, %v2783_v12  ;;  %v2585_v32 = vadd.f32 1.0, %v5068_v22  ;;  %v2102_v25 = vmul.f32 0.70710677, %v7289_v37  ;;  %v1900_v20 = vmul.f32 0.5, %v7212_v40  ;;  %v1765_v11 = vpop.f32.mrf.mxu1 }
 0x1cc   :  { %3664 = vst.msk [vmem:[%s7804_s3 + $0x11c] sm:$0xf] %vm3592_vm1, %v4258_v43  ;;  %v2681_v9 = vmul.f32 %v2485_v19, %v1897_v0  ;;  %v2490_v46 = vadd.f32 1.0, %v5070_v44  ;;  %5083 = verf.f32 %v2197_v15  ;;  %v2202_v29 = vmul.f32 0.70710677, %v7293_v41 }
 0x1cd   :  { %3764 = vst.msk [vmem:[%s7804_s3 + $0x2ac] sm:$0xf] %vm3592_vm1, %v4358_v33  ;;  %v2781_v3 = vmul.f32 %v2585_v32, %v1997_v16  ;;  %5085 = verf.f32 %v2102_v25  ;;  %v2100_v49 = vmul.f32 0.70710677, %v7301_v48  ;;  %v7322_v58 = vadd.f32 %v6784_v59, %v7230_v24  ;;  %v7355_v27 = vpop.f32.mrf.mxu1 }
 0x1ce   :  { %v5072_v55 = vpop.eup %5071  ;;  %v4256_v54 = vpack.c.bf16 %v2681_v9, %v2681_v9  ;;  %v2686_v63 = vmul.f32 %v2490_v46, %v1902_v31  ;;  %5087 = verf.f32 %v2202_v29  ;;  %v7330_v18 = vadd.f32 %v6784_v59, %v7200_v7 }
 0x1cf   :  { %v5074_v23 = vpop.eup %5073  ;;  %v4356_v14 = vpack.c.bf16 %v2781_v3, %v2781_v3  ;;  %v2590_v60 = vadd.f32 1.0, %v5072_v55  ;;  %5089 = verf.f32 %v2100_v49  ;;  %v2200_v5 = vmul.f32 0.70710677, %v7322_v58  ;;  %v7382_v9 = vpop.f32.mrf.mxu1  ;;  %v7401_v3 = vld [vmem:[%s7803_s2] ss:$0 sm:$0xff] }
 0x1d0   :  { %3662 = vst.msk [vmem:[%s7804_s3 + $0x114] sm:$0xf] %vm3592_vm1, %v4256_v54  ;;  %v4261_v40 = vpack.c.bf16 %v2686_v63, %v2686_v63  ;;  %v2488_v50 = vadd.f32 1.0, %v5074_v23  ;;  %v7341_v10 = vadd.f32 %v6784_v59, %v7255_v28  ;;  %v2000_v45 = vmul.f32 0.5, %v7228_v53  ;;  %v7357_v53 = vpop.f32.mrf.mxu0 }
 0x1d1   :  { %3762 = vst.msk [vmem:[%s7804_s3 + $0x2a4] sm:$0xf] %vm3592_vm1, %v4356_v14  ;;  %v2786_v24 = vmul.f32 %v2590_v60, %v2002_v51  ;;  %v2103_v34 = vmul.f32 0.70710677, %v7330_v18  ;;  %v7351_v36 = vadd.f32 %v6784_v59, %v7232_v42  ;;  %v1903_v28 = vmul.f32 0.5, %v7240_v21  ;;  %v4670_v23 = vpop.f32.mrf.mxu1 }
 0x1d2   :  { %v5076_v26 = vpop.eup %5075  ;;  %3667 = vst.msk [vmem:[%s7804_s3 + $0x128] sm:$0xf] %vm3592_vm1, %v4261_v40  ;;  %v2684_v7 = vmul.f32 %v2488_v50, %v1900_v20  ;;  %5091 = verf.f32 %v2200_v5  ;;  %v2203_v57 = vmul.f32 0.70710677, %v7341_v10  ;;  %v2003_v35 = vmul.f32 0.5, %v7244_v47 }
 0x1d3   :  { %v5078_v4 = vpop.eup %5077  ;;  %v4361_v17 = vpack.c.bf16 %v2786_v24, %v2786_v24  ;;  %v2588_v1 = vadd.f32 1.0, %v5076_v26  ;;  %5093 = verf.f32 %v2103_v34  ;;  %v2101_v62 = vmul.f32 0.70710677, %v7351_v36 }
 0x1d4   :  { %v5080_v30 = vpop.eup %5079  ;;  %v4259_v2 = vpack.c.bf16 %v2684_v7, %v2684_v7  ;;  %v2491_v0 = vadd.f32 1.0, %v5078_v4  ;;  %5095 = verf.f32 %v2203_v57  ;;  %v7371_v16 = vadd.f32 %v6784_v59, %v7278_v8  ;;  %v7384_v8 = vpop.f32.mrf.mxu0 }
 0x1d5   :  { %3767 = vst.msk [vmem:[%s7804_s3 + $0x2b8] sm:$0xf] %vm3592_vm1, %v4361_v17  ;;  %v2784_v42 = vmul.f32 %v2588_v1, %v2000_v45  ;;  %v2591_v21 = vadd.f32 1.0, %v5080_v30  ;;  %v7375_v22 = vadd.f32 %v6784_v59, %v7257_v56  ;;  %5097 = verf.f32 %v2101_v62 }
 0x1d6   :  { %3665 = vst.msk [vmem:[%s7804_s3 + $0x120] sm:$0xf] %vm3592_vm1, %v4259_v2  ;;  %v2687_v12 = vmul.f32 %v2491_v0, %v1903_v28  ;;  %v5082_v43 = vpop.eup %5081  ;;  %v7378_v44 = vadd.f32 %v6784_v59, %v4666_v39  ;;  %v1901_v32 = vmul.f32 0.5, %v7266_v38  ;;  %v2201_v15 = vmul.f32 0.70710677, %v7371_v16  ;;  %v7419_v14 = vpop.f32.mrf.mxu0 }
 0x1d7   :  { %v4359_v47 = vpack.c.bf16 %v2784_v42, %v2784_v42  ;;  %v2787_v19 = vmul.f32 %v2591_v21, %v2003_v35  ;;  %v2489_v31 = vadd.f32 1.0, %v5082_v43  ;;  %v2001_v46 = vmul.f32 0.5, %v7276_v6  ;;  %v1781_v28 = vpop.f32.mrf.mxu1 }
 0x1d8   :  { %v4262_v33 = vpack.c.bf16 %v2687_v12, %v2687_v12  ;;  %v1906_v59 = vmul.f32 0.5, %v7289_v37  ;;  %v2106_v51 = vmul.f32 0.70710677, %v7375_v22  ;;  %5099 = verf.f32 %v2201_v15  ;;  %v7434_v30 = vpop.f32.mrf.mxu0 }
 0x1d9   :  { %3765 = vst.msk [vmem:[%s7804_s3 + $0x2b0] sm:$0xf] %vm3592_vm1, %v4359_v47  ;;  %v4362_v56 = vpack.c.bf16 %v2787_v19, %v2787_v19  ;;  %v5084_v38 = vpop.eup %5083  ;;  %v2685_v25 = vmul.f32 %v2489_v31, %v1901_v32  ;;  %v2206_v39 = vmul.f32 0.70710677, %v7378_v44  ;;  %v7405_v6 = vadd.f32 %v7401_v3, %v7280_v13 }
 0x1da   :  { %3668 = vst.msk [vmem:[%s7804_s3 + $0x12c] sm:$0xf] %vm3592_vm1, %v4262_v33  ;;  %v5086_v37 = vpop.eup %5085  ;;  %v2589_v20 = vadd.f32 1.0, %v5084_v38  ;;  %5101 = verf.f32 %v2106_v51  ;;  %v7412_v29 = vadd.f32 %v7401_v3, %v1765_v11  ;;  %v7416_v55 = vadd.f32 %v7401_v3, %v7311_v61  ;;  %v7468_v31 = vpop.f32.mrf.mxu0 }
 0x1db   :  { %3768 = vst.msk [vmem:[%s7804_s3 + $0x2bc] sm:$0xf] %vm3592_vm1, %v4362_v56  ;;  %v5088_v54 = vpop.eup %5087  ;;  %v4260_v63 = vpack.c.bf16 %v2685_v25, %v2685_v25  ;;  %v2494_v49 = vadd.f32 1.0, %v5086_v37  ;;  %v2006_v13 = vmul.f32 0.5, %v7293_v41  ;;  %5103 = verf.f32 %v2206_v39 }
 0x1dc   :  { %v5090_v60 = vpop.eup %5089  ;;  %v2785_v40 = vmul.f32 %v2589_v20, %v2001_v46  ;;  %v2594_v50 = vadd.f32 1.0, %v5088_v54  ;;  %v1904_v24 = vmul.f32 0.5, %v7301_v48  ;;  %v2104_v11 = vmul.f32 0.70710677, %v7405_v6 }
 0x1dd   :  { %3666 = vst.msk [vmem:[%s7804_s3 + $0x124] sm:$0xf] %vm3592_vm1, %v4260_v63  ;;  %v2690_v61 = vmul.f32 %v2494_v49, %v1906_v59  ;;  %v2492_v5 = vadd.f32 1.0, %v5090_v60  ;;  %v2004_v41 = vmul.f32 0.5, %v7322_v58  ;;  %v2204_v26 = vmul.f32 0.70710677, %v7412_v29 }
 0x1de   :  { %v4360_v7 = vpack.c.bf16 %v2785_v40, %v2785_v40  ;;  %v2790_v45 = vmul.f32 %v2594_v50, %v2006_v13  ;;  %5105 = verf.f32 %v2104_v11  ;;  %v2107_v34 = vmul.f32 0.70710677, %v7416_v55  ;;  %v7492_v13 = vpop.f32.mrf.mxu0 }
 0x1df   :  { %v5092_v4 = vpop.eup %5091  ;;  %v4265_v48 = vpack.c.bf16 %v2690_v61, %v2690_v61  ;;  %v2688_v17 = vmul.f32 %v2492_v5, %v1904_v24  ;;  %5107 = verf.f32 %v2204_v26  ;;  %v7432_v1 = vadd.f32 %v7401_v3, %v7355_v27 }
 0x1e0   :  { %v5094_v2 = vpop.eup %5093  ;;  %3766 = vst.msk [vmem:[%s7804_s3 + $0x2b4] sm:$0xf] %vm3592_vm1, %v4360_v7  ;;  %v4365_v58 = vpack.c.bf16 %v2790_v45, %v2790_v45  ;;  %v2592_v0 = vadd.f32 1.0, %v5092_v4  ;;  %5109 = verf.f32 %v2107_v34  ;;  %v7442_v57 = vadd.f32 %v7401_v3, %v7332_v52 }
 0x1e1   :  { %3671 = vst.msk [vmem:[%s7804_s3 + $0x138] sm:$0xf] %vm3592_vm1, %v4265_v48  ;;  %v4263_v27 = vpack.c.bf16 %v2688_v17, %v2688_v17  ;;  %v1907_v42 = vmul.f32 0.5, %v7330_v18  ;;  %v2495_v35 = vadd.f32 1.0, %v5094_v2  ;;  %v2207_v21 = vmul.f32 0.70710677, %v7432_v1  ;;  %v5096_v62 = vpop.eup %5095  ;;  %v7512_v48 = vpop.f32.mrf.mxu0 }
 0x1e2   :  { %3771 = vst.msk [vmem:[%s7804_s3 + $0x2c8] sm:$0xf] %vm3592_vm1, %v4365_v58  ;;  %v2788_v12 = vmul.f32 %v2592_v0, %v2004_v41  ;;  %v2007_v52 = vmul.f32 0.5, %v7341_v10  ;;  %v2105_v43 = vmul.f32 0.70710677, %v7442_v57  ;;  %v7458_v47 = vadd.f32 %v7401_v3, %v7382_v9  ;;  %v5098_v19 = vpop.eup %5097  ;;  %v4671_v10 = vpop.f32.mrf.mxu1 }
 0x1e3   :  { %3669 = vst.msk [vmem:[%s7804_s3 + $0x130] sm:$0xf] %vm3592_vm1, %v4263_v27  ;;  %v2691_v18 = vmul.f32 %v2495_v35, %v1907_v42  ;;  %v2595_v33 = vadd.f32 1.0, %v5096_v62  ;;  %5111 = verf.f32 %v2207_v21  ;;  %v7466_v32 = vadd.f32 %v7401_v3, %v7357_v53 }
 0x1e4   :  { %v4363_v15 = vpack.c.bf16 %v2788_v12, %v2788_v12  ;;  %v1905_v9 = vmul.f32 0.5, %v7351_v36  ;;  %v2493_v56 = vadd.f32 1.0, %v5098_v19  ;;  %5113 = verf.f32 %v2105_v43  ;;  %v1784_v49 = vpop.f32.mrf.mxu1 }
 0x1e5   :  { %v4266_v46 = vpack.c.bf16 %v2691_v18, %v2691_v18  ;;  %v2791_v59 = vmul.f32 %v2595_v33, %v2007_v52  ;;  %v2005_v51 = vmul.f32 0.5, %v7371_v16  ;;  %v2205_v38 = vmul.f32 0.70710677, %v7458_v47  ;;  %v5100_v25 = vpop.eup %5099 }
 0x1e6   :  { %3769 = vst.msk [vmem:[%s7804_s3 + $0x2c0] sm:$0xf] %vm3592_vm1, %v4363_v15  ;;  %v2689_v53 = vmul.f32 %v2493_v56, %v1905_v9  ;;  %v2110_v39 = vmul.f32 0.70710677, %v7466_v32  ;;  %v7479_v37 = vadd.f32 %v7401_v3, %v4670_v23  ;;  %v7483_v36 = vadd.f32 %v7401_v3, %v7384_v8  ;;  %v4674_v4 = vpop.f32.mrf.mxu1 }
 0x1e7   :  { %v5102_v20 = vpop.eup %5101  ;;  %3672 = vst.msk [vmem:[%s7804_s3 + $0x13c] sm:$0xf] %vm3592_vm1, %v4266_v46  ;;  %v4366_v16 = vpack.c.bf16 %v2791_v59, %v2791_v59  ;;  %v2593_v54 = vadd.f32 1.0, %v5100_v25  ;;  %5115 = verf.f32 %v2205_v38  ;;  %v7490_v63 = vadd.f32 %v7401_v3, %v1781_v28 }
 0x1e8   :  { %v5104_v23 = vpop.eup %5103  ;;  %v4264_v60 = vpack.c.bf16 %v2689_v53, %v2689_v53  ;;  %v1910_v8 = vmul.f32 0.5, %v7375_v22  ;;  %v2498_v40 = vadd.f32 1.0, %v5102_v20  ;;  %5117 = verf.f32 %v2110_v39  ;;  %v1797_v19 = vpop.f32.mrf.mxu1 }
 0x1e9   :  { %3772 = vst.msk [vmem:[%s7804_s3 + $0x2cc] sm:$0xf] %vm3592_vm1, %v4366_v16  ;;  %v2789_v50 = vmul.f32 %v2593_v54, %v2005_v51  ;;  %v2010_v24 = vmul.f32 0.5, %v7378_v44  ;;  %v2598_v11 = vadd.f32 1.0, %v5104_v23  ;;  %v2210_v61 = vmul.f32 0.70710677, %v7479_v37 }
 0x1ea   :  { %3670 = vst.msk [vmem:[%s7804_s3 + $0x134] sm:$0xf] %vm3592_vm1, %v4264_v60  ;;  %v2694_v5 = vmul.f32 %v2498_v40, %v1910_v8  ;;  %v1908_v22 = vmul.f32 0.5, %v7405_v6  ;;  %v2108_v41 = vmul.f32 0.70710677, %v7483_v36  ;;  %v7510_v44 = vadd.f32 %v7401_v3, %v7419_v14  ;;  %v4675_v20 = vpop.f32.mrf.mxu1 }
 0x1eb   :  { %v2208_v26 = vmul.f32 0.70710677, %v7490_v63  ;;  %v5106_v7 = vpop.eup %5105  ;;  %v4364_v45 = vpack.c.bf16 %v2789_v50, %v2789_v50  ;;  %v2794_v34 = vmul.f32 %v2598_v11, %v2010_v24  ;;  %5119 = verf.f32 %v2210_v61 }
 0x1ec   :  { %v5108_v17 = vpop.eup %5107  ;;  %v4269_v28 = vpack.c.bf16 %v2694_v5, %v2694_v5  ;;  %v2496_v2 = vadd.f32 1.0, %v5106_v7  ;;  %5121 = verf.f32 %v2108_v41  ;;  %v7515_v6 = vadd.f32 %v7401_v3, %v4671_v10  ;;  %v1800_v41 = vpop.f32.mrf.mxu1 }
 0x1ed   :  { %v5110_v58 = vpop.eup %5109  ;;  %3770 = vst.msk [vmem:[%s7804_s3 + $0x2c4] sm:$0xf] %vm3592_vm1, %v4364_v45  ;;  %v4369_v0 = vpack.c.bf16 %v2794_v34, %v2794_v34  ;;  %v2008_v14 = vmul.f32 0.5, %v7412_v29  ;;  %v2596_v27 = vadd.f32 1.0, %v5108_v17  ;;  %5123 = verf.f32 %v2208_v26 }
 0x1ee   :  { %3675 = vst.msk [vmem:[%s7804_s3 + $0x148] sm:$0xf] %vm3592_vm1, %v4269_v28  ;;  %v2692_v42 = vmul.f32 %v2496_v2, %v1908_v22  ;;  %v1911_v35 = vmul.f32 0.5, %v7416_v55  ;;  %v2499_v21 = vadd.f32 1.0, %v5110_v58  ;;  %v2111_v62 = vmul.f32 0.70710677, %v7510_v44  ;;  %v7540_v55 = vpop.f32.mrf.mxu0 }
 0x1ef   :  { %3775 = vst.msk [vmem:[%s7804_s3 + $0x2d8] sm:$0xf] %vm3592_vm1, %v4369_v0  ;;  %v2792_v12 = vmul.f32 %v2596_v27, %v2008_v14  ;;  %v2211_v29 = vmul.f32 0.70710677, %v7515_v6  ;;  %v7535_v52 = vadd.f32 %v7401_v3, %v7434_v30  ;;  %v7538_v43 = vadd.f32 %v7401_v3, %v1784_v49 }
 0x1f0   :  { %v5112_v18 = vpop.eup %5111  ;;  %v4267_v33 = vpack.c.bf16 %v2692_v42, %v2692_v42  ;;  %v2695_v10 = vmul.f32 %v2499_v21, %v1911_v35  ;;  %5125 = verf.f32 %v2111_v62  ;;  %v7544_v15 = vadd.f32 %v7401_v3, %v7468_v31  ;;  %v7560_v16 = vpop.f32.mrf.mxu0 }
 0x1f1   :  { %v5114_v9 = vpop.eup %5113  ;;  %v4367_v56 = vpack.c.bf16 %v2792_v12, %v2792_v12  ;;  %v2011_v46 = vmul.f32 0.5, %v7432_v1  ;;  %v2599_v30 = vadd.f32 1.0, %v5112_v18  ;;  %5127 = verf.f32 %v2211_v29  ;;  %v4678_v35 = vpop.f32.mrf.mxu1 }
 0x1f2   :  { %3673 = vst.msk [vmem:[%s7804_s3 + $0x140] sm:$0xf] %vm3592_vm1, %v4267_v33  ;;  %v4270_v59 = vpack.c.bf16 %v2695_v10, %v2695_v10  ;;  %v1909_v51 = vmul.f32 0.5, %v7442_v57  ;;  %v2497_v38 = vadd.f32 1.0, %v5114_v9  ;;  %v2109_v25 = vmul.f32 0.70710677, %v7535_v52  ;;  %v1413_v26 = vpop.f32.mrf.mxu0 }
 0x1f3   :  { %3773 = vst.msk [vmem:[%s7804_s3 + $0x2d0] sm:$0xf] %vm3592_vm1, %v4367_v56  ;;  %v2795_v31 = vmul.f32 %v2599_v30, %v2011_v46  ;;  %v2009_v1 = vmul.f32 0.5, %v7458_v47  ;;  %v2209_v53 = vmul.f32 0.70710677, %v7538_v43  ;;  %v7567_v49 = vadd.f32 %v7401_v3, %v4674_v4 }
 0x1f4   :  { %v2114_v39 = vmul.f32 0.70710677, %v7544_v15  ;;  %v5116_v54 = vpop.eup %5115  ;;  %3676 = vst.msk [vmem:[%s7804_s3 + $0x14c] sm:$0xf] %vm3592_vm1, %v4270_v59  ;;  %v2693_v57 = vmul.f32 %v2497_v38, %v1909_v51  ;;  %5129 = verf.f32 %v2109_v25  ;;  %v7571_v47 = vadd.f32 %v7401_v3, %v7492_v13  ;;  %v7603_v21 = vpop.f32.mrf.mxu0 }
 0x1f5   :  { %v5118_v23 = vpop.eup %5117  ;;  %v4370_v60 = vpack.c.bf16 %v2795_v31, %v2795_v31  ;;  %v2597_v8 = vadd.f32 1.0, %v5116_v54  ;;  %5131 = verf.f32 %v2209_v53  ;;  %v7574_v40 = vadd.f32 %v7401_v3, %v1797_v19  ;;  %v1813_v38 = vpop.f32.mrf.mxu1 }
 0x1f6   :  { %v4268_v50 = vpack.c.bf16 %v2693_v57, %v2693_v57  ;;  %v1914_v24 = vmul.f32 0.5, %v7466_v32  ;;  %v2502_v11 = vadd.f32 1.0, %v5118_v23  ;;  %5133 = verf.f32 %v2114_v39  ;;  %v1416_v25 = vpop.f32.mrf.mxu0 }
 0x1f7   :  { %3776 = vst.msk [vmem:[%s7804_s3 + $0x2dc] sm:$0xf] %vm3592_vm1, %v4370_v60  ;;  %v2793_v61 = vmul.f32 %v2597_v8, %v2009_v1  ;;  %v2014_v13 = vmul.f32 0.5, %v7479_v37  ;;  %v2214_v5 = vmul.f32 0.70710677, %v7567_v49  ;;  %v1912_v45 = vmul.f32 0.5, %v7483_v36 }
 0x1f8   :  { %v2112_v22 = vmul.f32 0.70710677, %v7571_v47  ;;  %v5120_v7 = vpop.eup %5119  ;;  %3674 = vst.msk [vmem:[%s7804_s3 + $0x144] sm:$0xf] %vm3592_vm1, %v4268_v50  ;;  %v2698_v32 = vmul.f32 %v2502_v11, %v1914_v24  ;;  %v2212_v34 = vmul.f32 0.70710677, %v7574_v40  ;;  %v7592_v37 = vadd.f32 %v7401_v3, %v7512_v48 }
 0x1f9   :  { %v5122_v4 = vpop.eup %5121  ;;  %v4368_v17 = vpack.c.bf16 %v2793_v61, %v2793_v61  ;;  %v2602_v28 = vadd.f32 1.0, %v5120_v7  ;;  %5135 = verf.f32 %v2214_v5  ;;  %v7595_v2 = vadd.f32 %v7401_v3, %v4675_v20 }
 0x1fa   :  { %v5124_v58 = vpop.eup %5123  ;;  %v4273_v0 = vpack.c.bf16 %v2698_v32, %v2698_v32  ;;  %v2500_v14 = vadd.f32 1.0, %v5122_v4  ;;  %v2012_v27 = vmul.f32 0.5, %v7490_v63  ;;  %5137 = verf.f32 %v2112_v22  ;;  %v4679_v32 = vpop.f32.mrf.mxu1 }
 0x1fb   :  { %3774 = vst.msk [vmem:[%s7804_s3 + $0x2d4] sm:$0xf] %vm3592_vm1, %v4368_v17  ;;  %v2798_v36 = vmul.f32 %v2602_v28, %v2014_v13  ;;  %v2600_v48 = vadd.f32 1.0, %v5124_v58  ;;  %5139 = verf.f32 %v2212_v34  ;;  %v2115_v42 = vmul.f32 0.70710677, %v7592_v37  ;;  %v4582_v13 = vpop.f32.mrf.mxu0 }
 0x1fc   :  { %3679 = vst.msk [vmem:[%s7804_s3 + $0x158] sm:$0xf] %vm3592_vm1, %v4273_v0  ;;  %v2696_v63 = vmul.f32 %v2500_v14, %v1912_v45  ;;  %v1915_v62 = vmul.f32 0.5, %v7510_v44  ;;  %v2215_v12 = vmul.f32 0.70710677, %v7595_v2  ;;  %v7613_v29 = vadd.f32 %v7401_v3, %v7540_v55 }
 0x1fd   :  { %v5126_v19 = vpop.eup %5125  ;;  %v4373_v18 = vpack.c.bf16 %v2798_v36, %v2798_v36  ;;  %v2796_v33 = vmul.f32 %v2600_v48, %v2012_v27  ;;  %5141 = verf.f32 %v2115_v42  ;;  %v7616_v10 = vadd.f32 %v7401_v3, %v1800_v41  ;;  %v1429_v14 = vpop.f32.mrf.mxu0 }
 0x1fe   :  { %v5128_v9 = vpop.eup %5127  ;;  %v4271_v56 = vpack.c.bf16 %v2696_v63, %v2696_v63  ;;  %v2503_v46 = vadd.f32 1.0, %v5126_v19  ;;  %v2015_v30 = vmul.f32 0.5, %v7515_v6  ;;  %5143 = verf.f32 %v2215_v12 }
 0x1ff   :  { %3779 = vst.msk [vmem:[%s7804_s3 + $0x2e8] sm:$0xf] %vm3592_vm1, %v4373_v18  ;;  %v4371_v44 = vpack.c.bf16 %v2796_v33, %v2796_v33  ;;  %v2603_v55 = vadd.f32 1.0, %v5128_v9  ;;  %v1913_v59 = vmul.f32 0.5, %v7535_v52  ;;  %v2113_v51 = vmul.f32 0.70710677, %v7613_v29  ;;  %v1816_v9 = vpop.f32.mrf.mxu1 }
 0x200   :  { %3677 = vst.msk [vmem:[%s7804_s3 + $0x150] sm:$0xf] %vm3592_vm1, %v4271_v56  ;;  %v2699_v6 = vmul.f32 %v2503_v46, %v1915_v62  ;;  %v2213_v31 = vmul.f32 0.70710677, %v7616_v10  ;;  %v7632_v1 = vadd.f32 %v7401_v3, %v7560_v16  ;;  %v7635_v53 = vadd.f32 %v7401_v3, %v4678_v35 }
 0x201   :  { %v5130_v52 = vpop.eup %5129  ;;  %3777 = vst.msk [vmem:[%s7804_s3 + $0x2e0] sm:$0xf] %vm3592_vm1, %v4371_v44  ;;  %v2799_v39 = vmul.f32 %v2603_v55, %v2015_v30  ;;  %v2013_v20 = vmul.f32 0.5, %v7538_v43  ;;  %5145 = verf.f32 %v2113_v51  ;;  %v7643_v54 = vadd.f32 %v7401_v3, %v1413_v26  ;;  %v4583_v44 = vpop.f32.mrf.mxu0 }
 0x202   :  { %v5132_v57 = vpop.eup %5131  ;;  %v4274_v23 = vpack.c.bf16 %v2699_v6, %v2699_v6  ;;  %v2501_v16 = vadd.f32 1.0, %v5130_v52  ;;  %5147 = verf.f32 %v2213_v31  ;;  %v7646_v60 = vadd.f32 %v7401_v3, %v1813_v38 }
 0x203   :  { %v5134_v8 = vpop.eup %5133  ;;  %v4374_v50 = vpack.c.bf16 %v2799_v39, %v2799_v39  ;;  %v2601_v24 = vadd.f32 1.0, %v5132_v57  ;;  %v1918_v11 = vmul.f32 0.5, %v7544_v15  ;;  %v2118_v61 = vmul.f32 0.70710677, %v7632_v1 }
 0x204   :  { %3680 = vst.msk [vmem:[%s7804_s3 + $0x15c] sm:$0xf] %vm3592_vm1, %v4274_v23  ;;  %v2697_v43 = vmul.f32 %v2501_v16, %v1913_v59  ;;  %v2506_v5 = vadd.f32 1.0, %v5134_v8  ;;  %v2018_v22 = vmul.f32 0.5, %v7567_v49  ;;  %v2218_v41 = vmul.f32 0.70710677, %v7635_v53 }
 0x205   :  { %3780 = vst.msk [vmem:[%s7804_s3 + $0x2ec] sm:$0xf] %vm3592_vm1, %v4374_v50  ;;  %v2797_v15 = vmul.f32 %v2601_v24, %v2013_v20  ;;  %v1916_v26 = vmul.f32 0.5, %v7571_v47  ;;  %5149 = verf.f32 %v2118_v61  ;;  %v2116_v7 = vmul.f32 0.70710677, %v7643_v54 }
 0x206   :  { %v5136_v45 = vpop.eup %5135  ;;  %v4272_v34 = vpack.c.bf16 %v2697_v43, %v2697_v43  ;;  %v2702_v4 = vmul.f32 %v2506_v5, %v1918_v11  ;;  %5151 = verf.f32 %v2218_v41  ;;  %v2216_v49 = vmul.f32 0.70710677, %v7646_v60 }
 0x207   :  { %v5138_v17 = vpop.eup %5137  ;;  %v4372_v28 = vpack.c.bf16 %v2797_v15, %v2797_v15  ;;  %v2606_v58 = vadd.f32 1.0, %v5136_v45  ;;  %5153 = verf.f32 %v2116_v7  ;;  %v7665_v0 = vadd.f32 %v7401_v3, %v7603_v21 }
 0x208   :  { %v5140_v47 = vpop.eup %5139  ;;  %3678 = vst.msk [vmem:[%s7804_s3 + $0x154] sm:$0xf] %vm3592_vm1, %v4272_v34  ;;  %v4277_v27 = vpack.c.bf16 %v2702_v4, %v2702_v4  ;;  %v2504_v36 = vadd.f32 1.0, %v5138_v17  ;;  %5155 = verf.f32 %v2216_v49  ;;  %v7672_v48 = vadd.f32 %v7401_v3, %v4679_v32 }
 0x209   :  { %3778 = vst.msk [vmem:[%s7804_s3 + $0x2e4] sm:$0xf] %vm3592_vm1, %v4372_v28  ;;  %v2802_v42 = vmul.f32 %v2606_v58, %v2018_v22  ;;  %v2016_v35 = vmul.f32 0.5, %v7574_v40  ;;  %v2604_v21 = vadd.f32 1.0, %v5140_v47  ;;  %v2119_v63 = vmul.f32 0.70710677, %v7665_v0 }
 0x20a   :  { %v5142_v62 = vpop.eup %5141  ;;  %3683 = vst.msk [vmem:[%s7804_s3 + $0x168] sm:$0xf] %vm3592_vm1, %v4277_v27  ;;  %v2700_v12 = vmul.f32 %v2504_v36, %v1916_v26  ;;  %v1919_v19 = vmul.f32 0.5, %v7592_v37  ;;  %v2219_v18 = vmul.f32 0.70710677, %v7672_v48  ;;  %v7687_v33 = vadd.f32 %v7401_v3, %v1416_v25 }
 0x20b   :  { %v5144_v56 = vpop.eup %5143  ;;  %v4377_v40 = vpack.c.bf16 %v2802_v42, %v2802_v42  ;;  %v2800_v46 = vmul.f32 %v2604_v21, %v2016_v35  ;;  %v2507_v30 = vadd.f32 1.0, %v5142_v62  ;;  %5157 = verf.f32 %v2119_v63 }
 0x20c   :  { %v4275_v55 = vpack.c.bf16 %v2700_v12, %v2700_v12  ;;  %v2019_v59 = vmul.f32 0.5, %v7595_v2  ;;  %v2607_v51 = vadd.f32 1.0, %v5144_v56  ;;  %5159 = verf.f32 %v2219_v18 }
 0x20d   :  { %3783 = vst.msk [vmem:[%s7804_s3 + $0x2f8] sm:$0xf] %vm3592_vm1, %v4377_v40  ;;  %v4375_v37 = vpack.c.bf16 %v2800_v46, %v2800_v46  ;;  %v2703_v38 = vmul.f32 %v2507_v30, %v1919_v19  ;;  %v2117_v25 = vmul.f32 0.70710677, %v7687_v33  ;;  %v7696_v6 = vadd.f32 %v7401_v3, %v1816_v9 }
 0x20e   :  { %v5146_v31 = vpop.eup %5145  ;;  %3681 = vst.msk [vmem:[%s7804_s3 + $0x160] sm:$0xf] %vm3592_vm1, %v4275_v55  ;;  %v2803_v2 = vmul.f32 %v2607_v51, %v2019_v59  ;;  %v7703_v52 = vadd.f32 %v7401_v3, %v4582_v13  ;;  %v7706_v39 = vadd.f32 %v7401_v3, %v1429_v14  ;;  %v7709_v20 = vadd.f32 %v7401_v3, %v4583_v44  ;;  %v1432_v13 = vpop.f32.mrf.mxu0 }
 0x20f   :  { %v5148_v57 = vpop.eup %5147  ;;  %3781 = vst.msk [vmem:[%s7804_s3 + $0x2f0] sm:$0xf] %vm3592_vm1, %v4375_v37  ;;  %v4278_v23 = vpack.c.bf16 %v2703_v38, %v2703_v38  ;;  %v1917_v16 = vmul.f32 0.5, %v7613_v29  ;;  %v2505_v8 = vadd.f32 1.0, %v5146_v31  ;;  %5161 = verf.f32 %v2117_v25 }
 0x210   :  { %v4378_v50 = vpack.c.bf16 %v2803_v2, %v2803_v2  ;;  %v2017_v24 = vmul.f32 0.5, %v7616_v10  ;;  %v2605_v11 = vadd.f32 1.0, %v5148_v57  ;;  %v2217_v61 = vmul.f32 0.70710677, %v7696_v6 }
 0x211   :  { %3684 = vst.msk [vmem:[%s7804_s3 + $0x16c] sm:$0xf] %vm3592_vm1, %v4278_v23  ;;  %v2701_v43 = vmul.f32 %v2505_v8, %v1917_v16  ;;  %v2122_v5 = vmul.f32 0.70710677, %v7703_v52  ;;  %v2120_v22 = vmul.f32 0.70710677, %v7706_v39  ;;  %v7731_v45 = vadd.f32 %v7401_v3, %v1432_v13 }
 0x212   :  { %v5150_v29 = vpop.eup %5149  ;;  %3784 = vst.msk [vmem:[%s7804_s3 + $0x2fc] sm:$0xf] %vm3592_vm1, %v4378_v50  ;;  %v2801_v10 = vmul.f32 %v2605_v11, %v2017_v24  ;;  %v1922_v41 = vmul.f32 0.5, %v7632_v1  ;;  %5163 = verf.f32 %v2217_v61  ;;  %v2123_v15 = vmul.f32 0.70710677, %v7709_v20 }
 0x213   :  { %v5152_v26 = vpop.eup %5151  ;;  %v4276_v7 = vpack.c.bf16 %v2701_v43, %v2701_v43  ;;  %v2510_v32 = vadd.f32 1.0, %v5150_v29  ;;  %5165 = verf.f32 %v2122_v5  ;;  %v2022_v49 = vmul.f32 0.5, %v7635_v53 }
 0x214   :  { %v5154_v34 = vpop.eup %5153  ;;  %v4376_v4 = vpack.c.bf16 %v2801_v10, %v2801_v10  ;;  %v2610_v17 = vadd.f32 1.0, %v5152_v26  ;;  %5167 = verf.f32 %v2120_v22  ;;  %v1920_v58 = vmul.f32 0.5, %v7643_v54 }
 0x215   :  { %v5156_v28 = vpop.eup %5155  ;;  %3682 = vst.msk [vmem:[%s7804_s3 + $0x164] sm:$0xf] %vm3592_vm1, %v4276_v7  ;;  %v2706_v1 = vmul.f32 %v2510_v32, %v1922_v41  ;;  %v2508_v14 = vadd.f32 1.0, %v5154_v34  ;;  %5169 = verf.f32 %v2123_v15  ;;  %v2020_v53 = vmul.f32 0.5, %v7646_v60 }
 0x216   :  { %3782 = vst.msk [vmem:[%s7804_s3 + $0x2f4] sm:$0xf] %vm3592_vm1, %v4376_v4  ;;  %v2806_v3 = vmul.f32 %v2610_v17, %v2022_v49  ;;  %v2608_v47 = vadd.f32 1.0, %v5156_v28  ;;  %v2121_v27 = vmul.f32 0.70710677, %v7731_v45  ;;  %v1923_v12 = vmul.f32 0.5, %v7665_v0 }
 0x217   :  { %v4281_v36 = vpack.c.bf16 %v2706_v1, %v2706_v1  ;;  %v2704_v42 = vmul.f32 %v2508_v14, %v1920_v58  ;;  %v2023_v18 = vmul.f32 0.5, %v7672_v48  ;;  %v1921_v30 = vmul.f32 0.5, %v7687_v33 }
 0x218   :  { %v5158_v35 = vpop.eup %5157  ;;  %v4381_v21 = vpack.c.bf16 %v2806_v3, %v2806_v3  ;;  %v2804_v63 = vmul.f32 %v2608_v47, %v2020_v53  ;;  %5171 = verf.f32 %v2121_v27  ;;  %v2021_v37 = vmul.f32 0.5, %v7696_v6 }
 0x219   :  { %v5160_v54 = vpop.eup %5159  ;;  %3687 = vst.msk [vmem:[%s7804_s3 + $0x178] sm:$0xf] %vm3592_vm1, %v4281_v36  ;;  %v4279_v62 = vpack.c.bf16 %v2704_v42, %v2704_v42  ;;  %v2511_v19 = vadd.f32 1.0, %v5158_v35  ;;  %v1926_v31 = vmul.f32 0.5, %v7703_v52  ;;  %v1924_v16 = vmul.f32 0.5, %v7706_v39 }
 0x21a   :  { %3787 = vst.msk [vmem:[%s7804_s3 + $0x308] sm:$0xf] %vm3592_vm1, %v4381_v21  ;;  %v4379_v60 = vpack.c.bf16 %v2804_v63, %v2804_v63  ;;  %v2611_v9 = vadd.f32 1.0, %v5160_v54  ;;  %v1927_v24 = vmul.f32 0.5, %v7709_v20  ;;  %v1925_v5 = vmul.f32 0.5, %v7731_v45 }
 0x21b   :  { %3685 = vst.msk [vmem:[%s7804_s3 + $0x170] sm:$0xf] %vm3592_vm1, %v4279_v62  ;;  %v2707_v56 = vmul.f32 %v2511_v19, %v1923_v12 }
 0x21c   :  { %v5162_v40 = vpop.eup %5161  ;;  %3785 = vst.msk [vmem:[%s7804_s3 + $0x300] sm:$0xf] %vm3592_vm1, %v4379_v60  ;;  %v2807_v0 = vmul.f32 %v2611_v9, %v2023_v18 }
 0x21d   :  { %v4282_v46 = vpack.c.bf16 %v2707_v56, %v2707_v56  ;;  %v2509_v44 = vadd.f32 1.0, %v5162_v40 }
 0x21e   :  { %v4382_v55 = vpack.c.bf16 %v2807_v0, %v2807_v0 }
 0x21f   :  { %v5164_v48 = vpop.eup %5163  ;;  %3688 = vst.msk [vmem:[%s7804_s3 + $0x17c] sm:$0xf] %vm3592_vm1, %v4282_v46  ;;  %v2705_v59 = vmul.f32 %v2509_v44, %v1921_v30 }
 0x220   :  { %v5166_v51 = vpop.eup %5165  ;;  %3788 = vst.msk [vmem:[%s7804_s3 + $0x30c] sm:$0xf] %vm3592_vm1, %v4382_v55  ;;  %v2609_v38 = vadd.f32 1.0, %v5164_v48 }
 0x221   :  { %v5168_v25 = vpop.eup %5167  ;;  %v4280_v33 = vpack.c.bf16 %v2705_v59, %v2705_v59  ;;  %v2514_v2 = vadd.f32 1.0, %v5166_v51 }
 0x222   :  { %v5170_v57 = vpop.eup %5169  ;;  %v2805_v23 = vmul.f32 %v2609_v38, %v2021_v37  ;;  %v2512_v8 = vadd.f32 1.0, %v5168_v25 }
 0x223   :  { %3686 = vst.msk [vmem:[%s7804_s3 + $0x174] sm:$0xf] %vm3592_vm1, %v4280_v33  ;;  %v2710_v50 = vmul.f32 %v2514_v2, %v1926_v31  ;;  %v2515_v6 = vadd.f32 1.0, %v5170_v57 }
 0x224   :  { %v4380_v11 = vpack.c.bf16 %v2805_v23, %v2805_v23  ;;  %v2708_v61 = vmul.f32 %v2512_v8, %v1924_v16 }
 0x225   :  { %v5172_v13 = vpop.eup %5171  ;;  %v4285_v43 = vpack.c.bf16 %v2710_v50, %v2710_v50  ;;  %v2711_v52 = vmul.f32 %v2515_v6, %v1927_v24 }
 0x226   :  { %3786 = vst.msk [vmem:[%s7804_s3 + $0x304] sm:$0xf] %vm3592_vm1, %v4380_v11  ;;  %v4283_v39 = vpack.c.bf16 %v2708_v61, %v2708_v61  ;;  %v2513_v22 = vadd.f32 1.0, %v5172_v13 }
 0x227   :  { %3691 = vst.msk [vmem:[%s7804_s3 + $0x188] sm:$0xf] %vm3592_vm1, %v4285_v43  ;;  %v4286_v20 = vpack.c.bf16 %v2711_v52, %v2711_v52 }
 0x228   :  { %3689 = vst.msk [vmem:[%s7804_s3 + $0x180] sm:$0xf] %vm3592_vm1, %v4283_v39  ;;  %v2709_v29 = vmul.f32 %v2513_v22, %v1925_v5 }
 0x229   :  { %3692 = vst.msk [vmem:[%s7804_s3 + $0x18c] sm:$0xf] %vm3592_vm1, %v4286_v20 }
 0x22a   :  { %v4284_v10 = vpack.c.bf16 %v2709_v29, %v2709_v29 }
 0x22c   :  { %3690 = vst.msk [vmem:[%s7804_s3 + $0x184] sm:$0xf] %vm3592_vm1, %v4284_v10 }

// kernel: mhd_image_processor.3
= control target key start
LH: loop header
LB: loop body
LE: loop exit
PB: predicated region body
PF: predicated region fallthrough
CT: control target
= control target key end

     0   :  { %10 = vsyncpa [#allocation4], 0  ;;  %s1603_s18 = smov 0   ;;  %s1605_s19 = smov 0   ;;  %s1874_s0 = inlined_call_operand.vmem [shape: bf16[49,8,1024], index: 0, kind: input, shape index: {}]   ;;  %s1875_s1 = inlined_call_operand.vmem [shape: bf16[1024,128], index: 1, kind: input, shape index: {}]   ;;  %s1876_s2 = inlined_call_operand.vmem [shape: f32[1,128], index: 2, kind: input, shape index: {}]   ;;  %s1877_s3 = inlined_call_operand.vmem [shape: bf16[49,128,128], index: 3, kind: input, shape index: {}]   ;;  %s1878_s4 = inlined_call_operand.vmem [shape: f32[1,128], index: 4, kind: input, shape index: {}]   ;;  %s1879_s5 = inlined_call_operand.hbm [shape: f32[8,128], index: 5, kind: output, shape index: {}]  }
   0x1   :  { %s1607_s20 = smov 0  }
   0x2 LB: > { %s1186_s21 = sadd.s32 4294967295, %s1567_s20   ;;  %s25_s22 = sadd.s32 1, %s1563_s19  ;;  %s1567_s20 = sphi %s1607_s20, %s16_s20   ;;  %s1563_s19 = sphi %s1605_s19, %s1882_s19   ;;  %s1559_s18 = sphi %s1603_s18, %s1881_s18  }
   0x3   : > { %p26_p0 = scmp.ge.s32.totalorder %s25_s22, 49  ;;  %p1189_p1 = scmp.ge.s32.totalorder %s1567_s20, 1 }
   0x4   : > { %p216_p2 = scmp.lt.s32.totalorder %s1567_s20, 50 }
   0x5   : > { %s1884_s22 = smov (%p26_p0, %s25_s22), 0 }
   0x6   : > { %p217_p3 = pnand %p1189_p1, %p216_p2 }
   0x7   : > { %p248_p4 = scmp.lt.s32.totalorder (!%p217_p3), %s1559_s18, 48  ;;  %p1194_p5 = scmp.ne.s32.totalorder (!%p217_p3), %s1559_s18, 0 }
   0x8   : > { %220 = sbr.rel (%p217_p3) target bundleno = 531 (0x213), region = 40 }
   0xd   : > { %s249_s23 = scalar_select %p248_p4, %s1559_s18, 48 }
   0xe   : > { %266 = sbr.rel (%p1194_p5) target bundleno = 21 (0x15), region = 44 }
   0xf   : > { %s1282_s24 = sshll.u32 %s249_s23, 5  ;;  %s1283_s25 = sshll.u32 %s249_s23, 6 }
  0x10   : > { %s1629_s28 = scalar_lea.vmem %s1874_s0, %s1282_s24  ;;  %s1634_s6 = scalar_lea.vmem %s1877_s3, %s1283_s25 }
  0x13   : > { %v1569_v0 = vmov 0.0  }
  0x14   : > { %267 = vst [vmem:[#allocation2] sm:$0xff] %v1569_v0 }
  0x15 PF: > { %v1435_v1 = vld [vmem:[%s1875_s1 + $0x78] sm:$0xff]   ;;  %v1439_v5 = vld [vmem:[%s1875_s1 + $0x70] sm:$0xff]   ;;  %v1443_v9 = vld [vmem:[%s1875_s1 + $0x68] sm:$0xff]   ;;  %vm1571_vm0 = vmmov 0   ;;  %p1276_p6 = scmp.ne.s32.totalorder %s1559_s18, 48 }
  0x16   : > { %v1436_v2 = vld [vmem:[%s1875_s1 + $0xf8] sm:$0xff]   ;;  %1284 = vmatprep.subr.bf16.mxu0 %v1435_v1  ;;  %v1440_v6 = vld [vmem:[%s1875_s1 + $0xf0] sm:$0xff]   ;;  %v1444_v10 = vld [vmem:[%s1875_s1 + $0xe8] sm:$0xff]  }
  0x17   : > { %v1437_v3 = vld [vmem:[%s1875_s1 + $0x38] sm:$0xff]   ;;  %1306 = vmatprep.subr.bf16.mxu1 %v1436_v2  ;;  %v1441_v7 = vld [vmem:[%s1875_s1 + $0x30] sm:$0xff]   ;;  %v1445_v11 = vld [vmem:[%s1875_s1 + $0x28] sm:$0xff]  }
  0x18   : > { %v1438_v4 = vld [vmem:[%s1875_s1 + $0xb8] sm:$0xff]   ;;  %1285 = vmatpush3.bf16.msra.mxu0 %v1437_v3  ;;  %v1442_v8 = vld [vmem:[%s1875_s1 + $0xb0] sm:$0xff]   ;;  %v1446_v12 = vld [vmem:[%s1875_s1 + $0xa8] sm:$0xff]  }
  0x19   : > { %1307 = vmatpush3.bf16.msra.mxu1 %v1438_v4  ;;  %1286 = vmatprep.subr.bf16.mxu0 %v1439_v5  ;;  %v1447_v13 = vld [vmem:[%s1875_s1 + $0x60] sm:$0xff]   ;;  %v1451_v17 = vld [vmem:[%s1875_s1 + $0x58] sm:$0xff]   ;;  %v1455_v21 = vld [vmem:[%s1875_s1 + $0x50] sm:$0xff]  }
  0x1a   : > { %1308 = vmatprep.subr.bf16.mxu1 %v1440_v6  ;;  %v1448_v14 = vld [vmem:[%s1875_s1 + $0xe0] sm:$0xff]   ;;  %v1452_v18 = vld [vmem:[%s1875_s1 + $0xd8] sm:$0xff]   ;;  %v1456_v22 = vld [vmem:[%s1875_s1 + $0xd0] sm:$0xff]  }
  0x1b   : > { %v1449_v15 = vld [vmem:[%s1875_s1 + $0x20] sm:$0xff]   ;;  %v1453_v19 = vld [vmem:[%s1875_s1 + $0x18] sm:$0xff]   ;;  %v1457_v23 = vld [vmem:[%s1875_s1 + $0x10] sm:$0xff]  }
  0x1c   : > { %1287 = vmatpush3.bf16.msra.mxu0 %v1441_v7  ;;  %v1450_v16 = vld [vmem:[%s1875_s1 + $0xa0] sm:$0xff]   ;;  %v1454_v20 = vld [vmem:[%s1875_s1 + $0x98] sm:$0xff]   ;;  %v1458_v24 = vld [vmem:[%s1875_s1 + $0x90] sm:$0xff]  }
  0x1d   : > { %1309 = vmatpush3.bf16.msra.mxu1 %v1442_v8  ;;  %1288 = vmatprep.subr.bf16.mxu0 %v1443_v9  ;;  %v1459_v25 = vld [vmem:[%s1875_s1 + $0x48] sm:$0xff]   ;;  %v1463_v29 = vld [vmem:[%s1875_s1 + $0x40] sm:$0xff]   ;;  %v1471_v39 = vld [vmem:[%s1875_s1 + $0x178] sm:$0xff]  }
  0x1e   : > { %1310 = vmatprep.subr.bf16.mxu1 %v1444_v10  ;;  %v1460_v26 = vld [vmem:[%s1875_s1 + $0xc8] sm:$0xff]   ;;  %v1464_v30 = vld [vmem:[%s1875_s1 + $0xc0] sm:$0xff]   ;;  %v1472_v40 = vld [vmem:[%s1875_s1 + $0x1f8] sm:$0xff]  }
  0x1f   : > { %v1461_v27 = vld [vmem:[%s1875_s1 + $0x8] sm:$0xff]   ;;  %v1465_v31 = vld [vmem:[%s1875_s1] sm:$0xff]   ;;  %v1473_v41 = vld [vmem:[%s1875_s1 + $0x138] sm:$0xff]  }
  0x20   : > { %1289 = vmatpush3.bf16.msra.mxu0 %v1445_v11  ;;  %v1462_v28 = vld [vmem:[%s1875_s1 + $0x88] sm:$0xff]   ;;  %v1466_v32 = vld [vmem:[%s1875_s1 + $0x80] sm:$0xff]   ;;  %v1474_v42 = vld [vmem:[%s1875_s1 + $0x1b8] sm:$0xff]  }
  0x21   : > { %1311 = vmatpush3.bf16.msra.mxu1 %v1446_v12  ;;  %1290 = vmatprep.subr.bf16.mxu0 %v1447_v13  ;;  %v268_v33 = vld [vmem:[%s1629_s28] sm:$0xff]  ;;  %v269_v34 = vld [vmem:[%s1629_s28 + $0x8] sm:$0xff]  ;;  %v1475_v43 = vld [vmem:[%s1875_s1 + $0x170] sm:$0xff]   ;;  %v1570_v13 = vmov 0.0  }
  0x22   : > { %1312 = vmatprep.subr.bf16.mxu1 %v1448_v14  ;;  %v1196_v35 = vcombine.low %v268_v33, %v268_v33  ;;  %v1197_v36 = vcombine.high %v268_v33, %v268_v33  ;;  %v1198_v37 = vcombine.low %v269_v34, %v269_v34  ;;  %v1199_v38 = vcombine.high %v269_v34, %v269_v34  ;;  %v1476_v44 = vld [vmem:[%s1875_s1 + $0x1f0] sm:$0xff]   ;;  %v1479_v47 = vld [vmem:[%s1875_s1 + $0x168] sm:$0xff]   ;;  %v1483_v51 = vld [vmem:[%s1875_s1 + $0x160] sm:$0xff]  }
  0x23   : > { %v1477_v45 = vld [vmem:[%s1875_s1 + $0x130] sm:$0xff]   ;;  %v1480_v48 = vld [vmem:[%s1875_s1 + $0x1e8] sm:$0xff]   ;;  %v1484_v52 = vld [vmem:[%s1875_s1 + $0x1e0] sm:$0xff]  }
  0x24   : > { %1291 = vmatpush3.bf16.msra.mxu0 %v1449_v15  ;;  %851 = vmatprep.mubr.bf16.mxu0 %v1197_v36  ;;  %v1478_v46 = vld [vmem:[%s1875_s1 + $0x1b0] sm:$0xff]   ;;  %v1481_v49 = vld [vmem:[%s1875_s1 + $0x128] sm:$0xff]   ;;  %v1485_v53 = vld [vmem:[%s1875_s1 + $0x120] sm:$0xff]  }
  0x25   : > { %1313 = vmatpush3.bf16.msra.mxu1 %v1450_v16  ;;  %1292 = vmatprep.subr.bf16.mxu0 %v1451_v17  ;;  %v1482_v50 = vld [vmem:[%s1875_s1 + $0x1a8] sm:$0xff]   ;;  %v1486_v54 = vld [vmem:[%s1875_s1 + $0x1a0] sm:$0xff]   ;;  %v1487_v55 = vld [vmem:[%s1875_s1 + $0x158] sm:$0xff]  }
  0x26   : > { %1314 = vmatprep.subr.bf16.mxu1 %v1452_v18  ;;  %891 = vmatprep.mubr.bf16.mxu1 %v1199_v38  ;;  %v1488_v56 = vld [vmem:[%s1875_s1 + $0x1d8] sm:$0xff]   ;;  %v1491_v59 = vld [vmem:[%s1875_s1 + $0x150] sm:$0xff]   ;;  %v1495_v63 = vld [vmem:[%s1875_s1 + $0x148] sm:$0xff]  }
  0x27   : > { %v1489_v57 = vld [vmem:[%s1875_s1 + $0x118] sm:$0xff]   ;;  %v1492_v60 = vld [vmem:[%s1875_s1 + $0x1d0] sm:$0xff]   ;;  %v1496_v0 = vld [vmem:[%s1875_s1 + $0x1c8] sm:$0xff]  }
  0x28   : > { %1293 = vmatpush3.bf16.msra.mxu0 %v1453_v19  ;;  %v1490_v58 = vld [vmem:[%s1875_s1 + $0x198] sm:$0xff]   ;;  %v1493_v61 = vld [vmem:[%s1875_s1 + $0x110] sm:$0xff]   ;;  %v1497_v1 = vld [vmem:[%s1875_s1 + $0x108] sm:$0xff]  }
  0x29   : > { %1315 = vmatpush3.bf16.msra.mxu1 %v1454_v20  ;;  %1294 = vmatprep.subr.bf16.mxu0 %v1455_v21  ;;  %v1494_v62 = vld [vmem:[%s1875_s1 + $0x190] sm:$0xff]   ;;  %v1498_v2 = vld [vmem:[%s1875_s1 + $0x188] sm:$0xff]   ;;  %v1499_v3 = vld [vmem:[%s1875_s1 + $0x140] sm:$0xff]  }
  0x2a   : > { %1316 = vmatprep.subr.bf16.mxu1 %v1456_v22  ;;  %v1500_v4 = vld [vmem:[%s1875_s1 + $0x1c0] sm:$0xff]   ;;  %v270_v7 = vld [vmem:[%s1629_s28 + $0x10] sm:$0xff]  ;;  %v271_v10 = vld [vmem:[%s1629_s28 + $0x18] sm:$0xff] }
  0x2b   : > { %v1501_v5 = vld [vmem:[%s1875_s1 + $0x100] sm:$0xff]   ;;  %v1200_v8 = vcombine.low %v270_v7, %v270_v7  ;;  %v1201_v9 = vcombine.high %v270_v7, %v270_v7  ;;  %v1202_v11 = vcombine.low %v271_v10, %v271_v10  ;;  %v1203_v12 = vcombine.high %v271_v10, %v271_v10  ;;  %v1507_v14 = vld [vmem:[%s1634_s6 + $0x38] sm:$0xff]   ;;  %v1508_v15 = vld [vmem:[%s1634_s6 + $0x30] sm:$0xff]  }
  0x2c   : > { %1295 = vmatpush3.bf16.msra.mxu0 %v1457_v23  ;;  %v1502_v6 = vld [vmem:[%s1875_s1 + $0x180] sm:$0xff]   ;;  %v1509_v16 = vld [vmem:[%s1634_s6 + $0x28] sm:$0xff]   ;;  %v1511_v18 = vld [vmem:[%s1634_s6 + $0x18] sm:$0xff]  }
  0x2d   : > { %1317 = vmatpush3.bf16.msra.mxu1 %v1458_v24  ;;  %1296 = vmatprep.subr.bf16.mxu0 %v1459_v25  ;;  %v1510_v17 = vld [vmem:[%s1634_s6 + $0x20] sm:$0xff]   ;;  %v1512_v19 = vld [vmem:[%s1634_s6 + $0x10] sm:$0xff]   ;;  %v1513_v20 = vld [vmem:[%s1634_s6 + $0x8] sm:$0xff]  }
  0x2e   : > { %1318 = vmatprep.subr.bf16.mxu1 %v1460_v26  ;;  %v1514_v21 = vld [vmem:[%s1634_s6] sm:$0xff]  }
  0x30   : > { %1297 = vmatpush3.bf16.msra.mxu0 %v1461_v27 }
  0x31   : > { %1319 = vmatpush3.bf16.msra.mxu1 %v1462_v28  ;;  %1298 = vmatprep.subr.bf16.mxu0 %v1463_v29 }
  0x32   : > { %1320 = vmatprep.subr.bf16.mxu1 %v1464_v30 }
  0x34   : > { %1299 = vmatpush3.bf16.msra.mxu0 %v1465_v31  ;;  %v1195_v31 = vld [vmem:[%s1876_s2] ss:$0 sm:$0xff] }
  0x35   : > { %1321 = vmatpush3.bf16.msra.mxu1 %v1466_v32  ;;  %1328 = vmatprep.subr.bf16.mxu0 %v1471_v39 }
  0x36   : > { %1350 = vmatprep.subr.bf16.mxu1 %v1472_v40 }
  0x37   : > { %852 = vmatmul.mubr.bf16.vlgmr.msra.gmra.mxu0 %v1196_v35 }
  0x38   : > { %892 = vmatmul.mubr.bf16.vlgmr.msra.gmra.mxu1 %v1198_v37  ;;  %1329 = vmatpush3.bf16.msra.mxu0 %v1473_v41 }
  0x39   : > { %1351 = vmatpush3.bf16.msra.mxu1 %v1474_v42  ;;  %1330 = vmatprep.subr.bf16.mxu0 %v1475_v43 }
  0x3a   : > { %1352 = vmatprep.subr.bf16.mxu1 %v1476_v44  ;;  %931 = vmatprep.mubr.bf16.mxu0 %v1201_v9 }
  0x3b   : > { %971 = vmatprep.mubr.bf16.mxu1 %v1203_v12 }
  0x3c   : > { %1331 = vmatpush3.bf16.msra.mxu0 %v1477_v45 }
  0x3d   : > { %1353 = vmatpush3.bf16.msra.mxu1 %v1478_v46  ;;  %1332 = vmatprep.subr.bf16.mxu0 %v1479_v47 }
  0x3e   : > { %1354 = vmatprep.subr.bf16.mxu1 %v1480_v48 }
  0x40   : > { %1333 = vmatpush3.bf16.msra.mxu0 %v1481_v49 }
  0x41   : > { %1355 = vmatpush3.bf16.msra.mxu1 %v1482_v50  ;;  %1334 = vmatprep.subr.bf16.mxu0 %v1483_v51 }
  0x42   : > { %1356 = vmatprep.subr.bf16.mxu1 %v1484_v52 }
  0x44   : > { %1335 = vmatpush3.bf16.msra.mxu0 %v1485_v53  ;;  %v984_v53 = vld [vmem:[#allocation2] sm:$0xff] }
  0x45   : > { %1357 = vmatpush3.bf16.msra.mxu1 %v1486_v54  ;;  %1336 = vmatprep.subr.bf16.mxu0 %v1487_v55 }
  0x46   : > { %1358 = vmatprep.subr.bf16.mxu1 %v1488_v56 }
  0x48   : > { %1337 = vmatpush3.bf16.msra.mxu0 %v1489_v57 }
  0x49   : > { %1359 = vmatpush3.bf16.msra.mxu1 %v1490_v58  ;;  %1338 = vmatprep.subr.bf16.mxu0 %v1491_v59 }
  0x4a   : > { %1360 = vmatprep.subr.bf16.mxu1 %v1492_v60 }
  0x4c   : > { %1339 = vmatpush3.bf16.msra.mxu0 %v1493_v61 }
  0x4d   : > { %1361 = vmatpush3.bf16.msra.mxu1 %v1494_v62  ;;  %1340 = vmatprep.subr.bf16.mxu0 %v1495_v63 }
  0x4e   : > { %1362 = vmatprep.subr.bf16.mxu1 %v1496_v0 }
  0x50   : > { %1341 = vmatpush3.bf16.msra.mxu0 %v1497_v1 }
  0x51   : > { %1363 = vmatpush3.bf16.msra.mxu1 %v1498_v2  ;;  %1342 = vmatprep.subr.bf16.mxu0 %v1499_v3 }
  0x52   : > { %1364 = vmatprep.subr.bf16.mxu1 %v1500_v4 }
  0x54   : > { %1343 = vmatpush3.bf16.msra.mxu0 %v1501_v5 }
  0x55   : > { %1365 = vmatpush3.bf16.msra.mxu1 %v1502_v6  ;;  %1381 = vmatprep.subr.bf16.mxu0 %v1570_v13 }
  0x57   : > { %932 = vmatmul.mubr.bf16.vlgmr.msra.gmra.mxu0 %v1200_v8 }
  0x58   : > { %972 = vmatmul.mubr.bf16.vlgmr.msra.gmra.mxu1 %v1202_v11  ;;  %1382 = vmatpush3.bf16.msra.mxu0 %v1507_v14 }
  0x59   : > { %1383 = vmatprep.subr.bf16.mxu0 %v1570_v13  ;;  %1397 = vmatprep.mubr.msk.bf16.mxu0 %vm1571_vm0, %v1570_v13 }
  0x5c   : > { %1384 = vmatpush3.bf16.msra.mxu0 %v1508_v15 }
  0x5d   : > { %1385 = vmatprep.subr.bf16.mxu0 %v1570_v13 }
  0x60   : > { %1386 = vmatpush3.bf16.msra.mxu0 %v1509_v16 }
  0x61   : > { %1387 = vmatprep.subr.bf16.mxu0 %v1570_v13 }
  0x64   : > { %1388 = vmatpush3.bf16.msra.mxu0 %v1510_v17 }
  0x65   : > { %1389 = vmatprep.subr.bf16.mxu0 %v1570_v13 }
  0x68   : > { %1390 = vmatpush3.bf16.msra.mxu0 %v1511_v18 }
  0x69   : > { %1391 = vmatprep.subr.bf16.mxu0 %v1570_v13 }
  0x6c   : > { %1392 = vmatpush3.bf16.msra.mxu0 %v1512_v19 }
  0x6d   : > { %1393 = vmatprep.subr.bf16.mxu0 %v1570_v13 }
  0x70   : > { %1394 = vmatpush3.bf16.msra.mxu0 %v1513_v20 }
  0x71   : > { %1395 = vmatprep.subr.bf16.mxu0 %v1570_v13 }
  0x74   : > { %1396 = vmatpush3.bf16.msra.mxu0 %v1514_v21 }
  0xf7   : > { %v1300_v22 = vpop.f32.mrf.mxu0 }
  0xf8   : > { %v1322_v23 = vpop.f32.mrf.mxu1 }
  0xf9   : > { %v1301_v24 = vpop.f32.mrf.mxu0 }
  0xfa   : > { %v1323_v25 = vpop.f32.mrf.mxu1  ;;  %v1302_v30 = vadd.f32 %v1301_v24, %v1300_v22 }
  0xfb   : > { %v1303_v26 = vpop.f32.mrf.mxu0  ;;  %v1324_v33 = vadd.f32 %v1323_v25, %v1322_v23 }
  0xfc   : > { %v1325_v27 = vpop.f32.mrf.mxu1  ;;  %v854_v32 = vadd.f32 %v1302_v30, %v1195_v31 }
  0xfd   : > { %v1304_v28 = vpop.f32.mrf.mxu0 }
  0xfe   : > { %v1326_v29 = vpop.f32.mrf.mxu1  ;;  %v894_v38 = vadd.f32 %v1324_v33, %v854_v32 }
 0x117   : > { %v1344_v34 = vpop.f32.mrf.mxu0 }
 0x118   : > { %v1366_v35 = vpop.f32.mrf.mxu1 }
 0x119   : > { %v1345_v36 = vpop.f32.mrf.mxu0 }
 0x11a   : > { %v1367_v37 = vpop.f32.mrf.mxu1  ;;  %v1346_v39 = vadd.f32 %v1345_v36, %v1344_v34 }
 0x11b   : > { %v1347_v40 = vpop.f32.mrf.mxu0  ;;  %v1368_v43 = vadd.f32 %v1367_v37, %v1366_v35 }
 0x11c   : > { %v1369_v41 = vpop.f32.mrf.mxu1  ;;  %v934_v42 = vadd.f32 %v1346_v39, %v894_v38 }
 0x11d   : > { %v1348_v44 = vpop.f32.mrf.mxu0 }
 0x11e   : > { %v1370_v45 = vpop.f32.mrf.mxu1  ;;  %v974_v46 = vadd.f32 %v1368_v43, %v934_v42 }
 0x120   : > { %v980_v47 = vmul.f32 0.70710677, %v974_v46  ;;  %v979_v49 = vmul.f32 0.5, %v974_v46 }
 0x122   : > { %1515 = verf.f32 %v980_v47 }
 0x12f   : > { %v1516_v48 = vpop.eup %1515 }
 0x130   : > { %v982_v50 = vadd.f32 1.0, %v1516_v48 }
 0x132   : > { %v983_v51 = vmul.f32 %v982_v50, %v979_v49 }
 0x134   : > { %v985_v52 = vpack.c.bf16 %v983_v51, %v983_v51 }
 0x136   : > { %1398 = vmatmul.mubr.bf16.vlgmr.msra.gmra.mxu0 %v985_v52 }
 0x1f6   : > { %v1084_v54 = vpop.f32.mrf.mxu0 }
 0x1f7   : > { %v1090_v55 = vadd.f32 %v1084_v54, %v984_v53 }
 0x1f8   : > { %v1399_v56 = vpop.f32.mrf.mxu0  ;;  %1095 = sbr.rel (%p1276_p6) target bundleno = 516 (0x204), region = 48 }
 0x1f9   : > { %1091 = vst [vmem:[#allocation2] sm:$0xff] %v1090_v55 }
 0x1fa   : > { %v1087_v57 = vpop.f32.mrf.mxu0 }
 0x1fc   : > { %v1400_v58 = vpop.f32.mrf.mxu0 }
 0x1fd   : > { %v1277_v60 = vld [vmem:[%s1878_s4] ss:$0 sm:$0xff] }
 0x200   : > { %v1096_v59 = vld [vmem:[#allocation2] sm:$0xff] }
 0x201   : > { %v1104_v61 = vadd.f32 %v1277_v60, %v1096_v59 }
 0x203   : > { %1105 = vst [vmem:[#allocation3] sm:$0xff] %v1104_v61 }
 0x204 PF: > { %p1850_p7 = scmp.eq.s32.totalorder %s1186_s21, 48  ;;  %s1572_s12 = smov [#allocation3]  }
 0x205   : > { %s1115_s13 = sshll.u32 %s1572_s12, 4  ;;  %s1116_s13 = int_to_ptr.vmem [resolvable:$true] %s1115_s13 }
 0x206   : > { %s1517_s18 = scalar_lea.vmem %s1116_s13, 128  ;;  %p1524_p11 = scmp.lt.s32.totalorder %s1116_s13, %s1116_s13 }
 0x207   : > { %p1518_p8 = scmp.ne.s32.totalorder %s1116_s13, %s1517_s18  ;;  %p1525_p12 = scmp.lt.s32.totalorder %s1517_s18, %s1517_s18 }
 0x209   : > { %p1519_p9 = pnand %p1518_p8, %p1850_p7  ;;  %p1526_p13 = por %p1525_p12, %p1524_p11 }
 0x20b   : > { %p1520_p10 = pneg %p1519_p9 }
 0x20d   : > { %p1527_p0 = pnand %p1526_p13, %p1520_p10 }
 0x20f   : > { %1530 = shalt.err (!%p1527_p0)
}
 0x210   : > { %1402 = dma.vmem_to_hbm [thread:$0]  (%p1850_p7), %s1116_s13, 128, %s1879_s5, [#allocation4]  }
 0x211   : > { %1554 = dma.done.wait (%p1850_p7), [#allocation4], 128  }
 0x212   : > { %1556 = vsyncadd (%p1850_p7), [#allocation4], 4294967168 }
 0x213 PF: > { %s16_s20 = sadd.s32 1, %s1567_s20   ;;  %s1881_s18 = smov %s1563_s19 }
 0x214   : > { %p13_p1 = scmp.ge.s32.totalorder %s16_s20, 51   ;;  %s1882_s19 = smov %s1884_s22 }
 0x216   :  { %15 = sbr.rel (!%p13_p1) target bundleno = 2 (0x2), region = 79 }
 0x21b   :  { %1128 = vsyncpa [#allocation4], 1 }
 0x21c   :  { %1130 = vsyncpa [#allocation4 + $0x1], 1 }

</bundles_post_ra>
